<compile_context>
chip_gen: v7x
topology: tpu7x:2x2x1
jax: 0.10.0
libtpu: 0.0.40
codegen_flags: <defaults>
</compile_context>

<pallas_src>
import functools
import math

import jax
import jax.numpy as jnp
from jax import lax
from jax.experimental import pallas as pl
from jax.experimental.pallas import tpu as pltpu


def _flash_gqa_kernel(q_ref, k_ref, v_ref, o_ref, kc_ref,
                      m_scr, l_scr, acc_scr,
                      *, scale, group, head_size, tq, tk):
    """One grid step: (kv head h, q tile qi, kv tile ki).

    q_ref : (tq, group*D)   queries of all heads sharing kv head h (lane-dense)
    k_ref : (1, tk, D)      keys of kv head h
    v_ref : (1, tk, D)      values of kv head h
    o_ref : (tq, group*D)   lane-dense output slab
    kc_ref: (2, 1, tk, D)   fused kv-cache tile (0 = key, 1 = value)
    m/l/acc scratch: (group, tq, 1 / 1 / D) f32, resident across the kv axis
    """
    D = head_size
    qi = pl.program_id(1)
    ki = pl.program_id(2)
    nk = pl.num_programs(2)

    # --- init online-softmax state at the start of each kv sweep
    @pl.when(ki == 0)
    def _init():
        m_scr[...] = jnp.full(m_scr.shape, -jnp.inf, dtype=jnp.float32)
        l_scr[...] = jnp.zeros(l_scr.shape, dtype=jnp.float32)
        acc_scr[...] = jnp.zeros(acc_scr.shape, dtype=jnp.float32)

    k = k_ref[0]                       # (tk, D), native dtype (bf16 stays bf16)
    v = v_ref[0]

    # --- fused KV-cache store: K/V tiles are already in VMEM; write them to the
    # cache output only on the first q-tile pass (the cache out_spec pins its block
    # index for qi > 0, so each cache tile is DMA'd back to HBM exactly once).
    @pl.when(qi == 0)
    def _store_kv_cache():
        kc_ref[0, 0] = k
        kc_ref[1, 0] = v

    # --- skip kv tiles that lie entirely above the causal diagonal
    @pl.when(ki * tk < (qi + 1) * tq)
    def _compute():
        # fold the softmax scale into q (tq x group*D muls instead of tq x tk)
        q = q_ref[...] * scale                                  # native dtype

        row = qi * tq + lax.broadcasted_iota(jnp.int32, (tq, tk), 0)
        col = ki * tk + lax.broadcasted_iota(jnp.int32, (tq, tk), 1)
        causal = col <= row

        for g in range(group):                                  # static unroll
            q_g = q[:, g * D:(g + 1) * D]                       # (tq, D)
            # contract last dims directly (no explicit k.T / XLU transpose)
            s = lax.dot_general(q_g, k, (((1,), (1,)), ((), ())),
                                preferred_element_type=jnp.float32)   # (tq, tk) f32
            # scores are f32 here, so -1e30 is a safe mask fill even for bf16 inputs
            s = jnp.where(causal, s, -1e30)

            m_prev = m_scr[g]                                   # (tq, 1)
            m_new = jnp.maximum(m_prev, jnp.max(s, axis=-1, keepdims=True))
            alpha = jnp.exp(m_prev - m_new)
            p = jnp.exp(s - m_new)                              # (tq, tk) f32
            l_scr[g] = alpha * l_scr[g] + jnp.sum(p, axis=-1, keepdims=True)
            acc_scr[g] = alpha * acc_scr[g] + jnp.dot(
                p.astype(v.dtype), v, preferred_element_type=jnp.float32)
            m_scr[g] = m_new

    # --- finalize: normalize and emit one lane-dense (tq, group*D) slab
    @pl.when(ki == nk - 1)
    def _finalize():
        l = l_scr[...]                                          # (group, tq, 1)
        inv = pl.reciprocal(l, approx=True)                     # EUP slot
        inv = inv * (2.0 - l * inv)                             # 1 Newton step -> ~f32 exact
        for g in range(group):
            o_ref[:, g * D:(g + 1) * D] = (acc_scr[g] * inv[g]).astype(o_ref.dtype)


class PallasAttention:
    """Mirror of vllm.attention.layer.Attention (decoder prompt path, 'auto' cache)."""

    def __init__(self, num_heads: int, head_size: int, scale: float,
                 num_kv_heads=None, q_block: int = 128, kv_block: int = 128):
        if num_kv_heads is None:
            num_kv_heads = num_heads
        assert num_heads % num_kv_heads == 0
        self.num_heads = num_heads
        self.num_kv_heads = num_kv_heads
        self.head_size = head_size
        self.scale = scale
        self.q_block = q_block        # re-derive per generation: fits v7x 64 MiB VMEM,
        self.kv_block = kv_block      # can be raised to 512+ on v6e's 128 MiB VMEM.
        self._k_scale = 1.0           # kv-cache quant scales (unused: 'auto' cache dtype)
        self._v_scale = 1.0
        # TODO(synk): alibi_slopes / sliding_window / logits_soft_cap / fp8 kv-cache
        # quantization / paged decode (attn_metadata) paths are not implemented.

    def __call__(self, query, key, value):
        T = query.shape[0]
        H, KVH, D = self.num_heads, self.num_kv_heads, self.head_size
        group = H // KVH

        tq = min(self.q_block, T)
        tk = min(self.kv_block, T)
        assert T % tq == 0 and T % tk == 0, "TODO(synk): pad ragged sequence lengths"
        assert tq % 8 == 0 and tk % 8 == 0
        # lane-dense q/output blocks: each grid step covers one whole GQA group
        assert (group * D) % 128 == 0 or KVH == 1, (
            "group*head_size must be a multiple of 128 for the lane-dense layout")
        # TODO(synk): fallback tiling when group*head_size is not a multiple of 128.

        nq, nk = T // tq, T // tk

        # K/V to head-major (KVH, T, D): group x less data than Q; Q and the output
        # stay in the flattened vLLM (T, H*D) layout -> no big transposes, and the
        # output block is a lane-dense (tq, group*D) slab.
        k_hm = key.reshape(T, KVH, D).transpose(1, 0, 2)
        v_hm = value.reshape(T, KVH, D).transpose(1, 0, 2)

        kernel = functools.partial(
            _flash_gqa_kernel, scale=self.scale, group=group,
            head_size=D, tq=tq, tk=tk)

        grid_spec = pltpu.PrefetchScalarGridSpec(
            num_scalar_prefetch=0,
            grid=(KVH, nq, nk),
            in_specs=[
                pl.BlockSpec((tq, group * D), lambda h, qi, ki: (qi, h)),   # q
                pl.BlockSpec((1, tk, D), lambda h, qi, ki: (h, ki, 0)),     # k
                pl.BlockSpec((1, tk, D), lambda h, qi, ki: (h, ki, 0)),     # v
            ],
            out_specs=(
                pl.BlockSpec((tq, group * D), lambda h, qi, ki: (qi, h)),   # out
                # Cache tile follows ki during the first q-tile pass; afterwards it
                # stays pinned on the last block so no further writebacks happen.
                pl.BlockSpec(
                    (2, 1, tk, D),
                    lambda h, qi, ki: (0, h, jnp.where(qi == 0, ki, nk - 1), 0)),
            ),
            scratch_shapes=[
                pltpu.VMEM((group, tq, 1), jnp.float32),   # m
                pltpu.VMEM((group, tq, 1), jnp.float32),   # l
                pltpu.VMEM((group, tq, D), jnp.float32),   # acc
            ],
        )

        out, kv_cache = pl.pallas_call(
            kernel,
            out_shape=(
                jax.ShapeDtypeStruct((T, H * D), query.dtype),
                jax.ShapeDtypeStruct((2, KVH, T, D), key.dtype),
            ),
            grid_spec=grid_spec,
            compiler_params=pltpu.CompilerParams(
                # kv-head axis shards across TensorCores (v7x); q/kv tile axes stay
                # on-core because the online softmax state and the single-shot
                # kv-cache write need one head's whole (qi, ki) sweep on one core.
                dimension_semantics=("parallel", "arbitrary", "arbitrary"),
                vmem_limit_bytes=64 * 1024 * 1024,
            ),
        )(query, k_hm, v_hm)

        return out, kv_cache


def _reference(query, key, value, num_heads, num_kv_heads, head_size, scale):
    T = query.shape[0]
    q = query.reshape(T, num_heads, head_size).transpose(1, 0, 2).astype(jnp.float32)
    k = key.reshape(T, num_kv_heads, head_size).transpose(1, 0, 2).astype(jnp.float32)
    v = value.reshape(T, num_kv_heads, head_size).transpose(1, 0, 2).astype(jnp.float32)
    group = num_heads // num_kv_heads
    k = jnp.repeat(k, group, axis=0)
    v = jnp.repeat(v, group, axis=0)
    s = jnp.einsum("hqd,hkd->hqk", q, k) * scale
    mask = jnp.tril(jnp.ones((T, T), dtype=bool))
    s = jnp.where(mask[None], s, -1e30)
    p = jax.nn.softmax(s, axis=-1)
    o = jnp.einsum("hqk,hkd->hqd", p, v)
    return o.transpose(1, 0, 2).reshape(T, num_heads * head_size)


if __name__ == "__main__":
    # Small but tile-consistent shapes: T=256 tokens, 4 query heads, 2 kv heads,
    # head_size=64 (group*head_size = 128 -> lane-dense q/output blocks).
    num_heads, num_kv_heads, head_size, T = 4, 2, 64, 256
    scale = 1.0 / math.sqrt(head_size)

    key0 = jax.random.PRNGKey(0)
    kq, kk, kv = jax.random.split(key0, 3)
    query = jax.random.normal(kq, (T, num_heads * head_size), dtype=jnp.float32)
    key_t = jax.random.normal(kk, (T, num_kv_heads * head_size), dtype=jnp.float32)
    value = jax.random.normal(kv, (T, num_kv_heads * head_size), dtype=jnp.float32)

    attn = PallasAttention(num_heads, head_size, scale, num_kv_heads,
                           q_block=128, kv_block=128)
    out, kv_cache = attn(query, key_t, value)
    out = jax.block_until_ready(out)
    kv_cache = jax.block_until_ready(kv_cache)

    ref = _reference(query, key_t, value, num_heads, num_kv_heads, head_size, scale)
    assert out.shape == (T, num_heads * head_size)
    assert kv_cache.shape == (2, num_kv_heads, T, head_size)
    assert jnp.allclose(out, ref, atol=1e-3, rtol=1e-3), "attention mismatch"
    assert jnp.allclose(
        kv_cache[0],
        key_t.reshape(T, num_kv_heads, head_size).transpose(1, 0, 2)), "k cache mismatch"
    assert jnp.allclose(
        kv_cache[1],
        value.reshape(T, num_kv_heads, head_size).transpose(1, 0, 2)), "v cache mismatch"

    print("KERNEL_OK")
</pallas_src>

<mosaic_0001>
module attributes {stable_mosaic.version = 11 : i64} {
  func.func @_flash_gqa_kernel(%arg0: i32, %arg1: i32, %arg2: i32, %arg3: memref<128x128xf32, #tpu.memory_space<vmem>>, %arg4: memref<1x128x64xf32, #tpu.memory_space<vmem>>, %arg5: memref<1x128x64xf32, #tpu.memory_space<vmem>>, %arg6: memref<128x128xf32, #tpu.memory_space<vmem>>, %arg7: memref<2x1x128x64xf32, #tpu.memory_space<vmem>>, %arg8: memref<2x128x1xf32, #tpu.memory_space<vmem>>, %arg9: memref<2x128x1xf32, #tpu.memory_space<vmem>>, %arg10: memref<2x128x64xf32, #tpu.memory_space<vmem>>) attributes {dimension_semantics = [#tpu.dimension_semantics<parallel>, #tpu.dimension_semantics<arbitrary>, #tpu.dimension_semantics<arbitrary>], iteration_bounds = array<i64: 2, 2, 2>, scalar_prefetch = 0 : i64, scratch_operands = 3 : i64, tpu.core_type = #tpu.core_type<tc>, window_params = [{transform_indices = @transform_0, window_bounds = array<i64: 128, 128>}, {transform_indices = @transform_1, window_bounds = array<i64: 1, 128, 64>}, {transform_indices = @transform_2, window_bounds = array<i64: 1, 128, 64>}, {transform_indices = @transform_3, window_bounds = array<i64: 128, 128>}, {transform_indices = @transform_4, window_bounds = array<i64: 2, 1, 128, 64>}]} {
    %c0_i32 = arith.constant 0 : i32
    %0 = arith.cmpi eq, %arg2, %c0_i32 : i32
    %1 = arith.extui %0 : i1 to i32
    %c0_i32_0 = arith.constant 0 : i32
    %2 = arith.cmpi ne, %1, %c0_i32_0 : i32
    scf.if %2 {
      %cst = arith.constant 0xFF800000 : f32
      %19 = vector.broadcast %cst : f32 to vector<2x128x1xf32>
      %c0_12 = arith.constant 0 : index
      %c0_13 = arith.constant 0 : index
      %c0_14 = arith.constant 0 : index
      %20 = vector.load %arg8[%c0_12, %c0_13, %c0_14] : memref<2x128x1xf32, #tpu.memory_space<vmem>>, vector<2x128x1xf32>
      tpu.vector_store %arg8[%c0_12, %c0_13, %c0_14], %19 {strides = array<i32>} : memref<2x128x1xf32, #tpu.memory_space<vmem>>, vector<2x128x1xf32>,
      %cst_15 = arith.constant 0.000000e+00 : f32
      %21 = vector.broadcast %cst_15 : f32 to vector<2x128x1xf32>
      %c0_16 = arith.constant 0 : index
      %c0_17 = arith.constant 0 : index
      %c0_18 = arith.constant 0 : index
      %22 = vector.load %arg9[%c0_16, %c0_17, %c0_18] : memref<2x128x1xf32, #tpu.memory_space<vmem>>, vector<2x128x1xf32>
      tpu.vector_store %arg9[%c0_16, %c0_17, %c0_18], %21 {strides = array<i32>} : memref<2x128x1xf32, #tpu.memory_space<vmem>>, vector<2x128x1xf32>,
      %cst_19 = arith.constant 0.000000e+00 : f32
      %23 = vector.broadcast %cst_19 : f32 to vector<2x128x64xf32>
      %c0_20 = arith.constant 0 : index
      %c0_21 = arith.constant 0 : index
      %c0_22 = arith.constant 0 : index
      %24 = vector.load %arg10[%c0_20, %c0_21, %c0_22] : memref<2x128x64xf32, #tpu.memory_space<vmem>>, vector<2x128x64xf32>
      tpu.vector_store %arg10[%c0_20, %c0_21, %c0_22], %23 {strides = array<i32>} : memref<2x128x64xf32, #tpu.memory_space<vmem>>, vector<2x128x64xf32>,
    } else {
    }
    %c0 = arith.constant 0 : index
    %c0_1 = arith.constant 0 : index
    %c0_2 = arith.constant 0 : index
    %3 = vector.load %arg4[%c0, %c0_1, %c0_2] : memref<1x128x64xf32, #tpu.memory_space<vmem>>, vector<1x128x64xf32>
    %4 = vector.shape_cast %3 : vector<1x128x64xf32> to vector<128x64xf32>
    %c0_3 = arith.constant 0 : index
    %c0_4 = arith.constant 0 : index
    %c0_5 = arith.constant 0 : index
    %5 = vector.load %arg5[%c0_3, %c0_4, %c0_5] : memref<1x128x64xf32, #tpu.memory_space<vmem>>, vector<1x128x64xf32>
    %6 = vector.shape_cast %5 : vector<1x128x64xf32> to vector<128x64xf32>
    %c0_i32_6 = arith.constant 0 : i32
    %7 = arith.cmpi eq, %arg1, %c0_i32_6 : i32
    %8 = arith.extui %7 : i1 to i32
    %c0_i32_7 = arith.constant 0 : i32
    %9 = arith.cmpi ne, %8, %c0_i32_7 : i32
    scf.if %9 {
      %c0_12 = arith.constant 0 : index
      %c0_13 = arith.constant 0 : index
      %c0_14 = arith.constant 0 : index
      %c0_15 = arith.constant 0 : index
      %19 = vector.load %arg7[%c0_12, %c0_13, %c0_14, %c0_15] : memref<2x1x128x64xf32, #tpu.memory_space<vmem>>, vector<1x1x128x64xf32>
      %20 = vector.shape_cast %19 : vector<1x1x128x64xf32> to vector<128x64xf32>
      %21 = vector.shape_cast %4 : vector<128x64xf32> to vector<1x1x128x64xf32>
      tpu.vector_store %arg7[%c0_12, %c0_13, %c0_14, %c0_15], %21 {strides = array<i32>} : memref<2x1x128x64xf32, #tpu.memory_space<vmem>>, vector<1x1x128x64xf32>,
      %c1 = arith.constant 1 : index
      %c0_16 = arith.constant 0 : index
      %c0_17 = arith.constant 0 : index
      %c0_18 = arith.constant 0 : index
      %22 = vector.load %arg7[%c1, %c0_16, %c0_17, %c0_18] : memref<2x1x128x64xf32, #tpu.memory_space<vmem>>, vector<1x1x128x64xf32>
      %23 = vector.shape_cast %22 : vector<1x1x128x64xf32> to vector<128x64xf32>
      %24 = vector.shape_cast %6 : vector<128x64xf32> to vector<1x1x128x64xf32>
      tpu.vector_store %arg7[%c1, %c0_16, %c0_17, %c0_18], %24 {strides = array<i32>} : memref<2x1x128x64xf32, #tpu.memory_space<vmem>>, vector<1x1x128x64xf32>,
    } else {
    }
    %c128_i32 = arith.constant 128 : i32
    %10 = arith.muli %arg2, %c128_i32 : i32
    %c1_i32 = arith.constant 1 : i32
    %11 = arith.addi %arg1, %c1_i32 : i32
    %c128_i32_8 = arith.constant 128 : i32
    %12 = arith.muli %11, %c128_i32_8 : i32
    %13 = arith.cmpi slt, %10, %12 : i32
    %14 = arith.extui %13 : i1 to i32
    %c0_i32_9 = arith.constant 0 : i32
    %15 = arith.cmpi ne, %14, %c0_i32_9 : i32
    scf.if %15 {
      %c0_12 = arith.constant 0 : index
      %c0_13 = arith.constant 0 : index
      %19 = vector.load %arg3[%c0_12, %c0_13] : memref<128x128xf32, #tpu.memory_space<vmem>>, vector<128x128xf32>
      %cst = arith.constant 1.250000e-01 : f32
      %20 = vector.broadcast %cst : f32 to vector<128x128xf32>
      %21 = arith.mulf %19, %20 : vector<128x128xf32>
      %c128_i32_14 = arith.constant 128 : i32
      %22 = arith.muli %arg1, %c128_i32_14 : i32
      %23 = tpu.iota {dimensions = array<i32: 0>} : vector<128x128xi32>
      %24 = vector.broadcast %22 : i32 to vector<128x128xi32>
      %25 = arith.addi %24, %23 : vector<128x128xi32>
      %c128_i32_15 = arith.constant 128 : i32
      %26 = arith.muli %arg2, %c128_i32_15 : i32
      %27 = tpu.iota {dimensions = array<i32: 1>} : vector<128x128xi32>
      %28 = vector.broadcast %26 : i32 to vector<128x128xi32>
      %29 = arith.addi %28, %27 : vector<128x128xi32>
      %30 = arith.cmpi sle, %29, %25 : vector<128x128xi32>
      %31 = vector.extract_strided_slice %21 {offsets = [0, 0], sizes = [128, 64], strides = [1, 1]} : vector<128x128xf32> to vector<128x64xf32>
      %cst_16 = arith.constant dense<0.000000e+00> : vector<128x128xf32>
      %32 = tpu.matmul %31, %4, %cst_16 {dimension_numbers = #tpu.dot_dimension_numbers<[1], [1], [0], [0], [0, 0, 1, 0], [], []>} : vector<128x64xf32>, vector<128x64xf32>, vector<128x128xf32> -> vector<128x128xf32>
      %cst_17 = arith.constant -1.000000e+30 : f32
      %33 = vector.broadcast %cst_17 : f32 to vector<128x128xf32>
      %34 = arith.select %30, %32, %33 : vector<128x128xi1>, vector<128x128xf32>
      %c0_18 = arith.constant 0 : index
      %c0_19 = arith.constant 0 : index
      %c0_20 = arith.constant 0 : index
      %35 = vector.load %arg8[%c0_18, %c0_19, %c0_20] : memref<2x128x1xf32, #tpu.memory_space<vmem>>, vector<1x128x1xf32>
      %36 = vector.shape_cast %35 : vector<1x128x1xf32> to vector<128x1xf32>
      %cst_21 = arith.constant dense<0xFF800000> : vector<128xf32>
      %37 = vector.multi_reduction <maximumf>, %34, %cst_21 [1] : vector<128x128xf32> to vector<128xf32>
      %38 = vector.shape_cast %37 : vector<128xf32> to vector<128x1xf32>
      %39 = arith.maximumf %36, %38 : vector<128x1xf32>
      %40 = arith.subf %36, %39 : vector<128x1xf32>
      %41 = math.exp %40 : vector<128x1xf32>
      %42 = vector.broadcast %39 : vector<128x1xf32> to vector<128x128xf32>
      %43 = arith.subf %34, %42 : vector<128x128xf32>
      %44 = math.exp %43 : vector<128x128xf32>
      %c0_22 = arith.constant 0 : index
      %c0_23 = arith.constant 0 : index
      %c0_24 = arith.constant 0 : index
      %45 = vector.load %arg9[%c0_22, %c0_23, %c0_24] : memref<2x128x1xf32, #tpu.memory_space<vmem>>, vector<1x128x1xf32>
      %46 = vector.shape_cast %45 : vector<1x128x1xf32> to vector<128x1xf32>
      %47 = arith.mulf %41, %46 : vector<128x1xf32>
      %cst_25 = arith.constant dense<0.000000e+00> : vector<128xf32>
      %48 = vector.multi_reduction <add>, %44, %cst_25 [1] : vector<128x128xf32> to vector<128xf32>
      %49 = vector.shape_cast %48 : vector<128xf32> to vector<128x1xf32>
      %50 = arith.addf %47, %49 : vector<128x1xf32>
      %c0_26 = arith.constant 0 : index
      %c0_27 = arith.constant 0 : index
      %c0_28 = arith.constant 0 : index
      %51 = vector.load %arg9[%c0_26, %c0_27, %c0_28] : memref<2x128x1xf32, #tpu.memory_space<vmem>>, vector<1x128x1xf32>
      %52 = vector.shape_cast %51 : vector<1x128x1xf32> to vector<128x1xf32>
      %53 = vector.shape_cast %50 : vector<128x1xf32> to vector<1x128x1xf32>
      tpu.vector_store %arg9[%c0_26, %c0_27, %c0_28], %53 {strides = array<i32>} : memref<2x128x1xf32, #tpu.memory_space<vmem>>, vector<1x128x1xf32>,
      %c0_29 = arith.constant 0 : index
      %c0_30 = arith.constant 0 : index
      %c0_31 = arith.constant 0 : index
      %54 = vector.load %arg10[%c0_29, %c0_30, %c0_31] : memref<2x128x64xf32, #tpu.memory_space<vmem>>, vector<1x128x64xf32>
      %55 = vector.shape_cast %54 : vector<1x128x64xf32> to vector<128x64xf32>
      %56 = vector.broadcast %41 : vector<128x1xf32> to vector<128x64xf32>
      %57 = arith.mulf %56, %55 : vector<128x64xf32>
      %cst_32 = arith.constant dense<0.000000e+00> : vector<128x64xf32>
      %58 = tpu.matmul %44, %6, %cst_32 {dimension_numbers = #tpu.dot_dimension_numbers<[1], [0], [0], [1], [0, 0, 1, 1], [], []>} : vector<128x128xf32>, vector<128x64xf32>, vector<128x64xf32> -> vector<128x64xf32>
      %59 = arith.addf %57, %58 : vector<128x64xf32>
      %c0_33 = arith.constant 0 : index
      %c0_34 = arith.constant 0 : index
      %c0_35 = arith.constant 0 : index
      %60 = vector.load %arg10[%c0_33, %c0_34, %c0_35] : memref<2x128x64xf32, #tpu.memory_space<vmem>>, vector<1x128x64xf32>
      %61 = vector.shape_cast %60 : vector<1x128x64xf32> to vector<128x64xf32>
      %62 = vector.shape_cast %59 : vector<128x64xf32> to vector<1x128x64xf32>
      tpu.vector_store %arg10[%c0_33, %c0_34, %c0_35], %62 {strides = array<i32>} : memref<2x128x64xf32, #tpu.memory_space<vmem>>, vector<1x128x64xf32>,
      %c0_36 = arith.constant 0 : index
      %c0_37 = arith.constant 0 : index
      %c0_38 = arith.constant 0 : index
      %63 = vector.load %arg8[%c0_36, %c0_37, %c0_38] : memref<2x128x1xf32, #tpu.memory_space<vmem>>, vector<1x128x1xf32>
      %64 = vector.shape_cast %63 : vector<1x128x1xf32> to vector<128x1xf32>
      %65 = vector.shape_cast %39 : vector<128x1xf32> to vector<1x128x1xf32>
      tpu.vector_store %arg8[%c0_36, %c0_37, %c0_38], %65 {strides = array<i32>} : memref<2x128x1xf32, #tpu.memory_space<vmem>>, vector<1x128x1xf32>,
      %66 = vector.extract_strided_slice %21 {offsets = [0, 64], sizes = [128, 64], strides = [1, 1]} : vector<128x128xf32> to vector<128x64xf32>
      %cst_39 = arith.constant dense<0.000000e+00> : vector<128x128xf32>
      %67 = tpu.matmul %66, %4, %cst_39 {dimension_numbers = #tpu.dot_dimension_numbers<[1], [1], [0], [0], [0, 0, 1, 0], [], []>} : vector<128x64xf32>, vector<128x64xf32>, vector<128x128xf32> -> vector<128x128xf32>
      %cst_40 = arith.constant -1.000000e+30 : f32
      %68 = vector.broadcast %cst_40 : f32 to vector<128x128xf32>
      %69 = arith.select %30, %67, %68 : vector<128x128xi1>, vector<128x128xf32>
      %c1 = arith.constant 1 : index
      %c0_41 = arith.constant 0 : index
      %c0_42 = arith.constant 0 : index
      %70 = vector.load %arg8[%c1, %c0_41, %c0_42] : memref<2x128x1xf32, #tpu.memory_space<vmem>>, vector<1x128x1xf32>
      %71 = vector.shape_cast %70 : vector<1x128x1xf32> to vector<128x1xf32>
      %cst_43 = arith.constant dense<0xFF800000> : vector<128xf32>
      %72 = vector.multi_reduction <maximumf>, %69, %cst_43 [1] : vector<128x128xf32> to vector<128xf32>
      %73 = vector.shape_cast %72 : vector<128xf32> to vector<128x1xf32>
      %74 = arith.maximumf %71, %73 : vector<128x1xf32>
      %75 = arith.subf %71, %74 : vector<128x1xf32>
      %76 = math.exp %75 : vector<128x1xf32>
      %77 = vector.broadcast %74 : vector<128x1xf32> to vector<128x128xf32>
      %78 = arith.subf %69, %77 : vector<128x128xf32>
      %79 = math.exp %78 : vector<128x128xf32>
      %c1_44 = arith.constant 1 : index
      %c0_45 = arith.constant 0 : index
      %c0_46 = arith.constant 0 : index
      %80 = vector.load %arg9[%c1_44, %c0_45, %c0_46] : memref<2x128x1xf32, #tpu.memory_space<vmem>>, vector<1x128x1xf32>
      %81 = vector.shape_cast %80 : vector<1x128x1xf32> to vector<128x1xf32>
      %82 = arith.mulf %76, %81 : vector<128x1xf32>
      %cst_47 = arith.constant dense<0.000000e+00> : vector<128xf32>
      %83 = vector.multi_reduction <add>, %79, %cst_47 [1] : vector<128x128xf32> to vector<128xf32>
      %84 = vector.shape_cast %83 : vector<128xf32> to vector<128x1xf32>
      %85 = arith.addf %82, %84 : vector<128x1xf32>
      %c1_48 = arith.constant 1 : index
      %c0_49 = arith.constant 0 : index
      %c0_50 = arith.constant 0 : index
      %86 = vector.load %arg9[%c1_48, %c0_49, %c0_50] : memref<2x128x1xf32, #tpu.memory_space<vmem>>, vector<1x128x1xf32>
      %87 = vector.shape_cast %86 : vector<1x128x1xf32> to vector<128x1xf32>
      %88 = vector.shape_cast %85 : vector<128x1xf32> to vector<1x128x1xf32>
      tpu.vector_store %arg9[%c1_48, %c0_49, %c0_50], %88 {strides = array<i32>} : memref<2x128x1xf32, #tpu.memory_space<vmem>>, vector<1x128x1xf32>,
      %c1_51 = arith.constant 1 : index
      %c0_52 = arith.constant 0 : index
      %c0_53 = arith.constant 0 : index
      %89 = vector.load %arg10[%c1_51, %c0_52, %c0_53] : memref<2x128x64xf32, #tpu.memory_space<vmem>>, vector<1x128x64xf32>
      %90 = vector.shape_cast %89 : vector<1x128x64xf32> to vector<128x64xf32>
      %91 = vector.broadcast %76 : vector<128x1xf32> to vector<128x64xf32>
      %92 = arith.mulf %91, %90 : vector<128x64xf32>
      %cst_54 = arith.constant dense<0.000000e+00> : vector<128x64xf32>
      %93 = tpu.matmul %79, %6, %cst_54 {dimension_numbers = #tpu.dot_dimension_numbers<[1], [0], [0], [1], [0, 0, 1, 1], [], []>} : vector<128x128xf32>, vector<128x64xf32>, vector<128x64xf32> -> vector<128x64xf32>
      %94 = arith.addf %92, %93 : vector<128x64xf32>
      %c1_55 = arith.constant 1 : index
      %c0_56 = arith.constant 0 : index
      %c0_57 = arith.constant 0 : index
      %95 = vector.load %arg10[%c1_55, %c0_56, %c0_57] : memref<2x128x64xf32, #tpu.memory_space<vmem>>, vector<1x128x64xf32>
      %96 = vector.shape_cast %95 : vector<1x128x64xf32> to vector<128x64xf32>
      %97 = vector.shape_cast %94 : vector<128x64xf32> to vector<1x128x64xf32>
      tpu.vector_store %arg10[%c1_55, %c0_56, %c0_57], %97 {strides = array<i32>} : memref<2x128x64xf32, #tpu.memory_space<vmem>>, vector<1x128x64xf32>,
      %c1_58 = arith.constant 1 : index
      %c0_59 = arith.constant 0 : index
      %c0_60 = arith.constant 0 : index
      %98 = vector.load %arg8[%c1_58, %c0_59, %c0_60] : memref<2x128x1xf32, #tpu.memory_space<vmem>>, vector<1x128x1xf32>
      %99 = vector.shape_cast %98 : vector<1x128x1xf32> to vector<128x1xf32>
      %100 = vector.shape_cast %74 : vector<128x1xf32> to vector<1x128x1xf32>
      tpu.vector_store %arg8[%c1_58, %c0_59, %c0_60], %100 {strides = array<i32>} : memref<2x128x1xf32, #tpu.memory_space<vmem>>, vector<1x128x1xf32>,
    } else {
    }
    %c1_i32_10 = arith.constant 1 : i32
    %16 = arith.cmpi eq, %arg2, %c1_i32_10 : i32
    %17 = arith.extui %16 : i1 to i32
    %c0_i32_11 = arith.constant 0 : i32
    %18 = arith.cmpi ne, %17, %c0_i32_11 : i32
    scf.if %18 {
      %c0_12 = arith.constant 0 : index
      %c0_13 = arith.constant 0 : index
      %c0_14 = arith.constant 0 : index
      %19 = vector.load %arg9[%c0_12, %c0_13, %c0_14] : memref<2x128x1xf32, #tpu.memory_space<vmem>>, vector<2x128x1xf32>
      %20 = tpu.reciprocal %19 {approx = true} : vector<2x128x1xf32> -> vector<2x128x1xf32>
      %21 = arith.mulf %19, %20 : vector<2x128x1xf32>
      %cst = arith.constant 2.000000e+00 : f32
      %22 = vector.broadcast %cst : f32 to vector<2x128x1xf32>
      %23 = arith.subf %22, %21 : vector<2x128x1xf32>
      %24 = arith.mulf %20, %23 : vector<2x128x1xf32>
      %c0_15 = arith.constant 0 : index
      %c0_16 = arith.constant 0 : index
      %c0_17 = arith.constant 0 : index
      %25 = vector.load %arg10[%c0_15, %c0_16, %c0_17] : memref<2x128x64xf32, #tpu.memory_space<vmem>>, vector<1x128x64xf32>
      %26 = vector.shape_cast %25 : vector<1x128x64xf32> to vector<128x64xf32>
      %27 = vector.extract_strided_slice %24 {offsets = [0, 0, 0], sizes = [1, 128, 1], strides = [1, 1, 1]} : vector<2x128x1xf32> to vector<1x128x1xf32>
      %28 = vector.shape_cast %27 : vector<1x128x1xf32> to vector<128x1xf32>
      %29 = vector.broadcast %28 : vector<128x1xf32> to vector<128x64xf32>
      %30 = arith.mulf %26, %29 : vector<128x64xf32>
      %c0_18 = arith.constant 0 : index
      %c0_19 = arith.constant 0 : index
      %31 = vector.load %arg6[%c0_18, %c0_19] : memref<128x128xf32, #tpu.memory_space<vmem>>, vector<128x64xf32>
      tpu.vector_store %arg6[%c0_18, %c0_19], %30 {strides = array<i32>} : memref<128x128xf32, #tpu.memory_space<vmem>>, vector<128x64xf32>,
      %c1 = arith.constant 1 : index
      %c0_20 = arith.constant 0 : index
      %c0_21 = arith.constant 0 : index
      %32 = vector.load %arg10[%c1, %c0_20, %c0_21] : memref<2x128x64xf32, #tpu.memory_space<vmem>>, vector<1x128x64xf32>
      %33 = vector.shape_cast %32 : vector<1x128x64xf32> to vector<128x64xf32>
      %34 = vector.extract_strided_slice %24 {offsets = [1, 0, 0], sizes = [1, 128, 1], strides = [1, 1, 1]} : vector<2x128x1xf32> to vector<1x128x1xf32>
      %35 = vector.shape_cast %34 : vector<1x128x1xf32> to vector<128x1xf32>
      %36 = vector.broadcast %35 : vector<128x1xf32> to vector<128x64xf32>
      %37 = arith.mulf %33, %36 : vector<128x64xf32>
      %c0_22 = arith.constant 0 : index
      %c64 = arith.constant 64 : index
      %38 = vector.load %arg6[%c0_22, %c64] : memref<128x128xf32, #tpu.memory_space<vmem>>, vector<128x64xf32>
      tpu.vector_store %arg6[%c0_22, %c64], %37 {strides = array<i32>} : memref<128x128xf32, #tpu.memory_space<vmem>>, vector<128x64xf32>,
    } else {
    }
    return
  }
  func.func @transform_0(%arg0: i32, %arg1: i32, %arg2: i32) -> (i32, i32) {
    %c0_i32 = arith.constant 0 : i32
    return %arg1, %arg0 : i32, i32
  }
  func.func @transform_1(%arg0: i32, %arg1: i32, %arg2: i32) -> (i32, i32, i32) {
    %c0_i32 = arith.constant 0 : i32
    %c0_i32_0 = arith.constant 0 : i32
    return %arg0, %arg2, %c0_i32 : i32, i32, i32
  }
  func.func @transform_2(%arg0: i32, %arg1: i32, %arg2: i32) -> (i32, i32, i32) {
    %c0_i32 = arith.constant 0 : i32
    %c0_i32_0 = arith.constant 0 : i32
    return %arg0, %arg2, %c0_i32 : i32, i32, i32
  }
  func.func @transform_3(%arg0: i32, %arg1: i32, %arg2: i32) -> (i32, i32) {
    %c0_i32 = arith.constant 0 : i32
    return %arg1, %arg0 : i32, i32
  }
  func.func @transform_4(%arg0: i32, %arg1: i32, %arg2: i32) -> (i32, i32, i32, i32) {
    %c0_i32 = arith.constant 0 : i32
    %0 = arith.cmpi eq, %arg1, %c0_i32 : i32
    %c1_i32 = arith.constant 1 : i32
    %1 = arith.select %0, %arg2, %c1_i32 : i32
    %c0_i32_0 = arith.constant 0 : i32
    %c0_i32_1 = arith.constant 0 : i32
    %c0_i32_2 = arith.constant 0 : i32
    return %c0_i32_0, %arg0, %1, %c0_i32_1 : i32, i32, i32, i32
  }
}

</mosaic_0001>

<bundles_post_ra>
// kernel: tpu_custom_call.1
= control target key start
LH: loop header
LB: loop body
LE: loop exit
PB: predicated region body
PF: predicated region fallthrough
CT: control target
= control target key end

     0   :  { %s6705_s0 = inlined_call_operand.hbm [shape: f32[256,256], index: 0, kind: input, shape index: {}]   ;;  %s6706_s1 = inlined_call_operand.hbm [shape: f32[2,256,64], index: 1, kind: input, shape index: {}]   ;;  %s6707_s2 = inlined_call_operand.hbm [shape: f32[2,256,64], index: 2, kind: input, shape index: {}]   ;;  %s6708_s3 = inlined_call_operand.hbm [shape: f32[256,256], index: 3, kind: output, shape index: {0}]   ;;  %s6709_s4 = inlined_call_operand.hbm [shape: f32[2,2,256,64], index: 4, kind: output, shape index: {1}]  }
   0x1   :  { %6802 = sst [smem:[#allocation88_spill]] %s6705_s0 }
   0x2   :  { %6803 = sst [smem:[#allocation89_spill]] %s6706_s1 }
   0x3   :  { %6804 = sst [smem:[#allocation90_spill]] %s6708_s3 }
   0x4   :  { %6805 = sst [smem:[#allocation91_spill]] %s6709_s4 }
   0x5   :  { %10 = vsyncpa [#allocation6], 0 }
   0x6   :  { %12 = vsyncpa [#allocation6 + $0x1], 0 }
   0x7   :  { %13 = vsyncpa [#allocation9], 0 }
   0x8   :  { %15 = vsyncpa [#allocation9 + $0x1], 0 }
   0x9   :  { %16 = vsyncpa [#allocation7], 0 }
   0xa   :  { %18 = vsyncpa [#allocation7 + $0x1], 0 }
   0xb   :  { %19 = vsyncpa [#allocation13], 0 }
   0xc   :  { %21 = vsyncpa [#allocation13 + $0x1], 0  ;;  %s4443_s15 = smov 0   ;;  %s4445_s16 = smov 0  }
   0xd   :  { %s4447_s17 = smov 0   ;;  %s4449_s18 = smov 0  }
   0xe   :  { %s4451_s19 = smov 0   ;;  %s4453_s20 = smov 0  }
   0xf   :  { %s4455_s21 = smov 0   ;;  %s4457_s22 = smov 0  }
  0x10   :  { %s4459_s23 = smov 0   ;;  %s4461_s24 = smov 0  }
  0x11   :  { %s4463_s25 = smov 0   ;;  %s4465_s26 = smov 0  }
  0x12   :  { %s4467_s27 = smov 0   ;;  %s4469_s28 = smov 0  }
  0x13   :  { %s4471_s29 = smov 0   ;;  %s4473_s30 = smov 0  }
  0x14 LB: > { %6806 = sst [smem:[#allocation20_spill]] %s4333_s15  ;;  %s4524_s5 = sadd.s32 4294967295, %s4393_s30   ;;  %s4393_s30 = sphi %s4473_s30, %s27_s30   ;;  %s4389_s29 = sphi %s4471_s29, %s7076_s29   ;;  %s4385_s28 = sphi %s4469_s28, %s7075_s28   ;;  %s4381_s27 = sphi %s4467_s27, %s7065_s27   ;;  %s4377_s26 = sphi %s4465_s26, %s7074_s26   ;;  %s4373_s25 = sphi %s4463_s25, %s7064_s25   ;;  %s4369_s24 = sphi %s4461_s24, %s7063_s24   ;;  %s4365_s23 = sphi %s4459_s23, %s7073_s23   ;;  %s4361_s22 = sphi %s4457_s22, %s7072_s22   ;;  %s4357_s21 = sphi %s4455_s21, %s7071_s21   ;;  %s4353_s20 = sphi %s4453_s20, %s7061_s20   ;;  %s4349_s19 = sphi %s4451_s19, %s7060_s19   ;;  %s4345_s18 = sphi %s4449_s18, %s7059_s18   ;;  %s4341_s17 = sphi %s4447_s17, %s7070_s17   ;;  %s4337_s16 = sphi %s4445_s16, %s7069_s16   ;;  %s4333_s15 = sphi %s4443_s15, %s7057_s15  }
  0x15   : > { %6807 = sst [smem:[#allocation21_spill]] %s4337_s16  ;;  %s39_s6 = sadd.s32 1, %s4381_s27 }
  0x16   : > { %6808 = sst [smem:[#allocation22_spill]] %s4349_s19  ;;  %p40_p0 = scmp.ge.s32.totalorder %s39_s6, 2 }
  0x17   : > { %6809 = sst [smem:[#allocation23_spill]] %s4353_s20  ;;  %s42_s7 = sadd.s32 1, %s4385_s28 }
  0x18   : > { %6810 = sst [smem:[#allocation24_spill]] %s4369_s24  ;;  %s46_s8 = sadd.s32 1, %s4389_s29 }
  0x19   : > { %6811 = sst [smem:[#allocation25_spill]] %s4373_s25  ;;  %p6728_p1 = scmp.eq.s32.totalorder %s4393_s30, 0 }
  0x1a   : > { %6812 = sst [smem:[#allocation26_spill]] %s4377_s26  ;;  %s7078_s6 = smov (%p40_p0, %s39_s6), 0 }
  0x1b   : > { %6813 = sst [smem:[#allocation27_spill]] %s4381_s27  ;;  %s7080_s7 = smov (!%p40_p0, %s42_s7), %s4385_s28 }
  0x1c   : > { %6814 = sst [smem:[#allocation28_spill]] %s4385_s28  ;;  %p6727_p2 = scmp.eq.s32.totalorder %s4524_s5, 0 }
  0x1d   : > { %6815 = sst [smem:[#allocation29_spill]] %s4524_s5  ;;  %s79_s9 = ssub.s32 %s4381_s27, %s7078_s6 }
  0x1e   : > { %6816 = sst [smem:[#allocation30_spill]] %s7078_s6  ;;  %p44_p3 = scmp.ge.s32.totalorder %s7080_s7, 2 }
  0x1f   : > { %s83_s10 = sadd.s32 1, %s4353_s20  ;;  %p90_p4 = scmp.ne.s32.totalorder %s4353_s20, %s4349_s19 }
  0x20   : > { %p96_p5 = scmp.ne.s32.totalorder %s4349_s19, %s4345_s18  ;;  %s7082_s7 = smov (%p44_p3, %s7080_s7), 0 }
  0x21   : > { %6817 = sst [smem:[#allocation31_spill]] %s7082_s7  ;;  %s7084_s8 = smov (!%p44_p3, %s46_s8), %s4389_s29 }
  0x22   : > { %s50_s11 = ssub.s32 %s4385_s28, %s7082_s7  ;;  %p4548_p6 = por %p90_p4, %p6728_p1 }
  0x23   : > { %p48_p7 = scmp.ge.s32.totalorder %s7084_s8, 2  ;;  %p4554_p8 = por %p96_p5, %p6727_p2 }
  0x24   : > { %p162_p9 = scmp.eq.s32.totalorder %s4385_s28, 0  ;;  %p164_p10 = scmp.eq.s32.totalorder %s7082_s7, 0 }
  0x25   : > { %s6819_s13 = scalar_select %p4554_p8, 1, 0 }
  0x26   : > { %s7086_s8 = smov (%p48_p7, %s7084_s8), 0  ;;  %s171_s4 = sadd.s32 1, %s4341_s17 }
  0x27   : > { %6820 = sst [smem:[#allocation32_spill]] %s6819_s13  ;;  %s51_s18 = ssub.s32 %s4389_s29, %s7086_s8 }
  0x28   : > { %6821 = sst [smem:[#allocation33_spill]] %s7086_s8  ;;  %s4566_s3 = sor.u32 %s51_s18, %s50_s11 }
  0x29   : > { %s163_s14 = scalar_select %p162_p9, %s4381_s27, 1 }
  0x2a   : > { %s80_s26 = sor.u32 %s79_s9, %s51_s18  ;;  %p6726_p13 = scmp.lt.s32.totalorder %s4393_s30, 8 }
  0x2b   : > { %p81_p12 = scmp.eq.s32.totalorder %s80_s26, 0  ;;  %s231_s19 = sand.u32 1, %s4393_s30  }
  0x2c   : > { %s165_s25 = scalar_select %p164_p10, %s7078_s6, 1 }
  0x2d   : > { %s4571_s24 = scalar_select %p81_p12, %s4353_s20, %s83_s10  }
  0x2e   : > { %s167_s7 = ssub.s32 %s163_s14, %s165_s25  ;;  %s233_s0 = sand.u32 1, %s4353_s20  }
  0x2f   : > { %6822 = sst [smem:[#allocation34_spill]] %s4571_s24  ;;  %s168_s13 = sor.u32 %s167_s7, %s51_s18 }
  0x30   : > { %p169_p0 = scmp.eq.s32.totalorder %s168_s13, 0  ;;  %s3128_s28 = sshll.u32 %s233_s0, 7 }
  0x31   : > { %s3129_s11 = sshll.u32 %s4381_s27, 4  ;;  %s3130_s15 = sshll.u32 %s4389_s29, 5 }
  0x32   : > { %s4576_s8 = scalar_select %p169_p0, %s4341_s17, %s171_s4  }
  0x33   : > { %s241_s16 = sadd.s32 %s3130_s15, %s3129_s11  ;;  %s235_s9 = scalar_lea.vmem [#allocation8], %s3128_s28 }
  0x34   : > { %6823 = sst [smem:[#allocation35_spill]] %s4576_s8  ;;  %s244_s5 = sshll.u32 %s235_s9, 4  ;;  %s4581_s5 = int_to_ptr.vmem [resolvable:$true] %s244_s5 }
  0x35   : > { %s3131_s26 = sshll.u32 %s241_s16, 7  ;;  %s6824_s1 = sld [smem:[#allocation89_spill]] }
  0x36   : > { %p4592_p3 = pnand %p6726_p13, %p4548_p6  ;;  %s4599_s16 = scalar_lea.hbm %s6707_s2, %s3131_s26 }
  0x37   : > { %s258_s7 = scalar_lea.vmem [#allocation10], %s3128_s28  ;;  %s4603_s12 = scalar_lea.sflag [#allocation9], %s231_s19 }
  0x38   : > { %s4601_s13 = sshll.u32 %s258_s7, 4  ;;  %p6729_p5 = pneg %p4592_p3  ;;  %s4635_s13 = int_to_ptr.vmem [resolvable:$true] %s4601_s13 }
  0x3b   : > { %s4586_s14 = scalar_lea.hbm %s6824_s1, %s3131_s26  ;;  %s4138_s10 = scalar_lea.hbm %s6824_s1, 8192 }
  0x3c   : > { %s4133_s18 = scalar_lea.hbm %s4586_s14, 2048  ;;  %p4139_p9 = scmp.lt.u32.totalorder %s4586_s14, %s6824_s1 }
  0x3d   : > { %p4134_p4 = scmp.ne.s32.totalorder %s4586_s14, %s4133_s18  ;;  %p4140_p10 = scmp.lt.u32.totalorder %s4138_s10, %s4133_s18 }
  0x3e   : > { %p4142_p0 = scmp.lt.u32.totalorder %s4133_s18, %s4586_s14 }
  0x3f   : > { %p4136_p6 = pnand %p6729_p5, %p4134_p4  ;;  %p4141_p12 = por %p4140_p10, %p4139_p9 }
  0x41   : > { %p4137_p7 = pneg %p4136_p6  ;;  %p4143_p13 = por %p4142_p0, %p4141_p12 }
  0x43   : > { %p4144_p2 = pnand %p4143_p13, %p4137_p7 }
  0x45   : > { %4147 = shalt.err (!%p4144_p2)
}
  0x46   : > { %s4148_s19 = scalar_lea.vmem %s4581_s5, 2048  ;;  %s4395_s28 = smov [#allocation8]  }
  0x47   : > { %p4149_p4 = scmp.ne.s32.totalorder %s4581_s5, %s4148_s19  ;;  %s4153_s4 = sshll.u32 %s4395_s28, 4  ;;  %s4154_s4 = int_to_ptr.vmem [resolvable:$false] %s4153_s4 }
  0x48   : > { %s4155_s15 = scalar_lea.vmem %s4154_s4, 4096  ;;  %p4156_p11 = scmp.lt.s32.totalorder %s4581_s5, %s4154_s4 }
  0x49   : > { %p4151_p6 = pnand %p4149_p4, %p6729_p5  ;;  %p4157_p9 = scmp.lt.s32.totalorder %s4155_s15, %s4148_s19 }
  0x4b   : > { %p4152_p1 = pneg %p4151_p6  ;;  %p4158_p10 = por %p4157_p9, %p4156_p11 }
  0x4d   : > { %p4159_p12 = pnand %p4158_p10, %p4152_p1 }
  0x4f   : > { %4162 = shalt.err (!%p4159_p12)
}
  0x50   : > { %s6730_s7 = smov 128   ;;  %s6826_s18 = sld [smem:[#allocation29_spill]] }
  0x51   : > { %s6732_s11 = smov 8   ;;  %s6827_s9 = sld [smem:[#allocation21_spill]] }
  0x52   : > { %3777 = dma.hbm_to_vmem [thread:$0]  (!%p4592_p3), %s4586_s14, 2048, %s4581_s5, %s4603_s12, %s6730_s7, %s6730_s7, %s6732_s11  }
  0x53   : > { %s6828_s10 = sld [smem:[#allocation20_spill]]  ;;  %p3136_p1 = scmp.ge.s32.totalorder %s4393_s30, 1 }
  0x54   : > { %p275_p2 = scmp.lt.s32.totalorder %s4393_s30, 9  ;;  %s6829_s25 = sld [smem:[#allocation28_spill]] }
  0x55   : > { %s3121_s19 = sadd.s32 4294967294, %s4393_s30   ;;  %s55_s28 = sadd.s32 1, %s4365_s23 }
  0x56   : > { %p4639_p11 = pnand %p3136_p1, %p275_p2  ;;  %p6831_p13 = scmp.eq.s32.totalorder %s4566_s3, 0 }
  0x57   : > { %p62_p7 = scmp.ne.s32.totalorder %s4365_s23, %s4361_s22  ;;  %p68_p0 = scmp.ne.s32.totalorder %s4361_s22, %s4357_s21 }
  0x58   : > { %s6830_s26 = scalar_select %p4639_p11, 1, 0 }
  0x59   : > { %s4648_s4 = scalar_select %p6831_p13, %s4365_s23, %s55_s28  }
  0x5a   : > { %p150_p4 = scmp.eq.s32.totalorder %s6826_s18, 7  ;;  %p156_p6 = scmp.eq.s32.totalorder %s3121_s19, 7 }
  0x5b   : > { %6832 = sst [smem:[#allocation36_spill]] %s4648_s4  ;;  %p6833_p9 = scmp.eq.s32.totalorder %s4393_s30, 0 }
  0x5c   : > { %p6835_p12 = scmp.eq.s32.totalorder %s6826_s18, 0  ;;  %p4667_p2 = por %p150_p4, %p62_p7 }
  0x5d   : > { %p4657_p10 = por %p6833_p9, %p62_p7  ;;  %p4671_p13 = por %p156_p6, %p68_p0 }
  0x5e   : > { %p4663_p1 = por %p6835_p12, %p68_p0  ;;  %p181_p9 = scmp.ne.s32.totalorder %s4341_s17, %s6827_s9 }
  0x5f   : > { %s6837_s3 = scalar_select %p4667_p2, 1, 0 }
  0x60   : > { %s6836_s14 = scalar_select %p4663_p1, 1, 0 }
  0x61   : > { %s6838_s15 = scalar_select %p4671_p13, 1, 0 }
  0x62   : > { %p187_p5 = scmp.ne.s32.totalorder %s6827_s9, %s6828_s10  ;;  %s208_s18 = sand.u32 1, %s4365_s23  }
  0x63   : > { %s3239_s19 = sshll.u32 %s6829_s25, 5  ;;  %p4681_p12 = por %p181_p9, %p150_p4 }
  0x64   : > { %p4685_p7 = por %p187_p5, %p156_p6  ;;  %s3124_s11 = sshll.u32 %s208_s18, 7 }
  0x65   : > { %s6839_s28 = scalar_select %p4681_p12, 1, 0 }
  0x66   : > { %s6840_s7 = scalar_select %p4685_p7, 1, 0 }
  0x67   : > { %s218_s1 = sadd.s32 %s4389_s29, %s3239_s19  ;;  %s212_s27 = scalar_lea.vmem [#allocation5], %s3124_s11 }
  0x68   : > { %s3127_s6 = sshll.u32 %s218_s1, 7  ;;  %s221_s4 = sshll.u32 %s212_s27, 4  ;;  %s4697_s4 = int_to_ptr.vmem [resolvable:$true] %s221_s4 }
  0x69   : > { %s6841_s10 = sld [smem:[#allocation88_spill]]  ;;  %p6842_p0 = scmp.lt.s32.totalorder %s4393_s30, 8 }
  0x6a   : > { %s4163_s8 = scalar_lea.hbm %s4599_s16, 2048  ;;  %p6844_p6 = pneg %p4592_p3 }
  0x6b   : > { %p4703_p5 = pnand %p6842_p0, %p4657_p10  ;;  %p4164_p4 = scmp.ne.s32.totalorder %s4599_s16, %s4163_s8 }
  0x6c   : > { %s4168_s24 = scalar_lea.hbm %s6707_s2, 8192  ;;  %p4169_p13 = scmp.lt.u32.totalorder %s4599_s16, %s6707_s2 }
  0x6d   : > { %p4166_p9 = pnand %p4164_p4, %p6844_p6  ;;  %p4170_p12 = scmp.lt.u32.totalorder %s4168_s24, %s4163_s8 }
  0x6e   : > { %p4172_p10 = scmp.lt.u32.totalorder %s4163_s8, %s4599_s16 }
  0x6f   : > { %s4695_s25 = scalar_lea.hbm %s6841_s10, %s3127_s6  ;;  %p4167_p7 = pneg %p4166_p9 }
  0x70   : > { %p4171_p2 = por %p4170_p12, %p4169_p13 }
  0x72   : > { %p4173_p0 = por %p4172_p10, %p4171_p2 }
  0x74   : > { %p4174_p8 = pnand %p4173_p0, %p4167_p7 }
  0x76   : > { %4177 = shalt.err (!%p4174_p8)
}
  0x77   : > { %s4178_s5 = scalar_lea.vmem %s4635_s13, 2048  ;;  %s4398_s19 = smov [#allocation10]  }
  0x78   : > { %p4179_p4 = scmp.ne.s32.totalorder %s4635_s13, %s4178_s5  ;;  %s4183_s9 = sshll.u32 %s4398_s19, 4  ;;  %s4184_s9 = int_to_ptr.vmem [resolvable:$false] %s4183_s9 }
  0x79   : > { %s4185_s1 = scalar_lea.vmem %s4184_s9, 4096  ;;  %p4186_p11 = scmp.lt.s32.totalorder %s4635_s13, %s4184_s9 }
  0x7a   : > { %p4181_p9 = pnand %p4179_p4, %p6844_p6  ;;  %p4187_p13 = scmp.lt.s32.totalorder %s4185_s1, %s4178_s5 }
  0x7c   : > { %p4182_p1 = pneg %p4181_p9  ;;  %p4188_p12 = por %p4187_p13, %p4186_p11 }
  0x7e   : > { %p4189_p2 = pnand %p4188_p12, %p4182_p1 }
  0x80   : > { %4192 = shalt.err (!%p4189_p2)
}
  0x81   : > { %s6845_s8 = smov 8   ;;  %s6846_s27 = smov 128  }
  0x82   : > { %3780 = dma.hbm_to_vmem [thread:$0]  (!%p4592_p3), %s4599_s16, 2048, %s4635_s13, %s4603_s12, %s6846_s27, %s6846_s27, %s6845_s8  }
  0x83   : > { %s4736_s24 = scalar_lea.sflag [#allocation6], %s208_s18  ;;  %s4193_s6 = scalar_lea.hbm %s4695_s25, 2048 }
  0x84   : > { %p4194_p8 = scmp.ne.s32.totalorder %s4695_s25, %s4193_s6  ;;  %p4195_p11 = pneg %p4703_p5 }
  0x85   : > { %s4198_s5 = scalar_lea.hbm %s6841_s10, 8192  ;;  %p4199_p10 = scmp.lt.u32.totalorder %s4695_s25, %s6841_s10 }
  0x86   : > { %p4196_p1 = pnand %p4195_p11, %p4194_p8  ;;  %p4200_p3 = scmp.lt.u32.totalorder %s4198_s5, %s4193_s6 }
  0x87   : > { %p4202_p4 = scmp.lt.u32.totalorder %s4193_s6, %s4695_s25 }
  0x88   : > { %p4197_p7 = pneg %p4196_p1  ;;  %p4201_p0 = por %p4200_p3, %p4199_p10 }
  0x8a   : > { %p4203_p6 = por %p4202_p4, %p4201_p0 }
  0x8c   : > { %p4204_p9 = pnand %p4203_p6, %p4197_p7 }
  0x8e   : > { %4207 = shalt.err (!%p4204_p9)
}
  0x8f   : > { %s4208_s16 = scalar_lea.vmem %s4697_s4, 2048  ;;  %s4399_s13 = smov [#allocation5]  }
  0x90   : > { %p4209_p13 = scmp.ne.s32.totalorder %s4697_s4, %s4208_s16  ;;  %s4213_s12 = sshll.u32 %s4399_s13, 4  ;;  %s4214_s12 = int_to_ptr.vmem [resolvable:$false] %s4213_s12 }
  0x91   : > { %s4215_s18 = scalar_lea.vmem %s4214_s12, 4096  ;;  %p4216_p8 = scmp.lt.s32.totalorder %s4697_s4, %s4214_s12 }
  0x92   : > { %p4211_p12 = pnand %p4209_p13, %p4195_p11  ;;  %p4217_p1 = scmp.lt.s32.totalorder %s4215_s18, %s4208_s16 }
  0x94   : > { %p4212_p2 = pneg %p4211_p12  ;;  %p4218_p10 = por %p4217_p1, %p4216_p8 }
  0x96   : > { %p4219_p3 = pnand %p4218_p10, %p4212_p2 }
  0x98   : > { %4222 = shalt.err (!%p4219_p3)
}
  0x99   : > { %s4400_s1 = smov 256   ;;  %p6847_p11 = scmp.ne.s32.totalorder %s6830_s26, 0 }
  0x9a   : > { %3774 = dma.hbm_to_vmem [thread:$0]  (!%p4703_p5), %s4695_s25, 2048, %s4697_s4, %s4736_s24, %s4400_s1, %s6846_s27, %s6845_s8  }
  0x9b   : > { %279 = sbr.rel (%p6847_p11) target bundleno = 2021 (0x7e5), region = 32  ;;  %s4769_s6 = sand.u32 (!%p6847_p11), 1, %s4361_s22  }
  0x9c   : > { %s3137_s0 = sshll.u32 (!%p6847_p11), %s4769_s6, 7  ;;  %s282_s11 = scalar_lea.sflag (!%p6847_p11), [#allocation6], %s4769_s6 }
  0x9d   : > { %s4773_s5 = scalar_lea.vmem (!%p6847_p11), [#allocation5], %s3137_s0  ;;  %p6848_p7 = scmp.ne.s32.totalorder (!%p6847_p11), %s6836_s14, 0 }
  0xa2   : > { %4316 = dma.done.wait (%p6848_p7), %s282_s11, 2048  }
  0xa3   : > { %4318 = vsyncadd (%p6848_p7), %s282_s11, 4294965248  ;;  %s6849_s20 = sld [smem:[#allocation29_spill]]  ;;  %s6850_s4 = sld [smem:[#allocation22_spill]] }
  0xa4   : > { %s6851_s25 = sld [smem:[#allocation32_spill]] }
  0xa9   : > { %s290_s26 = sand.u32 1, %s6849_s20   ;;  %s292_s8 = sand.u32 1, %s6850_s4  }
  0xaa   : > { %s3138_s27 = sshll.u32 %s292_s8, 7  ;;  %s291_s24 = scalar_lea.sflag [#allocation9], %s290_s26 }
  0xab   : > { %s4781_s19 = scalar_lea.vmem [#allocation8], %s3138_s27  ;;  %p6852_p5 = scmp.ne.s32.totalorder %s6851_s25, 0 }
  0xad   : > { %4320 = dma.done.wait (%p6852_p5), %s291_s24, 4096  }
  0xae   : > { %4322 = vsyncadd (%p6852_p5), %s291_s24, 4294963200  ;;  %s6853_s9 = sld [smem:[#allocation21_spill]]  ;;  %s4790_s13 = scalar_lea.vmem [#allocation10], %s3138_s27 }
  0xaf   : > { %s4792_s12 = scalar_lea.vmem [#allocation11], %s3137_s0  ;;  %s6854_s1 = sld [smem:[#allocation24_spill]] }
  0xb4   : > { %s340_s16 = sand.u32 1, %s6853_s9  }
  0xb5   : > { %s3141_s14 = sshll.u32 %s340_s16, 8  ;;  %p3142_p0 = scmp.ne.s32.totalorder %s6854_s1, 0 }
  0xb6   : > { %s4794_s18 = scalar_lea.vmem [#allocation12], %s3141_s14  ;;  %vm354_vm0 = vcmask (!%p3142_p0), 7168   ;;  %vm419_vm1 = vcmask (!%p3142_p0), 523264   ;;  %v4401_v0 = vmov (!%p3142_p0), -inf   ;;  %v4402_v1 = vmov (!%p3142_p0), 0.0  }
  0xb7   : > { %353 = sbr.rel (%p3142_p0) target bundleno = 231 (0xe7), region = 48  ;;  %355 = vst.msk [vmem:[#allocation2] sm:$0xff] (!%p3142_p0), %vm354_vm0, %v4401_v0  ;;  %356 = vst.msk [vmem:[#allocation2 + $0x8] sm:$0xff] (!%p3142_p0), %vm354_vm0, %v4401_v0 }
  0xb8   : > { %357 = vst.msk [vmem:[#allocation2 + $0x10] sm:$0xff] (!%p3142_p0), %vm354_vm0, %v4401_v0  ;;  %358 = vst.msk [vmem:[#allocation2 + $0x18] sm:$0xff] (!%p3142_p0), %vm354_vm0, %v4401_v0 }
  0xb9   : > { %359 = vst.msk [vmem:[#allocation2 + $0x20] sm:$0xff] (!%p3142_p0), %vm354_vm0, %v4401_v0  ;;  %360 = vst.msk [vmem:[#allocation2 + $0x28] sm:$0xff] (!%p3142_p0), %vm354_vm0, %v4401_v0 }
  0xba   : > { %361 = vst.msk [vmem:[#allocation2 + $0x30] sm:$0xff] (!%p3142_p0), %vm354_vm0, %v4401_v0  ;;  %362 = vst.msk [vmem:[#allocation2 + $0x38] sm:$0xff] (!%p3142_p0), %vm354_vm0, %v4401_v0 }
  0xbb   : > { %363 = vst.msk [vmem:[#allocation2 + $0x40] sm:$0xff] (!%p3142_p0), %vm354_vm0, %v4401_v0  ;;  %364 = vst.msk [vmem:[#allocation2 + $0x48] sm:$0xff] (!%p3142_p0), %vm354_vm0, %v4401_v0 }
  0xbc   : > { %365 = vst.msk [vmem:[#allocation2 + $0x50] sm:$0xff] (!%p3142_p0), %vm354_vm0, %v4401_v0  ;;  %366 = vst.msk [vmem:[#allocation2 + $0x58] sm:$0xff] (!%p3142_p0), %vm354_vm0, %v4401_v0 }
  0xbd   : > { %367 = vst.msk [vmem:[#allocation2 + $0x60] sm:$0xff] (!%p3142_p0), %vm354_vm0, %v4401_v0  ;;  %368 = vst.msk [vmem:[#allocation2 + $0x68] sm:$0xff] (!%p3142_p0), %vm354_vm0, %v4401_v0 }
  0xbe   : > { %369 = vst.msk [vmem:[#allocation2 + $0x70] sm:$0xff] %vm354_vm0, %v4401_v0  ;;  %370 = vst.msk [vmem:[#allocation2 + $0x78] sm:$0xff] %vm354_vm0, %v4401_v0 }
  0xbf   : > { %371 = vst.msk [vmem:[#allocation2 + $0x80] sm:$0xff] %vm354_vm0, %v4401_v0  ;;  %372 = vst.msk [vmem:[#allocation2 + $0x88] sm:$0xff] %vm354_vm0, %v4401_v0 }
  0xc0   : > { %373 = vst.msk [vmem:[#allocation2 + $0x90] sm:$0xff] %vm354_vm0, %v4401_v0  ;;  %374 = vst.msk [vmem:[#allocation2 + $0x98] sm:$0xff] %vm354_vm0, %v4401_v0 }
  0xc1   : > { %375 = vst.msk [vmem:[#allocation2 + $0xa0] sm:$0xff] %vm354_vm0, %v4401_v0  ;;  %376 = vst.msk [vmem:[#allocation2 + $0xa8] sm:$0xff] %vm354_vm0, %v4401_v0 }
  0xc2   : > { %377 = vst.msk [vmem:[#allocation2 + $0xb0] sm:$0xff] %vm354_vm0, %v4401_v0  ;;  %378 = vst.msk [vmem:[#allocation2 + $0xb8] sm:$0xff] %vm354_vm0, %v4401_v0 }
  0xc3   : > { %379 = vst.msk [vmem:[#allocation2 + $0xc0] sm:$0xff] %vm354_vm0, %v4401_v0  ;;  %380 = vst.msk [vmem:[#allocation2 + $0xc8] sm:$0xff] %vm354_vm0, %v4401_v0 }
  0xc4   : > { %381 = vst.msk [vmem:[#allocation2 + $0xd0] sm:$0xff] %vm354_vm0, %v4401_v0  ;;  %382 = vst.msk [vmem:[#allocation2 + $0xd8] sm:$0xff] %vm354_vm0, %v4401_v0 }
  0xc5   : > { %383 = vst.msk [vmem:[#allocation2 + $0xe0] sm:$0xff] %vm354_vm0, %v4401_v0  ;;  %384 = vst.msk [vmem:[#allocation2 + $0xe8] sm:$0xff] %vm354_vm0, %v4401_v0 }
  0xc6   : > { %385 = vst.msk [vmem:[#allocation2 + $0xf0] sm:$0xff] %vm354_vm0, %v4401_v0  ;;  %386 = vst.msk [vmem:[#allocation2 + $0xf8] sm:$0xff] %vm354_vm0, %v4401_v0 }
  0xc7   : > { %387 = vst.msk [vmem:[#allocation3] sm:$0xff] %vm354_vm0, %v4402_v1  ;;  %388 = vst.msk [vmem:[#allocation3 + $0x8] sm:$0xff] %vm354_vm0, %v4402_v1 }
  0xc8   : > { %389 = vst.msk [vmem:[#allocation3 + $0x10] sm:$0xff] %vm354_vm0, %v4402_v1  ;;  %390 = vst.msk [vmem:[#allocation3 + $0x18] sm:$0xff] %vm354_vm0, %v4402_v1 }
  0xc9   : > { %391 = vst.msk [vmem:[#allocation3 + $0x20] sm:$0xff] %vm354_vm0, %v4402_v1  ;;  %392 = vst.msk [vmem:[#allocation3 + $0x28] sm:$0xff] %vm354_vm0, %v4402_v1 }
  0xca   : > { %393 = vst.msk [vmem:[#allocation3 + $0x30] sm:$0xff] %vm354_vm0, %v4402_v1  ;;  %394 = vst.msk [vmem:[#allocation3 + $0x38] sm:$0xff] %vm354_vm0, %v4402_v1 }
  0xcb   : > { %395 = vst.msk [vmem:[#allocation3 + $0x40] sm:$0xff] %vm354_vm0, %v4402_v1  ;;  %396 = vst.msk [vmem:[#allocation3 + $0x48] sm:$0xff] %vm354_vm0, %v4402_v1 }
  0xcc   : > { %397 = vst.msk [vmem:[#allocation3 + $0x50] sm:$0xff] %vm354_vm0, %v4402_v1  ;;  %398 = vst.msk [vmem:[#allocation3 + $0x58] sm:$0xff] %vm354_vm0, %v4402_v1 }
  0xcd   : > { %399 = vst.msk [vmem:[#allocation3 + $0x60] sm:$0xff] %vm354_vm0, %v4402_v1  ;;  %400 = vst.msk [vmem:[#allocation3 + $0x68] sm:$0xff] %vm354_vm0, %v4402_v1 }
  0xce   : > { %401 = vst.msk [vmem:[#allocation3 + $0x70] sm:$0xff] %vm354_vm0, %v4402_v1  ;;  %402 = vst.msk [vmem:[#allocation3 + $0x78] sm:$0xff] %vm354_vm0, %v4402_v1 }
  0xcf   : > { %403 = vst.msk [vmem:[#allocation3 + $0x80] sm:$0xff] %vm354_vm0, %v4402_v1  ;;  %404 = vst.msk [vmem:[#allocation3 + $0x88] sm:$0xff] %vm354_vm0, %v4402_v1 }
  0xd0   : > { %405 = vst.msk [vmem:[#allocation3 + $0x90] sm:$0xff] %vm354_vm0, %v4402_v1  ;;  %406 = vst.msk [vmem:[#allocation3 + $0x98] sm:$0xff] %vm354_vm0, %v4402_v1 }
  0xd1   : > { %407 = vst.msk [vmem:[#allocation3 + $0xa0] sm:$0xff] %vm354_vm0, %v4402_v1  ;;  %408 = vst.msk [vmem:[#allocation3 + $0xa8] sm:$0xff] %vm354_vm0, %v4402_v1 }
  0xd2   : > { %409 = vst.msk [vmem:[#allocation3 + $0xb0] sm:$0xff] %vm354_vm0, %v4402_v1  ;;  %410 = vst.msk [vmem:[#allocation3 + $0xb8] sm:$0xff] %vm354_vm0, %v4402_v1 }
  0xd3   : > { %411 = vst.msk [vmem:[#allocation3 + $0xc0] sm:$0xff] %vm354_vm0, %v4402_v1  ;;  %412 = vst.msk [vmem:[#allocation3 + $0xc8] sm:$0xff] %vm354_vm0, %v4402_v1 }
  0xd4   : > { %413 = vst.msk [vmem:[#allocation3 + $0xd0] sm:$0xff] %vm354_vm0, %v4402_v1  ;;  %414 = vst.msk [vmem:[#allocation3 + $0xd8] sm:$0xff] %vm354_vm0, %v4402_v1 }
  0xd5   : > { %415 = vst.msk [vmem:[#allocation3 + $0xe0] sm:$0xff] %vm354_vm0, %v4402_v1  ;;  %416 = vst.msk [vmem:[#allocation3 + $0xe8] sm:$0xff] %vm354_vm0, %v4402_v1 }
  0xd6   : > { %417 = vst.msk [vmem:[#allocation3 + $0xf0] sm:$0xff] %vm354_vm0, %v4402_v1  ;;  %418 = vst.msk [vmem:[#allocation3 + $0xf8] sm:$0xff] %vm354_vm0, %v4402_v1 }
  0xd7   : > { %420 = vst.msk [vmem:[#allocation4] sm:$0xff] %vm419_vm1, %v4402_v1  ;;  %421 = vst.msk [vmem:[#allocation4 + $0x8] sm:$0xff] %vm419_vm1, %v4402_v1 }
  0xd8   : > { %422 = vst.msk [vmem:[#allocation4 + $0x10] sm:$0xff] %vm419_vm1, %v4402_v1  ;;  %423 = vst.msk [vmem:[#allocation4 + $0x18] sm:$0xff] %vm419_vm1, %v4402_v1 }
  0xd9   : > { %424 = vst.msk [vmem:[#allocation4 + $0x20] sm:$0xff] %vm419_vm1, %v4402_v1  ;;  %425 = vst.msk [vmem:[#allocation4 + $0x28] sm:$0xff] %vm419_vm1, %v4402_v1 }
  0xda   : > { %426 = vst.msk [vmem:[#allocation4 + $0x30] sm:$0xff] %vm419_vm1, %v4402_v1  ;;  %427 = vst.msk [vmem:[#allocation4 + $0x38] sm:$0xff] %vm419_vm1, %v4402_v1 }
  0xdb   : > { %428 = vst.msk [vmem:[#allocation4 + $0x40] sm:$0xff] %vm419_vm1, %v4402_v1  ;;  %429 = vst.msk [vmem:[#allocation4 + $0x48] sm:$0xff] %vm419_vm1, %v4402_v1 }
  0xdc   : > { %430 = vst.msk [vmem:[#allocation4 + $0x50] sm:$0xff] %vm419_vm1, %v4402_v1  ;;  %431 = vst.msk [vmem:[#allocation4 + $0x58] sm:$0xff] %vm419_vm1, %v4402_v1 }
  0xdd   : > { %432 = vst.msk [vmem:[#allocation4 + $0x60] sm:$0xff] %vm419_vm1, %v4402_v1  ;;  %433 = vst.msk [vmem:[#allocation4 + $0x68] sm:$0xff] %vm419_vm1, %v4402_v1 }
  0xde   : > { %434 = vst.msk [vmem:[#allocation4 + $0x70] sm:$0xff] %vm419_vm1, %v4402_v1  ;;  %435 = vst.msk [vmem:[#allocation4 + $0x78] sm:$0xff] %vm419_vm1, %v4402_v1 }
  0xdf   : > { %436 = vst.msk [vmem:[#allocation4 + $0x80] sm:$0xff] %vm419_vm1, %v4402_v1  ;;  %437 = vst.msk [vmem:[#allocation4 + $0x88] sm:$0xff] %vm419_vm1, %v4402_v1 }
  0xe0   : > { %438 = vst.msk [vmem:[#allocation4 + $0x90] sm:$0xff] %vm419_vm1, %v4402_v1  ;;  %439 = vst.msk [vmem:[#allocation4 + $0x98] sm:$0xff] %vm419_vm1, %v4402_v1 }
  0xe1   : > { %440 = vst.msk [vmem:[#allocation4 + $0xa0] sm:$0xff] %vm419_vm1, %v4402_v1  ;;  %441 = vst.msk [vmem:[#allocation4 + $0xa8] sm:$0xff] %vm419_vm1, %v4402_v1 }
  0xe2   : > { %442 = vst.msk [vmem:[#allocation4 + $0xb0] sm:$0xff] %vm419_vm1, %v4402_v1  ;;  %443 = vst.msk [vmem:[#allocation4 + $0xb8] sm:$0xff] %vm419_vm1, %v4402_v1 }
  0xe3   : > { %444 = vst.msk [vmem:[#allocation4 + $0xc0] sm:$0xff] %vm419_vm1, %v4402_v1  ;;  %445 = vst.msk [vmem:[#allocation4 + $0xc8] sm:$0xff] %vm419_vm1, %v4402_v1 }
  0xe4   : > { %446 = vst.msk [vmem:[#allocation4 + $0xd0] sm:$0xff] %vm419_vm1, %v4402_v1  ;;  %447 = vst.msk [vmem:[#allocation4 + $0xd8] sm:$0xff] %vm419_vm1, %v4402_v1 }
  0xe5   : > { %448 = vst.msk [vmem:[#allocation4 + $0xe0] sm:$0xff] %vm419_vm1, %v4402_v1  ;;  %449 = vst.msk [vmem:[#allocation4 + $0xe8] sm:$0xff] %vm419_vm1, %v4402_v1 }
  0xe6   : > { %450 = vst.msk [vmem:[#allocation4 + $0xf0] sm:$0xff] %vm419_vm1, %v4402_v1  ;;  %451 = vst.msk [vmem:[#allocation4 + $0xf8] sm:$0xff] %vm419_vm1, %v4402_v1 }
  0xe7 PF: > { %v4958_v2 = vld [vmem:[%s4781_s19] sm:$0xff]  ;;  %v4961_v3 = vld [vmem:[%s4781_s19 + $0x8] sm:$0xff]  ;;  %v4964_v4 = vld [vmem:[%s4781_s19 + $0x10] sm:$0xff]  ;;  %s6855_s0 = sld [smem:[#allocation25_spill]] }
  0xe8   : > { %v4967_v5 = vld [vmem:[%s4781_s19 + $0x18] sm:$0xff]  ;;  %v4970_v6 = vld [vmem:[%s4781_s19 + $0x20] sm:$0xff]  ;;  %v4973_v7 = vld [vmem:[%s4781_s19 + $0x28] sm:$0xff] }
  0xe9   : > { %v4976_v8 = vld [vmem:[%s4781_s19 + $0x30] sm:$0xff]  ;;  %v4979_v9 = vld [vmem:[%s4781_s19 + $0x38] sm:$0xff]  ;;  %v4982_v10 = vld [vmem:[%s4781_s19 + $0x40] sm:$0xff] }
  0xea   : > { %v4985_v11 = vld [vmem:[%s4781_s19 + $0x48] sm:$0xff]  ;;  %v4988_v12 = vld [vmem:[%s4781_s19 + $0x50] sm:$0xff]  ;;  %v4991_v13 = vld [vmem:[%s4781_s19 + $0x58] sm:$0xff] }
  0xeb   : > { %v4994_v14 = vld [vmem:[%s4781_s19 + $0x60] sm:$0xff]  ;;  %v4997_v15 = vld [vmem:[%s4781_s19 + $0x68] sm:$0xff]  ;;  %v5000_v16 = vld [vmem:[%s4781_s19 + $0x70] sm:$0xff] }
  0xec   : > { %v5003_v17 = vld [vmem:[%s4781_s19 + $0x78] sm:$0xff]  ;;  %v5006_v18 = vld [vmem:[%s4790_s13] sm:$0xff]  ;;  %v5009_v19 = vld [vmem:[%s4790_s13 + $0x8] sm:$0xff] }
  0xed   : > { %v5012_v20 = vld [vmem:[%s4790_s13 + $0x10] sm:$0xff]  ;;  %v5015_v21 = vld [vmem:[%s4790_s13 + $0x18] sm:$0xff]  ;;  %v5018_v22 = vld [vmem:[%s4790_s13 + $0x20] sm:$0xff]  ;;  %p3143_p4 = scmp.ne.s32.totalorder %s6855_s0, 0 }
  0xee   : > { %v5021_v23 = vld [vmem:[%s4790_s13 + $0x28] sm:$0xff]  ;;  %v5024_v24 = vld [vmem:[%s4790_s13 + $0x30] sm:$0xff]  ;;  %v5027_v25 = vld [vmem:[%s4790_s13 + $0x38] sm:$0xff]  ;;  %vm488_vm2 = vcmask (!%p3143_p4), 523264  }
  0xef   : > { %v5030_v26 = vld [vmem:[%s4790_s13 + $0x40] sm:$0xff]  ;;  %v5033_v27 = vld [vmem:[%s4790_s13 + $0x48] sm:$0xff]  ;;  %v5036_v28 = vld [vmem:[%s4790_s13 + $0x50] sm:$0xff]  ;;  %487 = sbr.rel (%p3143_p4) target bundleno = 256 (0x100), region = 52  ;;  %489 = vst.msk [vmem:[%s4794_s18] sm:$0xff] (!%p3143_p4), %vm488_vm2, %v4958_v2 }
  0xf0   : > { %v5039_v29 = vld [vmem:[%s4790_s13 + $0x58] sm:$0xff]  ;;  %v5042_v30 = vld [vmem:[%s4790_s13 + $0x60] sm:$0xff]  ;;  %v5045_v31 = vld [vmem:[%s4790_s13 + $0x68] sm:$0xff]  ;;  %490 = vst.msk [vmem:[%s4794_s18 + $0x8] sm:$0xff] (!%p3143_p4), %vm488_vm2, %v4961_v3 }
  0xf1   : > { %v5048_v32 = vld [vmem:[%s4790_s13 + $0x70] sm:$0xff]  ;;  %v5051_v33 = vld [vmem:[%s4790_s13 + $0x78] sm:$0xff]  ;;  %491 = vst.msk [vmem:[%s4794_s18 + $0x10] sm:$0xff] (!%p3143_p4), %vm488_vm2, %v4964_v4  ;;  %492 = vst.msk [vmem:[%s4794_s18 + $0x18] sm:$0xff] (!%p3143_p4), %vm488_vm2, %v4967_v5 }
  0xf2   : > { %493 = vst.msk [vmem:[%s4794_s18 + $0x20] sm:$0xff] (!%p3143_p4), %vm488_vm2, %v4970_v6  ;;  %494 = vst.msk [vmem:[%s4794_s18 + $0x28] sm:$0xff] (!%p3143_p4), %vm488_vm2, %v4973_v7 }
  0xf3   : > { %495 = vst.msk [vmem:[%s4794_s18 + $0x30] sm:$0xff] (!%p3143_p4), %vm488_vm2, %v4976_v8  ;;  %496 = vst.msk [vmem:[%s4794_s18 + $0x38] sm:$0xff] (!%p3143_p4), %vm488_vm2, %v4979_v9 }
  0xf4   : > { %497 = vst.msk [vmem:[%s4794_s18 + $0x40] sm:$0xff] (!%p3143_p4), %vm488_vm2, %v4982_v10  ;;  %498 = vst.msk [vmem:[%s4794_s18 + $0x48] sm:$0xff] (!%p3143_p4), %vm488_vm2, %v4985_v11 }
  0xf5   : > { %499 = vst.msk [vmem:[%s4794_s18 + $0x50] sm:$0xff] (!%p3143_p4), %vm488_vm2, %v4988_v12  ;;  %500 = vst.msk [vmem:[%s4794_s18 + $0x58] sm:$0xff] (!%p3143_p4), %vm488_vm2, %v4991_v13 }
  0xf6   : > { %501 = vst.msk [vmem:[%s4794_s18 + $0x60] sm:$0xff] %vm488_vm2, %v4994_v14  ;;  %502 = vst.msk [vmem:[%s4794_s18 + $0x68] sm:$0xff] %vm488_vm2, %v4997_v15 }
  0xf7   : > { %503 = vst.msk [vmem:[%s4794_s18 + $0x70] sm:$0xff] %vm488_vm2, %v5000_v16  ;;  %504 = vst.msk [vmem:[%s4794_s18 + $0x78] sm:$0xff] %vm488_vm2, %v5003_v17 }
  0xf8   : > { %3144 = vst.msk [vmem:[%s4794_s18 + $0x80] sm:$0xff] %vm488_vm2, %v5006_v18  ;;  %3145 = vst.msk [vmem:[%s4794_s18 + $0x88] sm:$0xff] %vm488_vm2, %v5009_v19 }
  0xf9   : > { %3146 = vst.msk [vmem:[%s4794_s18 + $0x90] sm:$0xff] %vm488_vm2, %v5012_v20  ;;  %3147 = vst.msk [vmem:[%s4794_s18 + $0x98] sm:$0xff] %vm488_vm2, %v5015_v21 }
  0xfa   : > { %3148 = vst.msk [vmem:[%s4794_s18 + $0xa0] sm:$0xff] %vm488_vm2, %v5018_v22  ;;  %3149 = vst.msk [vmem:[%s4794_s18 + $0xa8] sm:$0xff] %vm488_vm2, %v5021_v23 }
  0xfb   : > { %3150 = vst.msk [vmem:[%s4794_s18 + $0xb0] sm:$0xff] %vm488_vm2, %v5024_v24  ;;  %3151 = vst.msk [vmem:[%s4794_s18 + $0xb8] sm:$0xff] %vm488_vm2, %v5027_v25 }
  0xfc   : > { %3152 = vst.msk [vmem:[%s4794_s18 + $0xc0] sm:$0xff] %vm488_vm2, %v5030_v26  ;;  %3153 = vst.msk [vmem:[%s4794_s18 + $0xc8] sm:$0xff] %vm488_vm2, %v5033_v27 }
  0xfd   : > { %3154 = vst.msk [vmem:[%s4794_s18 + $0xd0] sm:$0xff] %vm488_vm2, %v5036_v28  ;;  %3155 = vst.msk [vmem:[%s4794_s18 + $0xd8] sm:$0xff] %vm488_vm2, %v5039_v29 }
  0xfe   : > { %3156 = vst.msk [vmem:[%s4794_s18 + $0xe0] sm:$0xff] %vm488_vm2, %v5042_v30  ;;  %3157 = vst.msk [vmem:[%s4794_s18 + $0xe8] sm:$0xff] %vm488_vm2, %v5045_v31 }
  0xff   : > { %3158 = vst.msk [vmem:[%s4794_s18 + $0xf0] sm:$0xff] %vm488_vm2, %v5048_v32  ;;  %3159 = vst.msk [vmem:[%s4794_s18 + $0xf8] sm:$0xff] %vm488_vm2, %v5051_v33 }
 0x100 PF: > { %s6856_s11 = sld [smem:[#allocation24_spill]]  ;;  %s6857_s20 = sld [smem:[#allocation25_spill]] }
 0x106   : > { %s3160_s4 = sshll.u32 %s6856_s11, 7  ;;  %s3240_s25 = sshll.u32 %s6857_s20, 7 }
 0x107   : > { %s3241_s26 = sadd.s32 128, %s3240_s25 }
 0x108   : > { %p3162_p6 = scmp.ge.s32.totalorder %s3160_s4, %s3241_s26 }
 0x10a   : > { %528 = sbr.rel (%p3162_p6) target bundleno = 1657 (0x679), region = 56 }
 0x111   : > { %vm616_vm3 = vcmask 523264   ;;  %v5158_v34 = vpack.c.bf16 %v4961_v3, %v4958_v2  ;;  %v5162_v35 = vpack.c.bf16 %v4967_v5, %v4964_v4  ;;  %v529_v36 = vld [vmem:[%s4773_s5] sm:$0xff]  ;;  %v5186_v39 = vpack.c.bf16 %v4973_v7, %v4970_v6  ;;  %v530_v45 = vld [vmem:[%s4773_s5 + $0x8] sm:$0xff]  ;;  %v531_v46 = vld [vmem:[%s4773_s5 + $0x10] sm:$0xff] }
 0x112   : > { %vm5167_vm4 = vmpackc.low %vm616_vm3, %vm616_vm3  ;;  %v5174_v38 = vmul.f32 0.125, %v529_v36  ;;  %v5196_v40 = vpack.c.bf16 %v4979_v9, %v4976_v8  ;;  %v5206_v41 = vpack.c.bf16 %v4985_v11, %v4982_v10  ;;  %v5216_v42 = vpack.c.bf16 %v4991_v13, %v4988_v12  ;;  %v532_v49 = vld [vmem:[%s4773_s5 + $0x18] sm:$0xff]  ;;  %v533_v50 = vld [vmem:[%s4773_s5 + $0x20] sm:$0xff] }
 0x113   : > { %3597 = vmatprep.subr.msk.bf16.mxu0 %vm5167_vm4, %v5158_v34  ;;  %v5226_v43 = vpack.c.bf16 %v4997_v15, %v4994_v14  ;;  %v5236_v44 = vpack.c.bf16 %v5003_v17, %v5000_v16  ;;  %v5249_v47 = vmul.f32 0.125, %v530_v45  ;;  %v5251_v48 = vmul.f32 0.125, %v531_v46  ;;  %v534_v53 = vld [vmem:[%s4773_s5 + $0x28] sm:$0xff]  ;;  %v535_v54 = vld [vmem:[%s4773_s5 + $0x30] sm:$0xff]  ;;  %v536_v57 = vld [vmem:[%s4773_s5 + $0x38] sm:$0xff] }
 0x114   : > { %3600 = vmatpush3.bf16.xpose.msk.msra.mxu0 %vm5167_vm4, %v5158_v34  ;;  %3403 = vmatprep.mubr.msk.f32.mxu0 %vm616_vm3, %v5174_v38  ;;  %v5257_v51 = vmul.f32 0.125, %v532_v49  ;;  %v5261_v52 = vmul.f32 0.125, %v533_v50  ;;  %v5267_v55 = vmul.f32 0.125, %v534_v53  ;;  %v5271_v56 = vmul.f32 0.125, %v535_v54  ;;  %v537_v58 = vld [vmem:[%s4773_s5 + $0x40] sm:$0xff]  ;;  %v538_v61 = vld [vmem:[%s4773_s5 + $0x48] sm:$0xff] }
 0x115   : > { %3603 = vmatprep.subr.msk.bf16.mxu0 %vm5167_vm4, %v5162_v35  ;;  %6860 = vst [vmem:[#allocation37_spill] sm:$0xff] %v5236_v44  ;;  %v5277_v59 = vmul.f32 0.125, %v536_v57  ;;  %v5281_v60 = vmul.f32 0.125, %v537_v58  ;;  %v539_v62 = vld [vmem:[%s4773_s5 + $0x50] sm:$0xff]  ;;  %v5287_v63 = vmul.f32 0.125, %v538_v61  ;;  %v540_v1 = vld [vmem:[%s4773_s5 + $0x58] sm:$0xff]  ;;  %v562_v11 = vlaneseq }
 0x116   : > { %v5291_v0 = vmul.f32 0.125, %v539_v62  ;;  %v541_v2 = vld [vmem:[%s4773_s5 + $0x60] sm:$0xff]  ;;  %v5297_v3 = vmul.f32 0.125, %v540_v1  ;;  %v542_v5 = vld [vmem:[%s4773_s5 + $0x68] sm:$0xff]  ;;  %v543_v6 = vld [vmem:[%s4773_s5 + $0x70] sm:$0xff]  ;;  %v5326_v14 = vstv %s3240_s25 }
 0x117   : > { %v5301_v4 = vmul.f32 0.125, %v541_v2  ;;  %v5307_v7 = vmul.f32 0.125, %v542_v5  ;;  %v5311_v8 = vmul.f32 0.125, %v543_v6  ;;  %v544_v9 = vld [vmem:[%s4773_s5 + $0x78] sm:$0xff]  ;;  %v5322_v12 = vshrl.u32 %v562_v11, 7  ;;  %s4404_s5 = smov 64  }
 0x118   : > { %v5316_v10 = vmul.f32 0.125, %v544_v9  ;;  %v597_v13 = vand.u32 127, %v562_v11  ;;  %v598_v15 = vstv %s3160_s4 }
 0x119   : > { %v566_v16 = vadd.s32 24, %v5322_v12  ;;  %v5333_v17 = vadd.s32 %v5326_v14, %v5322_v12  ;;  %v564_v45 = vadd.s32 8, %v5322_v12  ;;  %v565_v46 = vadd.s32 16, %v5322_v12 }
 0x11a   : > { %v5335_v36 = vadd.s32 %v598_v15, %v597_v13  ;;  %v567_v53 = vadd.s32 32, %v5322_v12  ;;  %v568_v58 = vadd.s32 40, %v5322_v12  ;;  %v569_v2 = vadd.s32 48, %v5322_v12 }
 0x11b   : > { %6863 = vst [vmem:[#allocation38_spill] sm:$0xff] %v5333_v17  ;;  %v5340_v49 = vadd.s32 %v5326_v14, %v566_v16  ;;  %v5345_v50 = vadd.s32 %v5326_v14, %v564_v45  ;;  %v5349_v57 = vadd.s32 %v5326_v14, %v565_v46  ;;  %v570_v9 = vadd.s32 56, %v5322_v12 }
 0x11c   : > { %3606 = vmatpush3.bf16.xpose.msk.msra.mxu0 %vm5167_vm4, %v5162_v35  ;;  %vm600_vm5 = vcmp.le.s32.totalorder %v5335_v36, %v5333_v17  ;;  %v5363_v1 = vadd.s32 %v5326_v14, %v567_v53  ;;  %v5369_v6 = vadd.s32 %v5326_v14, %v568_v58  ;;  %v5392_v45 = vadd.s32 %v5326_v14, %v569_v2 }
 0x11d   : > { %3609 = vmatprep.subr.msk.bf16.mxu0 %vm5167_vm4, %v5186_v39  ;;  %6864 = vst [vmem:[#allocation39_spill] sm:$0xff] %v5340_v49  ;;  %6865 = vst [vmem:[#allocation40_spill] sm:$0xff] %v5345_v50  ;;  %vm603_vm6 = vcmp.le.s32.totalorder %v5335_v36, %v5340_v49  ;;  %vm601_vm7 = vcmp.le.s32.totalorder %v5335_v36, %v5345_v50  ;;  %vm602_vm8 = vcmp.le.s32.totalorder %v5335_v36, %v5349_v57 }
 0x11e   : > { %6866 = vst [vmem:[#allocation41_spill] sm:$0xff] %v5349_v57  ;;  %6867 = vst [vmem:[#allocation42_spill] sm:$0xff] %v5363_v1  ;;  %vm604_vm9 = vcmp.le.s32.totalorder %v5335_v36, %v5363_v1  ;;  %v571_v46 = vadd.s32 64, %v5322_v12  ;;  %vm605_vm10 = vcmp.le.s32.totalorder %v5335_v36, %v5369_v6  ;;  %v572_v58 = vadd.s32 72, %v5322_v12 }
 0x11f   : > { %6868 = vst [vmem:[#allocation43_spill] sm:$0xff] %v5369_v6  ;;  %6869 = vst [vmem:[#allocation44_spill] sm:$0xff] %v5392_v45  ;;  %vm606_vm11 = vcmp.le.s32.totalorder %v5335_v36, %v5392_v45  ;;  %v575_v49 = vadd.s32 96, %v5322_v12 }
 0x124   : > { %3612 = vmatpush3.bf16.xpose.msk.msra.mxu0 %vm5167_vm4, %v5186_v39 }
 0x125   : > { %3615 = vmatprep.subr.msk.bf16.mxu0 %vm5167_vm4, %v5196_v40 }
 0x12c   : > { %3618 = vmatpush3.bf16.xpose.msk.msra.mxu0 %vm5167_vm4, %v5196_v40 }
 0x12d   : > { %3621 = vmatprep.subr.msk.bf16.mxu0 %vm5167_vm4, %v5206_v41 }
 0x134   : > { %3624 = vmatpush3.bf16.xpose.msk.msra.mxu0 %vm5167_vm4, %v5206_v41 }
 0x135   : > { %3627 = vmatprep.subr.msk.bf16.mxu0 %vm5167_vm4, %v5216_v42 }
 0x13c   : > { %3630 = vmatpush3.bf16.xpose.msk.msra.mxu0 %vm5167_vm4, %v5216_v42 }
 0x13d   : > { %3633 = vmatprep.subr.msk.bf16.mxu0 %vm5167_vm4, %v5226_v43 }
 0x144   : > { %3636 = vmatpush3.bf16.xpose.msk.msra.mxu0 %vm5167_vm4, %v5226_v43 }
 0x145   : > { %3639 = vmatprep.subr.msk.bf16.mxu0 %vm5167_vm4, %v5236_v44 }
 0x14c   : > { %3642 = vmatpush3.bf16.xpose.msk.msra.mxu0 %vm5167_vm4, %v5236_v44  ;;  %v577_v44 = vadd.s32 112, %v5322_v12 }
 0x153   : > { %3404 = vmatmul.mubr.msk.f32.vlgmr.msra.gmra.mrb[0].mxu0 %vm616_vm3, %v5249_v47 }
 0x154   : > { %3406 = vmatprep.mubr.msk.f32.mxu0 %vm616_vm3, %v5251_v48 }
 0x157   : > { %3407 = vmatmul.mubr.msk.f32.gmra.mrb[2].mxu0 %vm616_vm3, %v5257_v51 }
 0x158   : > { %3409 = vmatprep.mubr.msk.f32.mxu0 %vm616_vm3, %v5261_v52 }
 0x15b   : > { %3410 = vmatmul.mubr.msk.f32.gmra.mrb[4].mxu0 %vm616_vm3, %v5267_v55 }
 0x15c   : > { %3412 = vmatprep.mubr.msk.f32.mxu0 %vm616_vm3, %v5271_v56 }
 0x15f   : > { %3413 = vmatmul.mubr.msk.f32.gmra.mrb[6].mxu0 %vm616_vm3, %v5277_v59 }
 0x160   : > { %3415 = vmatprep.mubr.msk.f32.mxu0 %vm616_vm3, %v5281_v60 }
 0x163   : > { %3416 = vmatmul.mubr.msk.f32.gmra.mrb[8].mxu0 %vm616_vm3, %v5287_v63 }
 0x164   : > { %3418 = vmatprep.mubr.msk.f32.mxu0 %vm616_vm3, %v5291_v0 }
 0x167   : > { %3419 = vmatmul.mubr.msk.f32.gmra.mrb[10].mxu0 %vm616_vm3, %v5297_v3 }
 0x168   : > { %3421 = vmatprep.mubr.msk.f32.mxu0 %vm616_vm3, %v5301_v4 }
 0x16b   : > { %3422 = vmatmul.mubr.msk.f32.gmra.mrb[12].mxu0 %vm616_vm3, %v5307_v7 }
 0x16c   : > { %3424 = vmatprep.mubr.msk.f32.mxu0 %vm616_vm3, %v5311_v8 }
 0x16f   : > { %3425 = vmatmul.mubr.msk.f32.gmra.mrb[14].mxu0 %vm616_vm3, %v5316_v10 }
 0x226   : > { %v3405_v54 = vpop.f32.mrb[0].mxu0 }
 0x227   : > { %v779_v61 = vpop.f32.mrb[1].mxu0  ;;  %v5381_v15 = vsel %vm601_vm7, %v3405_v54, -1e+30  ;;  %v5398_v54 = vadd.s32 %v5326_v14, %v570_v9  ;;  %v5416_v9 = vadd.s32 %v5326_v14, %v571_v46 }
 0x228   : > { %v5355_v62 = vsel %vm600_vm5, %v779_v61, -1e+30 }
 0x229   : > { %890 = vmax.xlane.f32.xlu0 %v5355_v62  ;;  %6870 = vst [vmem:[#allocation45_spill] sm:$0xff] %v5398_v54  ;;  %6871 = vst [vmem:[#allocation46_spill] sm:$0xff] %v5416_v9  ;;  %vm607_vm12 = vcmp.le.s32.totalorder %v5335_v36, %v5398_v54  ;;  %vm608_vm13 = vcmp.le.s32.totalorder %v5335_v36, %v5416_v9 }
 0x22a   : > { %v3408_v5 = vpop.f32.mrb[2].mxu0 }
 0x22b   : > { %v5375_v11 = vsel %vm603_vm6, %v3408_v5, -1e+30  ;;  %v789_v13 = vpop.f32.mrb[3].mxu0 }
 0x22c   : > { %896 = vmax.xlane.f32.xlu1 %v5375_v11  ;;  %v5387_v16 = vsel %vm602_vm8, %v789_v13, -1e+30  ;;  %v573_v13 = vadd.s32 80, %v5322_v12 }
 0x22d   : > { %892 = vmax.xlane.f32.xlu0 %v5381_v15 }
 0x22e   : > { %v3411_v53 = vpop.f32.mrb[4].mxu0 }
 0x22f   : > { %v799_v61 = vpop.f32.mrb[5].mxu0  ;;  %v5410_v2 = vsel %vm605_vm10, %v3411_v53, -1e+30  ;;  %v574_v53 = vadd.s32 88, %v5322_v12 }
 0x230   : > { %894 = vmax.xlane.f32.xlu1 %v5387_v16  ;;  %v5405_v5 = vsel %vm604_vm9, %v799_v61, -1e+30  ;;  %v5422_v61 = vadd.s32 %v5326_v14, %v572_v58  ;;  %v5440_v58 = vadd.s32 %v5326_v14, %v573_v13  ;;  %v4403_v13 = vmov 0  }
 0x231   : > { %898 = vmax.xlane.f32.xlu0 %v5405_v5  ;;  %3938 = vset.pattern.permute.xlu1 %v4403_v13 }
 0x232   : > { %v3414_v57 = vpop.f32.mrb[6].mxu0  ;;  %6872 = vst [vmem:[#allocation47_spill] sm:$0xff] %v5422_v61  ;;  %6873 = vst [vmem:[#allocation48_spill] sm:$0xff] %v5440_v58  ;;  %vm609_vm14 = vcmp.le.s32.totalorder %v5335_v36, %v5422_v61  ;;  %3937 = vset.pattern.permute.xlu0 %v4403_v13  ;;  %vm6754_vm15 = vcmp.le.s32.totalorder %v5335_v36, %v5440_v58 }
 0x233   : > { %v809_v1 = vpop.f32.mrb[7].mxu0  ;;  %v5434_v46 = vsel %vm607_vm12, %v3414_v57, -1e+30  ;;  %v576_v57 = vadd.s32 104, %v5322_v12 }
 0x234   : > { %900 = vmax.xlane.f32.xlu1 %v5410_v2  ;;  %v5429_v6 = vsel %vm606_vm11, %v809_v1, -1e+30  ;;  %v5446_v1 = vadd.s32 %v5326_v14, %v574_v53  ;;  %v5464_v53 = vadd.s32 %v5326_v14, %v575_v49 }
 0x235   : > { %902 = vmax.xlane.f32.xlu0 %v5429_v6  ;;  %v5470_v9 = vadd.s32 %v5326_v14, %v576_v57 }
 0x236   : > { %v3417_v17 = vpop.f32.mrb[8].mxu0  ;;  %6874 = vst [vmem:[#allocation49_spill] sm:$0xff] %v5464_v53  ;;  %vm6755_vm0 = vcmp.le.s32.totalorder %v5335_v36, %v5446_v1  ;;  %vm612_vm1 = vcmp.le.s32.totalorder %v5335_v36, %v5464_v53  ;;  %v3643_v53 = vpack.c.bf16 %v5009_v19, %v5006_v18  ;;  %v3655_v18 = vpack.c.bf16 %v5027_v25, %v5024_v24  ;;  %v5541_v24 = vld [vmem:[#allocation2 + $0x8] sm:$0xff] }
 0x237   : > { %v819_v45 = vpop.f32.mrb[9].mxu0  ;;  %v5458_v50 = vsel %vm609_vm14, %v3417_v17, -1e+30  ;;  %v578_v17 = vadd.s32 120, %v5322_v12  ;;  %v5488_v12 = vadd.s32 %v5326_v14, %v577_v44  ;;  %vm613_vm2 = vcmp.le.s32.totalorder %v5335_v36, %v5470_v9 }
 0x238   : > { %904 = vmax.xlane.f32.xlu1 %v5434_v46  ;;  %v5453_v54 = vsel %vm608_vm13, %v819_v45, -1e+30  ;;  %3644 = vmatprep.subr.bf16.mxu1 %v3643_v53  ;;  %v3659_v19 = vpack.c.bf16 %v5033_v27, %v5030_v26  ;;  %v3663_v25 = vpack.c.bf16 %v5039_v29, %v5036_v28  ;;  %v5562_v29 = vld [vmem:[#allocation2 + $0x20] sm:$0xff]  ;;  %v5574_v28 = vld [vmem:[#allocation2 + $0x28] sm:$0xff] }
 0x239   : > { %906 = vmax.xlane.f32.xlu0 %v5453_v54  ;;  %3724 = vmatprep.subr.bf16.mxu0 %v3643_v53  ;;  %6878 = vst [vmem:[#allocation53_spill] sm:$0xff] %v5562_v29  ;;  %6880 = vst [vmem:[#allocation55_spill] sm:$0xff] %v5574_v28 }
 0x23a   : > { %v3420_v45 = vpop.f32.mrb[10].mxu0  ;;  %3646 = vmatpush3.bf16.msra.mxu1 %v3643_v53  ;;  %3726 = vmatpush3.bf16.msra.mxu0 %v3643_v53 }
 0x23b   : > { %v829_v61 = vpop.f32.mrb[11].mxu0  ;;  %v5482_v13 = vsel %vm6755_vm0, %v3420_v45, -1e+30 }
 0x23c   : > { %908 = vmax.xlane.f32.xlu1 %v5458_v50  ;;  %v5477_v49 = vsel %vm6754_vm15, %v829_v61, -1e+30  ;;  %v5493_v61 = vadd.s32 %v5326_v14, %v578_v17  ;;  %vm6757_vm15 = vcmp.le.s32.totalorder %v5335_v36, %v5488_v12 }
 0x23d   : > { %910 = vmax.xlane.f32.xlu0 %v5477_v49 }
 0x23e   : > { %v3423_v57 = vpop.f32.mrb[12].mxu0  ;;  %vm615_vm0 = vcmp.le.s32.totalorder %v5335_v36, %v5493_v61 }
 0x23f   : > { %v839_v58 = vpop.f32.mrb[13].mxu0  ;;  %v5504_v44 = vsel %vm613_vm2, %v3423_v57, -1e+30 }
 0x240   : > { %912 = vmax.xlane.f32.xlu1 %v5482_v13  ;;  %v5499_v45 = vsel %vm612_vm1, %v839_v58, -1e+30 }
 0x241   : > { %914 = vmax.xlane.f32.xlu0 %v5499_v45 }
 0x242   : > { %v3426_v14 = vpop.f32.mrb[14].mxu0 }
 0x243   : > { %v849_v17 = vpop.f32.mrb[15].mxu0  ;;  %v5520_v57 = vsel %vm615_vm0, %v3426_v14, -1e+30  ;;  %v3651_v14 = vpack.c.bf16 %v5021_v23, %v5018_v22  ;;  %v5539_v23 = vld [vmem:[#allocation2 + $0x18] sm:$0xff] }
 0x244   : > { %916 = vmax.xlane.f32.xlu1 %v5504_v44  ;;  %v5515_v58 = vsel %vm6757_vm15, %v849_v17, -1e+30  ;;  %v3647_v17 = vpack.c.bf16 %v5015_v21, %v5012_v20  ;;  %v5534_v20 = vld [vmem:[#allocation2] sm:$0xff]  ;;  %vm1194_vm15 = vcmask 7168   ;;  %6875 = vst [vmem:[#allocation50_spill] sm:$0xff] %v5539_v23 }
 0x245   : > { %918 = vmax.xlane.f32.xlu0 %v5515_v58 }
 0x246   : > { %3648 = vmatprep.subr.bf16.mxu1 %v3647_v17  ;;  %3728 = vmatprep.subr.bf16.mxu0 %v3647_v17 }
 0x247   : > { %3650 = vmatpush3.bf16.msra.mxu1 %v3647_v17  ;;  %3730 = vmatpush3.bf16.msra.mxu0 %v3647_v17 }
 0x248   : > { %920 = vmax.xlane.f32.xlu1 %v5520_v57  ;;  %3652 = vmatprep.subr.bf16.mxu1 %v3651_v14 }
 0x249   : > { %3732 = vmatprep.subr.bf16.mxu0 %v3651_v14 }
 0x24b   : > { %3654 = vmatpush3.bf16.msra.mxu1 %v3651_v14  ;;  %3734 = vmatpush3.bf16.msra.mxu0 %v3651_v14 }
 0x24c   : > { %3656 = vmatprep.subr.bf16.mxu1 %v3655_v18  ;;  %3736 = vmatprep.subr.bf16.mxu0 %v3655_v18 }
 0x24f   : > { %3658 = vmatpush3.bf16.msra.mxu1 %v3655_v18  ;;  %3738 = vmatpush3.bf16.msra.mxu0 %v3655_v18  ;;  %v5556_v18 = vld [vmem:[#allocation2 + $0x10] sm:$0xff] }
 0x250   : > { %3660 = vmatprep.subr.bf16.mxu1 %v3659_v19  ;;  %3740 = vmatprep.subr.bf16.mxu0 %v3659_v19  ;;  %6877 = vst [vmem:[#allocation52_spill] sm:$0xff] %v5556_v18 }
 0x253   : > { %3662 = vmatpush3.bf16.msra.mxu1 %v3659_v19  ;;  %3742 = vmatpush3.bf16.msra.mxu0 %v3659_v19  ;;  %v3667_v19 = vpack.c.bf16 %v5045_v31, %v5042_v30  ;;  %v5583_v31 = vld [vmem:[#allocation2 + $0x30] sm:$0xff] }
 0x254   : > { %3664 = vmatprep.subr.bf16.mxu1 %v3663_v25  ;;  %3744 = vmatprep.subr.bf16.mxu0 %v3663_v25  ;;  %6882 = vst [vmem:[#allocation57_spill] sm:$0xff] %v5583_v31 }
 0x257   : > { %3666 = vmatpush3.bf16.msra.mxu1 %v3663_v25  ;;  %3746 = vmatpush3.bf16.msra.mxu0 %v3663_v25 }
 0x258   : > { %3668 = vmatprep.subr.bf16.mxu1 %v3667_v19  ;;  %3748 = vmatprep.subr.bf16.mxu0 %v3667_v19 }
 0x25b   : > { %3670 = vmatpush3.bf16.msra.mxu1 %v3667_v19  ;;  %3750 = vmatpush3.bf16.msra.mxu0 %v3667_v19 }
 0x2b6   : > { %v891_v21 = vpop.xlane.xlu0 %890 }
 0x2b7   : > { %v5537_v22 = vmax.f32 %v5534_v20, %v891_v21 }
 0x2b9   : > { %1500 = vst.msk [vmem:[#allocation2] sm:$0xff] %vm1194_vm15, %v5537_v22  ;;  %v897_v27 = vpop.xlane.xlu1 %896  ;;  %988 = vperm.xlu0 %3937, %v5537_v22  }
 0x2ba   : > { %v5551_v53 = vmax.f32 %v5539_v23, %v897_v27  ;;  %v893_v17 = vpop.xlane.xlu0 %892 }
 0x2bb   : > { %v5554_v14 = vmax.f32 %v5541_v24, %v893_v17 }
 0x2bc   : > { %6876 = vst [vmem:[#allocation51_spill] sm:$0xff] %v5551_v53  ;;  %1503 = vst.msk [vmem:[#allocation2 + $0x18] sm:$0xff] %vm1194_vm15, %v5551_v53 }
 0x2bd   : > { %1501 = vst.msk [vmem:[#allocation2 + $0x8] sm:$0xff] %vm1194_vm15, %v5554_v14  ;;  %v895_v27 = vpop.xlane.xlu1 %894  ;;  %993 = vperm.xlu1 %3938, %v5554_v14  }
 0x2be   : > { %v5572_v25 = vmax.f32 %v5556_v18, %v895_v27  ;;  %v899_v17 = vpop.xlane.xlu0 %898  ;;  %v3671_v27 = vpack.c.bf16 %v5051_v33, %v5048_v32  ;;  %v5595_v18 = vld [vmem:[#allocation2 + $0x38] sm:$0xff]  ;;  %v5604_v33 = vld [vmem:[#allocation2 + $0x40] sm:$0xff] }
 0x2bf   : > { %v5577_v26 = vmax.f32 %v5562_v29, %v899_v17  ;;  %6884 = vst [vmem:[#allocation59_spill] sm:$0xff] %v5595_v18  ;;  %6885 = vst [vmem:[#allocation60_spill] sm:$0xff] %v5604_v33  ;;  %v5617_v17 = vld [vmem:[#allocation2 + $0x48] sm:$0xff] }
 0x2c0   : > { %6879 = vst [vmem:[#allocation54_spill] sm:$0xff] %v5572_v25  ;;  %1502 = vst.msk [vmem:[#allocation2 + $0x10] sm:$0xff] %vm1194_vm15, %v5572_v25  ;;  %3672 = vmatprep.subr.bf16.mxu1 %v3671_v27  ;;  %3752 = vmatprep.subr.bf16.mxu0 %v3671_v27 }
 0x2c1   : > { %6881 = vst [vmem:[#allocation56_spill] sm:$0xff] %v5577_v26  ;;  %v901_v21 = vpop.xlane.xlu1 %900  ;;  %1003 = vperm.xlu1 %3938, %v5551_v53   ;;  %1504 = vst.msk [vmem:[#allocation2 + $0x20] sm:$0xff] %vm1194_vm15, %v5577_v26  ;;  %3674 = vmatpush3.bf16.msra.mxu1 %v3671_v27  ;;  %v5636_v53 = vld [vmem:[#allocation2 + $0x58] sm:$0xff] }
 0x2c2   : > { %v5593_v19 = vmax.f32 %v5574_v28, %v901_v21  ;;  %v903_v30 = vpop.xlane.xlu0 %902  ;;  %3754 = vmatpush3.bf16.msra.mxu0 %v3671_v27  ;;  %3677 = vmatprep.subr.msk.bf16.mxu1 %vm5167_vm4, %v5158_v34  ;;  %6886 = vst [vmem:[#allocation61_spill] sm:$0xff] %v5617_v17  ;;  %6889 = vst [vmem:[#allocation64_spill] sm:$0xff] %v5636_v53 }
 0x2c3   : > { %v5598_v23 = vmax.f32 %v5583_v31, %v903_v30 }
 0x2c4   : > { %6883 = vst [vmem:[#allocation58_spill] sm:$0xff] %v5593_v19  ;;  %1505 = vst.msk [vmem:[#allocation2 + $0x28] sm:$0xff] %vm1194_vm15, %v5593_v19 }
 0x2c5   : > { %v905_v21 = vpop.xlane.xlu1 %904  ;;  %998 = vperm.xlu1 %3938, %v5572_v25   ;;  %1506 = vst.msk [vmem:[#allocation2 + $0x30] sm:$0xff] %vm1194_vm15, %v5598_v23  ;;  %v5626_v25 = vld [vmem:[#allocation2 + $0x50] sm:$0xff] }
 0x2c6   : > { %v5615_v27 = vmax.f32 %v5595_v18, %v905_v21  ;;  %v907_v32 = vpop.xlane.xlu0 %906  ;;  %6887 = vst [vmem:[#allocation62_spill] sm:$0xff] %v5626_v25  ;;  %v5646_v21 = vld [vmem:[#allocation2 + $0x60] sm:$0xff] }
 0x2c7   : > { %v5620_v28 = vmax.f32 %v5604_v33, %v907_v32 }
 0x2c8   : > { %1507 = vst.msk [vmem:[#allocation2 + $0x38] sm:$0xff] %vm1194_vm15, %v5615_v27 }
 0x2c9   : > { %v909_v30 = vpop.xlane.xlu1 %908  ;;  %1013 = vperm.xlu1 %3938, %v5593_v19   ;;  %1508 = vst.msk [vmem:[#allocation2 + $0x40] sm:$0xff] %vm1194_vm15, %v5620_v28 }
 0x2ca   : > { %v5634_v32 = vmax.f32 %v5617_v17, %v909_v30  ;;  %v911_v31 = vpop.xlane.xlu0 %910  ;;  %v5656_v17 = vld [vmem:[#allocation2 + $0x68] sm:$0xff]  ;;  %v5666_v30 = vld [vmem:[#allocation2 + $0x70] sm:$0xff] }
 0x2cb   : > { %v5639_v29 = vmax.f32 %v5626_v25, %v911_v31 }
 0x2cc   : > { %6888 = vst [vmem:[#allocation63_spill] sm:$0xff] %v5634_v32  ;;  %1509 = vst.msk [vmem:[#allocation2 + $0x48] sm:$0xff] %vm1194_vm15, %v5634_v32  ;;  %1033 = vperm.xlu0 %3937, %v5634_v32  }
 0x2cd   : > { %v913_v33 = vpop.xlane.xlu1 %912  ;;  %1008 = vperm.xlu1 %3938, %v5577_v26   ;;  %1510 = vst.msk [vmem:[#allocation2 + $0x50] sm:$0xff] %vm1194_vm15, %v5639_v29 }
 0x2ce   : > { %v5654_v31 = vmax.f32 %v5636_v53, %v913_v33  ;;  %v915_v18 = vpop.xlane.xlu0 %914  ;;  %v5676_v53 = vld [vmem:[#allocation2 + $0x78] sm:$0xff] }
 0x2cf   : > { %v5659_v19 = vmax.f32 %v5646_v21, %v915_v18 }
 0x2d0   : > { %6890 = vst [vmem:[#allocation65_spill] sm:$0xff] %v5654_v31  ;;  %1511 = vst.msk [vmem:[#allocation2 + $0x58] sm:$0xff] %vm1194_vm15, %v5654_v31  ;;  %1043 = vperm.xlu0 %3937, %v5654_v31  }
 0x2d1   : > { %v917_v25 = vpop.xlane.xlu1 %916  ;;  %1023 = vperm.xlu1 %3938, %v5615_v27   ;;  %1512 = vst.msk [vmem:[#allocation2 + $0x60] sm:$0xff] %vm1194_vm15, %v5659_v19 }
 0x2d2   : > { %v5674_v18 = vmax.f32 %v5656_v17, %v917_v25  ;;  %v919_v32 = vpop.xlane.xlu0 %918 }
 0x2d3   : > { %v5679_v26 = vmax.f32 %v5666_v30, %v919_v32 }
 0x2d4   : > { %1513 = vst.msk [vmem:[#allocation2 + $0x68] sm:$0xff] %vm1194_vm15, %v5674_v18  ;;  %1053 = vperm.xlu0 %3937, %v5674_v18  }
 0x2d5   : > { %1018 = vperm.xlu1 %3938, %v5598_v23   ;;  %v921_v33 = vpop.xlane.xlu1 %920  ;;  %1514 = vst.msk [vmem:[#allocation2 + $0x70] sm:$0xff] %vm1194_vm15, %v5679_v26 }
 0x2d6   : > { %v5692_v32 = vmax.f32 %v5676_v53, %v921_v33 }
 0x2d8   : > { %1515 = vst.msk [vmem:[#allocation2 + $0x78] sm:$0xff] %vm1194_vm15, %v5692_v32  ;;  %1063 = vperm.xlu0 %3937, %v5692_v32  }
 0x2d9   : > { %1028 = vperm.xlu1 %3938, %v5620_v28  }
 0x2dc   : > { %1518 = vrot.lane.b32.xlu0 %v5249_v47, %s4404_s5 }
 0x2dd   : > { %1038 = vperm.xlu1 %3938, %v5639_v29  }
 0x2e0   : > { %1522 = vrot.lane.b32.xlu0 %v5257_v51, %s4404_s5 }
 0x2e1   : > { %1048 = vperm.xlu1 %3938, %v5659_v19  }
 0x2e4   : > { %1526 = vrot.lane.b32.xlu0 %v5267_v55, %s4404_s5 }
 0x2e5   : > { %1058 = vperm.xlu1 %3938, %v5679_v26  }
 0x2e8   : > { %1530 = vrot.lane.b32.xlu0 %v5277_v59, %s4404_s5 }
 0x2e9   : > { %1516 = vrot.lane.b32.xlu1 %v5174_v38, %s4404_s5 }
 0x2ec   : > { %1534 = vrot.lane.b32.xlu0 %v5287_v63, %s4404_s5 }
 0x2ed   : > { %1520 = vrot.lane.b32.xlu1 %v5251_v48, %s4404_s5 }
 0x2f0   : > { %1538 = vrot.lane.b32.xlu0 %v5297_v3, %s4404_s5 }
 0x2f1   : > { %1524 = vrot.lane.b32.xlu1 %v5261_v52, %s4404_s5 }
 0x2f4   : > { %1542 = vrot.lane.b32.xlu0 %v5307_v7, %s4404_s5 }
 0x2f5   : > { %1528 = vrot.lane.b32.xlu1 %v5271_v56, %s4404_s5 }
 0x2f8   : > { %1546 = vrot.lane.b32.xlu0 %v5316_v10, %s4404_s5 }
 0x2f9   : > { %1532 = vrot.lane.b32.xlu1 %v5281_v60, %s4404_s5 }
 0x2fd   : > { %1536 = vrot.lane.b32.xlu1 %v5291_v0, %s4404_s5 }
 0x301   : > { %1540 = vrot.lane.b32.xlu1 %v5301_v4, %s4404_s5 }
 0x305   : > { %1544 = vrot.lane.b32.xlu1 %v5311_v8, %s4404_s5 }
 0x338   : > { %v989_v38 = vpop.permute.xlu0 %988 }
 0x339   : > { %v1066_v47 = vsub.f32 %v5355_v62, %v989_v38 }
 0x33b   : > { %v1082_v48 = vmul.f32 1.442695, %v1066_v47 }
 0x33c   : > { %v994_v51 = vpop.permute.xlu1 %993 }
 0x33d   : > { %3939 = vpow2.f32 %v1082_v48  ;;  %v1067_v52 = vsub.f32 %v5381_v15, %v994_v51 }
 0x33f   : > { %v1084_v55 = vmul.f32 1.442695, %v1067_v52 }
 0x340   : > { %v1004_v56 = vpop.permute.xlu1 %1003 }
 0x341   : > { %3941 = vpow2.f32 %v1084_v55  ;;  %v1069_v59 = vsub.f32 %v5375_v11, %v1004_v56 }
 0x343   : > { %v1088_v3 = vmul.f32 1.442695, %v1069_v59 }
 0x344   : > { %v999_v60 = vpop.permute.xlu1 %998 }
 0x345   : > { %v1068_v63 = vsub.f32 %v5387_v16, %v999_v60 }
 0x347   : > { %v5723_v0 = vpop.eup %3939  ;;  %v1086_v4 = vmul.f32 1.442695, %v1068_v63 }
 0x348   : > { %v1014_v7 = vpop.permute.xlu1 %1013  ;;  %3459 = vmatprep.mubr.f32.mxu1 %v5723_v0 }
 0x349   : > { %3943 = vpow2.f32 %v1086_v4  ;;  %v1071_v10 = vsub.f32 %v5410_v2, %v1014_v7 }
 0x34a   : > { %3945 = vpow2.f32 %v1088_v3 }
 0x34b   : > { %v5726_v8 = vpop.eup %3941  ;;  %v1034_v15 = vpop.permute.xlu0 %1033  ;;  %v1092_v16 = vmul.f32 1.442695, %v1071_v10 }
 0x34c   : > { %v1009_v62 = vpop.permute.xlu1 %1008  ;;  %3460 = vmatmul.mubr.f32.vlgmr.msra.gmra.mrb[0].mxu1 %v5726_v8 }
 0x34d   : > { %v1070_v11 = vsub.f32 %v5405_v5, %v1009_v62  ;;  %3680 = vmatpush3.bf16.xpose.msk.msra.mxu1 %vm5167_vm4, %v5158_v34 }
 0x34e   : > { %3683 = vmatprep.subr.msk.bf16.mxu1 %vm5167_vm4, %v5162_v35 }
 0x34f   : > { %v1090_v33 = vmul.f32 1.442695, %v1070_v11  ;;  %v1044_v48 = vpop.permute.xlu0 %1043 }
 0x350   : > { %v1024_v38 = vpop.permute.xlu1 %1023 }
 0x351   : > { %3947 = vpow2.f32 %v1090_v33  ;;  %v1073_v2 = vsub.f32 %v5434_v46, %v1024_v38  ;;  %v1075_v46 = vsub.f32 %v5458_v50, %v1034_v15 }
 0x352   : > { %3949 = vpow2.f32 %v1092_v16 }
 0x353   : > { %v5737_v47 = vpop.eup %3943  ;;  %v1096_v52 = vmul.f32 1.442695, %v1073_v2  ;;  %v1054_v60 = vpop.permute.xlu0 %1053  ;;  %v1100_v63 = vmul.f32 1.442695, %v1075_v46 }
 0x354   : > { %v1019_v5 = vpop.permute.xlu1 %1018  ;;  %3462 = vmatprep.mubr.f32.mxu1 %v5737_v47  ;;  %v5741_v51 = vpop.eup %3945 }
 0x355   : > { %v1072_v34 = vsub.f32 %v5429_v6, %v1019_v5  ;;  %3686 = vmatpush3.bf16.xpose.msk.msra.mxu1 %vm5167_vm4, %v5162_v35  ;;  %v1077_v35 = vsub.f32 %v5482_v13, %v1044_v48  ;;  %v1079_v13 = vsub.f32 %v5504_v44, %v1054_v60 }
 0x356   : > { %3463 = vmatmul.mubr.f32.gmra.mrb[2].mxu1 %v5741_v51  ;;  %3689 = vmatprep.subr.msk.bf16.mxu1 %vm5167_vm4, %v5186_v39 }
 0x357   : > { %v1094_v55 = vmul.f32 1.442695, %v1072_v34  ;;  %v1064_v62 = vpop.permute.xlu0 %1063 }
 0x358   : > { %v1029_v56 = vpop.permute.xlu1 %1028  ;;  %v1081_v16 = vsub.f32 %v5520_v57, %v1064_v62 }
 0x359   : > { %3951 = vpow2.f32 %v1094_v55  ;;  %v1074_v59 = vsub.f32 %v5453_v54, %v1029_v56  ;;  %v1104_v54 = vmul.f32 1.442695, %v1077_v35 }
 0x35a   : > { %3953 = vpow2.f32 %v1096_v52  ;;  %v1112_v57 = vmul.f32 1.442695, %v1081_v16 }
 0x35b   : > { %v5753_v6 = vpop.eup %3947  ;;  %v1098_v3 = vmul.f32 1.442695, %v1074_v59  ;;  %v1519_v56 = vpop.permute.xlu0 %1518  ;;  %v6891_v59 = vld [vmem:[#allocation37_spill] sm:$0xff] }
 0x35c   : > { %v1039_v4 = vpop.permute.xlu1 %1038  ;;  %3465 = vmatprep.mubr.f32.mxu1 %v5753_v6  ;;  %v5757_v7 = vpop.eup %3949 }
 0x35d   : > { %3955 = vpow2.f32 %v1098_v3  ;;  %v1076_v50 = vsub.f32 %v5477_v49, %v1039_v4  ;;  %3692 = vmatpush3.bf16.xpose.msk.msra.mxu1 %vm5167_vm4, %v5186_v39  ;;  %v1108_v39 = vmul.f32 1.442695, %v1079_v13 }
 0x35e   : > { %3466 = vmatmul.mubr.f32.gmra.mrb[4].mxu1 %v5757_v7  ;;  %3695 = vmatprep.subr.msk.bf16.mxu1 %vm5167_vm4, %v5196_v40  ;;  %3957 = vpow2.f32 %v1100_v63 }
 0x35f   : > { %v1102_v10 = vmul.f32 1.442695, %v1076_v50  ;;  %v1523_v63 = vpop.permute.xlu0 %1522 }
 0x360   : > { %v1049_v11 = vpop.permute.xlu1 %1048 }
 0x361   : > { %3959 = vpow2.f32 %v1102_v10  ;;  %v1078_v49 = vsub.f32 %v5499_v45, %v1049_v11 }
 0x362   : > { %3961 = vpow2.f32 %v1104_v54 }
 0x363   : > { %v5769_v15 = vpop.eup %3951  ;;  %v1106_v33 = vmul.f32 1.442695, %v1078_v49  ;;  %v1527_v35 = vpop.permute.xlu0 %1526 }
 0x364   : > { %v1059_v38 = vpop.permute.xlu1 %1058  ;;  %3468 = vmatprep.mubr.f32.mxu1 %v5769_v15  ;;  %v5773_v2 = vpop.eup %3953 }
 0x365   : > { %3963 = vpow2.f32 %v1106_v33  ;;  %v1080_v44 = vsub.f32 %v5515_v58, %v1059_v38  ;;  %3698 = vmatpush3.bf16.xpose.msk.msra.mxu1 %vm5167_vm4, %v5196_v40 }
 0x366   : > { %3469 = vmatmul.mubr.f32.gmra.mrb[6].mxu1 %v5773_v2  ;;  %3701 = vmatprep.subr.msk.bf16.mxu1 %vm5167_vm4, %v5206_v41  ;;  %3965 = vpow2.f32 %v1108_v39 }
 0x367   : > { %v5783_v45 = vpop.eup %3955  ;;  %v1110_v48 = vmul.f32 1.442695, %v1080_v44  ;;  %v1531_v4 = vpop.permute.xlu0 %1530 }
 0x368   : > { %3471 = vmatprep.mubr.f32.mxu1 %v5783_v45  ;;  %v5786_v5 = vpop.eup %3957  ;;  %v1517_v55 = vpop.permute.xlu1 %1516 }
 0x369   : > { %3967 = vpow2.f32 %v1110_v48 }
 0x36a   : > { %3472 = vmatmul.mubr.f32.gmra.mrb[8].mxu1 %v5786_v5  ;;  %3969 = vpow2.f32 %v1112_v57 }
 0x36b   : > { %v5789_v58 = vpop.eup %3959  ;;  %v1535_v50 = vpop.permute.xlu0 %1534 }
 0x36c   : > { %3474 = vmatprep.mubr.f32.mxu1 %v5789_v58  ;;  %v5792_v40 = vpop.eup %3961  ;;  %v1521_v60 = vpop.permute.xlu1 %1520 }
 0x36d   : > { %3704 = vmatpush3.bf16.xpose.msk.msra.mxu1 %vm5167_vm4, %v5206_v41 }
 0x36e   : > { %3475 = vmatmul.mubr.f32.gmra.mrb[10].mxu1 %v5792_v40  ;;  %3707 = vmatprep.subr.msk.bf16.mxu1 %vm5167_vm4, %v5216_v42 }
 0x36f   : > { %v5801_v34 = vpop.eup %3963  ;;  %v1539_v37 = vpop.permute.xlu0 %1538 }
 0x370   : > { %3477 = vmatprep.mubr.f32.mxu1 %v5801_v34  ;;  %v5804_v46 = vpop.eup %3965 }
 0x372   : > { %3478 = vmatmul.mubr.f32.gmra.mrb[12].mxu1 %v5804_v46 }
 0x373   : > { %v5807_v52 = vpop.eup %3967  ;;  %v1543_v10 = vpop.permute.xlu0 %1542 }
 0x374   : > { %3480 = vmatprep.mubr.f32.mxu1 %v5807_v52  ;;  %v5810_v41 = vpop.eup %3969 }
 0x375   : > { %3710 = vmatpush3.bf16.xpose.msk.msra.mxu1 %vm5167_vm4, %v5216_v42  ;;  %v1525_v42 = vpop.permute.xlu1 %1524 }
 0x376   : > { %3481 = vmatmul.mubr.f32.gmra.mrb[14].mxu1 %v5810_v41  ;;  %3713 = vmatprep.subr.msk.bf16.mxu1 %vm5167_vm4, %v5226_v43 }
 0x377   : > { %3515 = vmatprep.mubr.msk.f32.mxu1 %vm616_vm3, %v1517_v55  ;;  %v1547_v11 = vpop.permute.xlu0 %1546 }
 0x379   : > { %v1529_v3 = vpop.permute.xlu1 %1528 }
 0x37d   : > { %3716 = vmatpush3.bf16.xpose.msk.msra.mxu1 %vm5167_vm4, %v5226_v43  ;;  %v1533_v43 = vpop.permute.xlu1 %1532 }
 0x37e   : > { %3719 = vmatprep.subr.msk.bf16.mxu1 %vm5167_vm4, %v6891_v59 }
 0x381   : > { %v1537_v54 = vpop.permute.xlu1 %1536 }
 0x385   : > { %3722 = vmatpush3.bf16.xpose.msk.msra.mxu1 %vm5167_vm4, %v6891_v59  ;;  %v1541_v13 = vpop.permute.xlu1 %1540  ;;  %vm6926_vm4 = vcmp.le.s32.totalorder %v5335_v36, %v5446_v1 }
 0x389   : > { %v1545_v62 = vpop.permute.xlu1 %1544 }
 0x38c   : > { %3516 = vmatmul.mubr.msk.f32.vlgmr.msra.gmra.mrb[16].mxu1 %vm616_vm3, %v1519_v56 }
 0x38d   : > { %3518 = vmatprep.mubr.msk.f32.mxu1 %vm616_vm3, %v1521_v60 }
 0x390   : > { %3519 = vmatmul.mubr.msk.f32.gmra.mrb[18].mxu1 %vm616_vm3, %v1523_v63 }
 0x391   : > { %3521 = vmatprep.mubr.msk.f32.mxu1 %vm616_vm3, %v1525_v42 }
 0x394   : > { %3522 = vmatmul.mubr.msk.f32.gmra.mrb[20].mxu1 %vm616_vm3, %v1527_v35 }
 0x395   : > { %3524 = vmatprep.mubr.msk.f32.mxu1 %vm616_vm3, %v1529_v3 }
 0x398   : > { %3525 = vmatmul.mubr.msk.f32.gmra.mrb[22].mxu1 %vm616_vm3, %v1531_v4 }
 0x399   : > { %3527 = vmatprep.mubr.msk.f32.mxu1 %vm616_vm3, %v1533_v43 }
 0x39c   : > { %3528 = vmatmul.mubr.msk.f32.gmra.mrb[24].mxu1 %vm616_vm3, %v1535_v50 }
 0x39d   : > { %3530 = vmatprep.mubr.msk.f32.mxu1 %vm616_vm3, %v1537_v54 }
 0x3a0   : > { %3531 = vmatmul.mubr.msk.f32.gmra.mrb[26].mxu1 %vm616_vm3, %v1539_v37 }
 0x3a1   : > { %3533 = vmatprep.mubr.msk.f32.mxu1 %vm616_vm3, %v1541_v13 }
 0x3a4   : > { %3534 = vmatmul.mubr.msk.f32.gmra.mrb[28].mxu1 %vm616_vm3, %v1543_v10 }
 0x3a5   : > { %3536 = vmatprep.mubr.msk.f32.mxu1 %vm616_vm3, %v1545_v62 }
 0x3a8   : > { %3537 = vmatmul.mubr.msk.f32.gmra.mrb[30].mxu1 %vm616_vm3, %v1547_v11 }
 0x41f   : > { %v5844_v49 = vpop.f32.mrb[0].mxu1 }
 0x420   : > { %6892 = vst [vmem:[#allocation37_spill] sm:$0xff] %v5844_v49  ;;  %v5846_v39 = vpop.f32.mrb[1].mxu1 }
 0x421   : > { %6893 = vst [vmem:[#allocation66_spill] sm:$0xff] %v5846_v39  ;;  %v6054_v39 = vld [vmem:[#allocation2 + $0xc8] sm:$0xff] }
 0x429   : > { %v5848_v16 = vpop.f32.mrb[2].mxu1 }
 0x42a   : > { %6894 = vst [vmem:[#allocation67_spill] sm:$0xff] %v5848_v16  ;;  %v5850_v33 = vpop.f32.mrb[3].mxu1 }
 0x42b   : > { %6895 = vst [vmem:[#allocation68_spill] sm:$0xff] %v5850_v33 }
 0x431   : > { %v5852_v38 = vpop.f32.mrb[4].mxu1 }
 0x432   : > { %6896 = vst [vmem:[#allocation69_spill] sm:$0xff] %v5852_v38  ;;  %v5854_v44 = vpop.f32.mrb[5].mxu1  ;;  %v6937_v38 = vsub.f32 %v5534_v20, %v5537_v22  ;;  %v6944_v20 = vld [vmem:[#allocation52_spill] sm:$0xff] }
 0x433   : > { %6897 = vst [vmem:[#allocation70_spill] sm:$0xff] %v5854_v44  ;;  %v6938_v44 = vsub.f32 %v5541_v24, %v5554_v14  ;;  %v6940_v14 = vld [vmem:[#allocation50_spill] sm:$0xff] }
 0x434   : > { %v954_v33 = vmul.f32 1.442695, %v6937_v38  ;;  %v6941_v38 = vld [vmem:[#allocation51_spill] sm:$0xff] }
 0x435   : > { %v956_v49 = vmul.f32 1.442695, %v6938_v44  ;;  %v6942_v44 = vsub.f32 %v6940_v14, %v6941_v38 }
 0x436   : > { %3971 = vpow2.f32 %v954_v33  ;;  %v6955_v33 = vld [vmem:[#allocation58_spill] sm:$0xff] }
 0x437   : > { %3973 = vpow2.f32 %v956_v49 }
 0x439   : > { %v5856_v57 = vpop.f32.mrb[6].mxu1 }
 0x43a   : > { %6898 = vst [vmem:[#allocation71_spill] sm:$0xff] %v5856_v57  ;;  %v5858_v48 = vpop.f32.mrb[7].mxu1  ;;  %v6030_v57 = vld [vmem:[#allocation2 + $0xb0] sm:$0xff] }
 0x43b   : > { %6899 = vst [vmem:[#allocation72_spill] sm:$0xff] %v5858_v48 }
 0x43d   : > { %v5860_v55 = vpop.f32.mrb[8].mxu1 }
 0x43e   : > { %6900 = vst [vmem:[#allocation73_spill] sm:$0xff] %v5860_v55  ;;  %v5862_v56 = vpop.f32.mrb[9].mxu1 }
 0x43f   : > { %6901 = vst [vmem:[#allocation74_spill] sm:$0xff] %v5862_v56 }
 0x441   : > { %v5864_v59 = vpop.f32.mrb[10].mxu1 }
 0x442   : > { %6902 = vst [vmem:[#allocation75_spill] sm:$0xff] %v5864_v59  ;;  %v5866_v60 = vpop.f32.mrb[11].mxu1 }
 0x443   : > { %6903 = vst [vmem:[#allocation76_spill] sm:$0xff] %v5866_v60 }
 0x445   : > { %v5868_v63 = vpop.f32.mrb[12].mxu1 }
 0x446   : > { %6904 = vst [vmem:[#allocation77_spill] sm:$0xff] %v5868_v63  ;;  %v5870_v42 = vpop.f32.mrb[13].mxu1  ;;  %v6928_v63 = vld [vmem:[#allocation48_spill] sm:$0xff] }
 0x447   : > { %6905 = vst [vmem:[#allocation78_spill] sm:$0xff] %v5870_v42 }
 0x449   : > { %v5872_v35 = vpop.f32.mrb[14].mxu1 }
 0x44a   : > { %6906 = vst [vmem:[#allocation79_spill] sm:$0xff] %v5872_v35  ;;  %v5874_v3 = vpop.f32.mrb[15].mxu1 }
 0x44b   : > { %6907 = vst [vmem:[#allocation80_spill] sm:$0xff] %v5874_v3 }
 0x45f   : > { %v3517_v4 = vpop.f32.mrb[16].mxu1 }
 0x460   : > { %v1646_v43 = vpop.f32.mrb[17].mxu1  ;;  %v5879_v54 = vsel %vm601_vm7, %v3517_v4, -1e+30 }
 0x461   : > { %1760 = vmax.xlane.f32.xlu0 %v5879_v54  ;;  %v5885_v13 = vsel %vm600_vm5, %v1646_v43, -1e+30  ;;  %vm6929_vm5 = vcmp.le.s32.totalorder %v5335_v36, %v6928_v63 }
 0x462   : > { %1758 = vmax.xlane.f32.xlu1 %v5885_v13 }
 0x463   : > { %v3520_v10 = vpop.f32.mrb[18].mxu1 }
 0x464   : > { %v1656_v62 = vpop.f32.mrb[19].mxu1  ;;  %v5891_v31 = vsel %vm603_vm6, %v3520_v10, -1e+30  ;;  %vm6935_vm6 = vcmp.le.s32.totalorder %v5335_v36, %v5488_v12  ;;  %v5979_v36 = vld [vmem:[#allocation2 + $0x88] sm:$0xff]  ;;  %v5981_v12 = vld [vmem:[#allocation2 + $0x80] sm:$0xff] }
 0x465   : > { %6911 = vst [vmem:[#allocation40_spill] sm:$0xff] %v5891_v31  ;;  %v5896_v4 = vsel %vm602_vm8, %v1656_v62, -1e+30 }
 0x466   : > { %6913 = vst [vmem:[#allocation38_spill] sm:$0xff] %v5896_v4  ;;  %1764 = vmax.xlane.f32.xlu1 %v5891_v31  ;;  %1762 = vmax.xlane.f32.xlu0 %v5896_v4 }
 0x467   : > { %v3523_v43 = vpop.f32.mrb[20].mxu1 }
 0x468   : > { %v1666_v37 = vpop.f32.mrb[21].mxu1  ;;  %v5903_v3 = vsel %vm605_vm10, %v3523_v43, -1e+30 }
 0x469   : > { %6915 = vst [vmem:[#allocation39_spill] sm:$0xff] %v5903_v3  ;;  %v5908_v10 = vsel %vm604_vm9, %v1666_v37, -1e+30 }
 0x46a   : > { %6917 = vst [vmem:[#allocation41_spill] sm:$0xff] %v5908_v10  ;;  %1768 = vmax.xlane.f32.xlu1 %v5903_v3  ;;  %1766 = vmax.xlane.f32.xlu0 %v5908_v10  ;;  %v6108_v3 = vld [vmem:[#allocation2 + $0xe0] sm:$0xff] }
 0x46b   : > { %v3526_v62 = vpop.f32.mrb[22].mxu1 }
 0x46c   : > { %v1676_v50 = vpop.f32.mrb[23].mxu1  ;;  %v5915_v42 = vsel %vm607_vm12, %v3526_v62, -1e+30 }
 0x46d   : > { %6919 = vst [vmem:[#allocation43_spill] sm:$0xff] %v5915_v42  ;;  %v5920_v43 = vsel %vm606_vm11, %v1676_v50, -1e+30 }
 0x46e   : > { %6921 = vst [vmem:[#allocation42_spill] sm:$0xff] %v5920_v43  ;;  %1772 = vmax.xlane.f32.xlu1 %v5915_v42  ;;  %1770 = vmax.xlane.f32.xlu0 %v5920_v43  ;;  %v6106_v43 = vld [vmem:[#allocation2 + $0xe8] sm:$0xff] }
 0x46f   : > { %v3529_v37 = vpop.f32.mrb[24].mxu1 }
 0x470   : > { %v1686_v11 = vpop.f32.mrb[25].mxu1  ;;  %v5927_v60 = vsel %vm609_vm14, %v3529_v37, -1e+30 }
 0x471   : > { %6923 = vst [vmem:[#allocation45_spill] sm:$0xff] %v5927_v60  ;;  %v5932_v62 = vsel %vm608_vm13, %v1686_v11, -1e+30 }
 0x472   : > { %6925 = vst [vmem:[#allocation44_spill] sm:$0xff] %v5932_v62  ;;  %1776 = vmax.xlane.f32.xlu1 %v5927_v60  ;;  %1774 = vmax.xlane.f32.xlu0 %v5932_v62  ;;  %v6082_v60 = vld [vmem:[#allocation2 + $0xd0] sm:$0xff] }
 0x473   : > { %v3532_v50 = vpop.f32.mrb[26].mxu1  ;;  %6948 = vst [vmem:[#allocation52_spill] sm:$0xff] %v6082_v60 }
 0x474   : > { %v1696_v25 = vpop.f32.mrb[27].mxu1  ;;  %v5939_v59 = vsel %vm6926_vm4, %v3532_v50, -1e+30 }
 0x475   : > { %6927 = vst [vmem:[#allocation47_spill] sm:$0xff] %v5939_v59  ;;  %v5944_v37 = vsel %vm6929_vm5, %v1696_v25, -1e+30 }
 0x476   : > { %6930 = vst [vmem:[#allocation46_spill] sm:$0xff] %v5944_v37  ;;  %1780 = vmax.xlane.f32.xlu1 %v5939_v59  ;;  %1778 = vmax.xlane.f32.xlu0 %v5944_v37  ;;  %v6080_v37 = vld [vmem:[#allocation2 + $0xd8] sm:$0xff] }
 0x477   : > { %v3535_v11 = vpop.f32.mrb[28].mxu1  ;;  %6947 = vst [vmem:[#allocation51_spill] sm:$0xff] %v6080_v37 }
 0x478   : > { %v1706_v35 = vpop.f32.mrb[29].mxu1  ;;  %v5951_v56 = vsel %vm613_vm2, %v3535_v11, -1e+30 }
 0x479   : > { %6931 = vst [vmem:[#allocation48_spill] sm:$0xff] %v5951_v56  ;;  %v5956_v50 = vsel %vm612_vm1, %v1706_v35, -1e+30 }
 0x47a   : > { %6933 = vst [vmem:[#allocation49_spill] sm:$0xff] %v5956_v50  ;;  %1784 = vmax.xlane.f32.xlu1 %v5951_v56  ;;  %1782 = vmax.xlane.f32.xlu0 %v5956_v50  ;;  %v6945_v56 = vld [vmem:[#allocation54_spill] sm:$0xff] }
 0x47b   : > { %v3538_v25 = vpop.f32.mrb[30].mxu1  ;;  %v6946_v50 = vsub.f32 %v6944_v20, %v6945_v56  ;;  %v6950_v20 = vld [vmem:[#allocation56_spill] sm:$0xff] }
 0x47c   : > { %v1716_v63 = vpop.f32.mrb[31].mxu1  ;;  %v5963_v55 = vsel %vm615_vm0, %v3538_v25, -1e+30  ;;  %6957 = vst [vmem:[#allocation56_spill] sm:$0xff] %v6106_v43 }
 0x47d   : > { %6934 = vst [vmem:[#allocation81_spill] sm:$0xff] %v5963_v55  ;;  %v5968_v9 = vsel %vm6935_vm6, %v1716_v63, -1e+30  ;;  %v6009_v63 = vld [vmem:[#allocation2 + $0xa8] sm:$0xff]  ;;  %v958_v59 = vmul.f32 1.442695, %v6946_v50 }
 0x47e   : > { %6936 = vst [vmem:[#allocation82_spill] sm:$0xff] %v5968_v9  ;;  %1788 = vmax.xlane.f32.xlu1 %v5963_v55  ;;  %1786 = vmax.xlane.f32.xlu0 %v5968_v9  ;;  %v6056_v55 = vld [vmem:[#allocation2 + $0xc0] sm:$0xff] }
 0x47f   : > { %6939 = vst [vmem:[#allocation83_spill] sm:$0xff] %v6056_v55  ;;  %v6949_v50 = vld [vmem:[#allocation53_spill] sm:$0xff] }
 0x482   : > { %1148 = vadd.xlane.f32.xlu1 %v5726_v8  ;;  %1146 = vadd.xlane.f32.xlu0 %v5723_v0 }
 0x486   : > { %1152 = vadd.xlane.f32.xlu1 %v5741_v51  ;;  %1150 = vadd.xlane.f32.xlu0 %v5737_v47  ;;  %v5994_v51 = vld [vmem:[#allocation2 + $0x98] sm:$0xff] }
 0x48a   : > { %1156 = vadd.xlane.f32.xlu1 %v5757_v7  ;;  %1154 = vadd.xlane.f32.xlu0 %v5753_v6  ;;  %v5996_v6 = vld [vmem:[#allocation2 + $0x90] sm:$0xff] }
 0x48e   : > { %1158 = vadd.xlane.f32.xlu0 %v5769_v15 }
 0x4ee   : > { %v1761_v61 = vpop.xlane.xlu0 %1760 }
 0x4ef   : > { %v5984_v11 = vmax.f32 %v5979_v36, %v1761_v61  ;;  %v1759_v8 = vpop.xlane.xlu1 %1758  ;;  %v6011_v61 = vld [vmem:[#allocation2 + $0xa0] sm:$0xff] }
 0x4f0   : > { %v5987_v0 = vmax.f32 %v5981_v12, %v1759_v8  ;;  %v6028_v8 = vld [vmem:[#allocation2 + $0xb8] sm:$0xff] }
 0x4f1   : > { %2370 = vst.msk [vmem:[#allocation2 + $0x88] sm:$0xff] %vm1194_vm15, %v5984_v11  ;;  %1861 = vperm.xlu0 %3937, %v5984_v11  }
 0x4f2   : > { %2369 = vst.msk [vmem:[#allocation2 + $0x80] sm:$0xff] %vm1194_vm15, %v5987_v0  ;;  %1856 = vperm.xlu1 %3938, %v5987_v0  }
 0x4f3   : > { %v1765_v15 = vpop.xlane.xlu1 %1764  ;;  %v1763_v35 = vpop.xlane.xlu0 %1762 }
 0x4f4   : > { %v6004_v1 = vmax.f32 %v5994_v51, %v1765_v15  ;;  %v6007_v25 = vmax.f32 %v5996_v6, %v1763_v35 }
 0x4f6   : > { %2372 = vst.msk [vmem:[#allocation2 + $0x98] sm:$0xff] %vm1194_vm15, %v6004_v1  ;;  %2371 = vst.msk [vmem:[#allocation2 + $0x90] sm:$0xff] %vm1194_vm15, %v6007_v25  ;;  %1866 = vperm.xlu1 %3938, %v6007_v25  }
 0x4f7   : > { %v1769_v15 = vpop.xlane.xlu1 %1768  ;;  %v1767_v35 = vpop.xlane.xlu0 %1766 }
 0x4f8   : > { %v6023_v47 = vmax.f32 %v6009_v63, %v1769_v15  ;;  %v6026_v48 = vmax.f32 %v6011_v61, %v1767_v35 }
 0x4fa   : > { %2374 = vst.msk [vmem:[#allocation2 + $0xa8] sm:$0xff] %vm1194_vm15, %v6023_v47  ;;  %2373 = vst.msk [vmem:[#allocation2 + $0xa0] sm:$0xff] %vm1194_vm15, %v6026_v48  ;;  %1871 = vperm.xlu1 %3938, %v6004_v1   ;;  %1876 = vperm.xlu0 %3937, %v6026_v48  }
 0x4fb   : > { %v1773_v15 = vpop.xlane.xlu1 %1772  ;;  %v1771_v35 = vpop.xlane.xlu0 %1770 }
 0x4fc   : > { %v6046_v7 = vmax.f32 %v6028_v8, %v1773_v15  ;;  %v6049_v16 = vmax.f32 %v6030_v57, %v1771_v35  ;;  %v960_v15 = vmul.f32 1.442695, %v6942_v44 }
 0x4fe   : > { %2376 = vst.msk [vmem:[#allocation2 + $0xb8] sm:$0xff] %vm1194_vm15, %v6046_v7  ;;  %2375 = vst.msk [vmem:[#allocation2 + $0xb0] sm:$0xff] %vm1194_vm15, %v6049_v16  ;;  %1881 = vperm.xlu1 %3938, %v6023_v47   ;;  %1886 = vperm.xlu0 %3937, %v6049_v16   ;;  %3975 = vpow2.f32 %v960_v15  ;;  %v6133_v15 = vpop.eup %3971 }
 0x4ff   : > { %v1777_v22 = vpop.xlane.xlu1 %1776  ;;  %v1775_v24 = vpop.xlane.xlu0 %1774  ;;  %3977 = vpow2.f32 %v958_v59 }
 0x500   : > { %v6072_v35 = vmax.f32 %v6054_v39, %v1777_v22  ;;  %v6075_v9 = vmax.f32 %v6056_v55, %v1775_v24  ;;  %v6951_v24 = vsub.f32 %v6949_v50, %v6950_v20  ;;  %v6954_v22 = vld [vmem:[#allocation55_spill] sm:$0xff] }
 0x501   : > { %v6956_v62 = vsub.f32 %v6954_v22, %v6955_v33  ;;  %6958 = vst [vmem:[#allocation55_spill] sm:$0xff] %v6108_v3 }
 0x502   : > { %6943 = vst [vmem:[#allocation50_spill] sm:$0xff] %v6075_v9  ;;  %2378 = vst.msk [vmem:[#allocation2 + $0xc8] sm:$0xff] %vm1194_vm15, %v6072_v35  ;;  %1891 = vperm.xlu1 %3938, %v6046_v7   ;;  %1896 = vperm.xlu0 %3937, %v6075_v9   ;;  %v962_v14 = vmul.f32 1.442695, %v6951_v24  ;;  %v6129_v24 = vld [vmem:[#allocation2 + $0xf8] sm:$0xff] }
 0x503   : > { %2377 = vst.msk [vmem:[#allocation2 + $0xc0] sm:$0xff] %vm1194_vm15, %v6075_v9  ;;  %v1781_v49 = vpop.xlane.xlu1 %1780  ;;  %v1779_v56 = vpop.xlane.xlu0 %1778  ;;  %v964_v42 = vmul.f32 1.442695, %v6956_v62 }
 0x504   : > { %v6098_v38 = vmax.f32 %v6080_v37, %v1781_v49  ;;  %v6101_v44 = vmax.f32 %v6082_v60, %v1779_v56  ;;  %3979 = vpow2.f32 %v962_v14  ;;  %v6961_v56 = vld [vmem:[#allocation57_spill] sm:$0xff]  ;;  %v6131_v49 = vld [vmem:[#allocation2 + $0xf0] sm:$0xff] }
 0x505   : > { %3981 = vpow2.f32 %v964_v42  ;;  %v6962_v50 = vsub.f32 %v6961_v56, %v5598_v23  ;;  %6963 = vst [vmem:[#allocation57_spill] sm:$0xff] %v6129_v24  ;;  %6964 = vst [vmem:[#allocation85_spill] sm:$0xff] %v6131_v49  ;;  %v1114_v23 = vld [vmem:[#allocation3] sm:$0xff]  ;;  %v3974_v42 = vpop.eup %3973 }
 0x506   : > { %6952 = vst [vmem:[#allocation54_spill] sm:$0xff] %v6098_v38  ;;  %6953 = vst [vmem:[#allocation53_spill] sm:$0xff] %v6101_v44  ;;  %1901 = vperm.xlu1 %3938, %v6072_v35   ;;  %1906 = vperm.xlu0 %3937, %v6101_v44   ;;  %v1118_v37 = vld [vmem:[#allocation3 + $0x20] sm:$0xff] }
 0x507   : > { %2380 = vst.msk [vmem:[#allocation2 + $0xd8] sm:$0xff] %vm1194_vm15, %v6098_v38  ;;  %2379 = vst.msk [vmem:[#allocation2 + $0xd0] sm:$0xff] %vm1194_vm15, %v6101_v44  ;;  %v1785_v59 = vpop.xlane.xlu1 %1784  ;;  %v1783_v62 = vpop.xlane.xlu0 %1782  ;;  %v966_v20 = vmul.f32 1.442695, %v6962_v50  ;;  %v1115_v50 = vld [vmem:[#allocation3 + $0x8] sm:$0xff]  ;;  %v1116_v44 = vld [vmem:[#allocation3 + $0x10] sm:$0xff] }
 0x508   : > { %v6121_v33 = vmax.f32 %v6106_v43, %v1785_v59  ;;  %v6124_v22 = vmax.f32 %v6108_v3, %v1783_v62  ;;  %v1130_v59 = vmul.f32 %v6133_v15, %v1114_v23  ;;  %v3976_v3 = vpop.eup %3975  ;;  %v1117_v43 = vld [vmem:[#allocation3 + $0x18] sm:$0xff] }
 0x509   : > { %3983 = vpow2.f32 %v966_v20  ;;  %v1131_v20 = vmul.f32 %v3974_v42, %v1115_v50  ;;  %v1119_v50 = vld [vmem:[#allocation3 + $0x28] sm:$0xff] }
 0x50a   : > { %6959 = vst [vmem:[#allocation58_spill] sm:$0xff] %v6121_v33  ;;  %6960 = vst [vmem:[#allocation84_spill] sm:$0xff] %v6124_v22  ;;  %1911 = vperm.xlu1 %3938, %v6098_v38   ;;  %1916 = vperm.xlu0 %3937, %v6124_v22  }
 0x50b   : > { %2382 = vst.msk [vmem:[#allocation2 + $0xe8] sm:$0xff] %vm1194_vm15, %v6121_v33  ;;  %2381 = vst.msk [vmem:[#allocation2 + $0xe0] sm:$0xff] %vm1194_vm15, %v6124_v22  ;;  %v1789_v62 = vpop.xlane.xlu1 %1788  ;;  %v1787_v56 = vpop.xlane.xlu0 %1786  ;;  %v1133_v22 = vmul.f32 %v3976_v3, %v1117_v43 }
 0x50c   : > { %v6146_v14 = vmax.f32 %v6129_v24, %v1789_v62  ;;  %v6149_v10 = vmax.f32 %v6131_v49, %v1787_v56  ;;  %v3978_v62 = vpop.eup %3977 }
 0x50d   : > { %v1132_v49 = vmul.f32 %v3978_v62, %v1116_v44 }
 0x50e   : > { %6965 = vst [vmem:[#allocation86_spill] sm:$0xff] %v6146_v14  ;;  %6966 = vst [vmem:[#allocation87_spill] sm:$0xff] %v6149_v10  ;;  %1921 = vperm.xlu1 %3938, %v6121_v33   ;;  %1926 = vperm.xlu0 %3937, %v6149_v10   ;;  %v3980_v60 = vpop.eup %3979 }
 0x50f   : > { %2384 = vst.msk [vmem:[#allocation2 + $0xf8] sm:$0xff] %vm1194_vm15, %v6146_v14  ;;  %2383 = vst.msk [vmem:[#allocation2 + $0xf0] sm:$0xff] %vm1194_vm15, %v6149_v10  ;;  %v1149_v23 = vpop.xlane.xlu1 %1148  ;;  %v1147_v56 = vpop.xlane.xlu0 %1146 }
 0x510   : > { %v1179_v31 = vadd.f32 %v1149_v23, %v1131_v20  ;;  %v1178_v24 = vadd.f32 %v1147_v56, %v1130_v59  ;;  %v3982_v33 = vpop.eup %3981  ;;  %v1134_v20 = vmul.f32 %v3980_v60, %v1118_v37  ;;  %v1120_v56 = vld [vmem:[#allocation3 + $0x30] sm:$0xff] }
 0x511   : > { %v1135_v59 = vmul.f32 %v3982_v33, %v1119_v50  ;;  %v6985_v50 = vsub.f32 %v5994_v51, %v6004_v1  ;;  %v6988_v51 = vsub.f32 %v6011_v61, %v6026_v48 }
 0x512   : > { %1196 = vst.msk [vmem:[#allocation3 + $0x8] sm:$0xff] %vm1194_vm15, %v1179_v31  ;;  %1195 = vst.msk [vmem:[#allocation3] sm:$0xff] %vm1194_vm15, %v1178_v24  ;;  %1931 = vperm.xlu1 %3938, %v6146_v14  }
 0x513   : > { %v1153_v38 = vpop.xlane.xlu1 %1152  ;;  %v1151_v10 = vpop.xlane.xlu0 %1150  ;;  %v1830_v1 = vmul.f32 1.442695, %v6988_v51 }
 0x514   : > { %v1181_v4 = vadd.f32 %v1153_v38, %v1133_v22  ;;  %v1180_v9 = vadd.f32 %v1151_v10, %v1132_v49  ;;  %v3984_v31 = vpop.eup %3983  ;;  %v6969_v10 = vld [vmem:[#allocation60_spill] sm:$0xff] }
 0x515   : > { %v1136_v44 = vmul.f32 %v3984_v31, %v1120_v56  ;;  %v6991_v56 = vsub.f32 %v6054_v39, %v6072_v35 }
 0x516   : > { %1198 = vst.msk [vmem:[#allocation3 + $0x18] sm:$0xff] %vm1194_vm15, %v1181_v4  ;;  %1197 = vst.msk [vmem:[#allocation3 + $0x10] sm:$0xff] %vm1194_vm15, %v1180_v9  ;;  %v6977_v9 = vld [vmem:[#allocation65_spill] sm:$0xff] }
 0x517   : > { %v1157_v23 = vpop.xlane.xlu1 %1156  ;;  %v1155_v24 = vpop.xlane.xlu0 %1154 }
 0x518   : > { %v1183_v14 = vadd.f32 %v1157_v23, %v1135_v59  ;;  %v1182_v43 = vadd.f32 %v1155_v24, %v1134_v20  ;;  %v1828_v59 = vmul.f32 1.442695, %v6985_v50  ;;  %v6987_v20 = vsub.f32 %v6009_v63, %v6023_v47 }
 0x519   : > { %v6989_v23 = vsub.f32 %v6028_v8, %v6046_v7  ;;  %v6990_v47 = vsub.f32 %v6030_v57, %v6049_v16  ;;  %v6992_v16 = vld [vmem:[#allocation83_spill] sm:$0xff]  ;;  %v6993_v57 = vld [vmem:[#allocation50_spill] sm:$0xff] }
 0x51a   : > { %1200 = vst.msk [vmem:[#allocation3 + $0x28] sm:$0xff] %vm1194_vm15, %v1183_v14  ;;  %1199 = vst.msk [vmem:[#allocation3 + $0x20] sm:$0xff] %vm1194_vm15, %v1182_v43  ;;  %v6980_v14 = vsub.f32 %v5656_v17, %v5674_v18  ;;  %v6983_v17 = vsub.f32 %v5979_v36, %v5984_v11  ;;  %v6986_v36 = vsub.f32 %v5996_v6, %v6007_v25  ;;  %v1840_v43 = vmul.f32 1.442695, %v6991_v56 }
 0x51b   : > { %v1159_v55 = vpop.xlane.xlu0 %1158  ;;  %v1836_v24 = vmul.f32 1.442695, %v6989_v23  ;;  %v1834_v63 = vmul.f32 1.442695, %v6990_v47 }
 0x51c   : > { %v1184_v38 = vadd.f32 %v1159_v55, %v1136_v44  ;;  %v6967_v55 = vld [vmem:[#allocation59_spill] sm:$0xff]  ;;  %v1824_v18 = vmul.f32 1.442695, %v6983_v17  ;;  %v1826_v11 = vmul.f32 1.442695, %v6986_v36 }
 0x51d   : > { %v6968_v4 = vsub.f32 %v6967_v55, %v5615_v27  ;;  %v6976_v27 = vld [vmem:[#allocation64_spill] sm:$0xff] }
 0x51e   : > { %1201 = vst.msk [vmem:[#allocation3 + $0x30] sm:$0xff] %vm1194_vm15, %v1184_v38 }
 0x52d   : > { %1160 = vadd.xlane.f32.xlu0 %v5773_v2  ;;  %v968_v2 = vmul.f32 1.442695, %v6968_v4  ;;  %v6994_v4 = vsub.f32 %v6992_v16, %v6993_v57  ;;  %v7012_v16 = vld [vmem:[#allocation43_spill] sm:$0xff] }
 0x52f   : > { %3985 = vpow2.f32 %v968_v2  ;;  %v1838_v2 = vmul.f32 1.442695, %v6994_v4  ;;  %v7013_v4 = vld [vmem:[#allocation44_spill] sm:$0xff] }
 0x531   : > { %1164 = vadd.xlane.f32.xlu0 %v5786_v5  ;;  %v6970_v5 = vsub.f32 %v6969_v10, %v5620_v28  ;;  %v6978_v28 = vsub.f32 %v6976_v27, %v6977_v9 }
 0x533   : > { %v976_v49 = vmul.f32 1.442695, %v6978_v28  ;;  %v7002_v28 = vld [vmem:[#allocation56_spill] sm:$0xff] }
 0x535   : > { %1166 = vadd.xlane.f32.xlu0 %v5789_v58  ;;  %v970_v58 = vmul.f32 1.442695, %v6970_v5 }
 0x536   : > { %1162 = vadd.xlane.f32.xlu1 %v5783_v45  ;;  %v6971_v45 = vld [vmem:[#allocation61_spill] sm:$0xff] }
 0x537   : > { %3987 = vpow2.f32 %v970_v58  ;;  %v6996_v58 = vld [vmem:[#allocation51_spill] sm:$0xff] }
 0x539   : > { %1170 = vadd.xlane.f32.xlu0 %v5801_v34 }
 0x53a   : > { %1168 = vadd.xlane.f32.xlu1 %v5792_v40  ;;  %v6972_v40 = vld [vmem:[#allocation63_spill] sm:$0xff] }
 0x53b   : > { %v6973_v34 = vsub.f32 %v6971_v45, %v6972_v40  ;;  %v6997_v45 = vld [vmem:[#allocation54_spill] sm:$0xff] }
 0x53c   : > { %v6998_v40 = vsub.f32 %v6996_v58, %v6997_v45 }
 0x53d   : > { %1174 = vadd.xlane.f32.xlu0 %v5807_v52  ;;  %v972_v52 = vmul.f32 1.442695, %v6973_v34 }
 0x53e   : > { %1172 = vadd.xlane.f32.xlu1 %v5804_v46  ;;  %v6974_v46 = vld [vmem:[#allocation62_spill] sm:$0xff]  ;;  %v1844_v34 = vmul.f32 1.442695, %v6998_v40 }
 0x53f   : > { %3989 = vpow2.f32 %v972_v52  ;;  %v6999_v52 = vld [vmem:[#allocation52_spill] sm:$0xff] }
 0x542   : > { %1176 = vadd.xlane.f32.xlu1 %v5810_v41  ;;  %v6975_v41 = vsub.f32 %v6974_v46, %v5639_v29  ;;  %v980_v29 = vmul.f32 1.442695, %v6980_v14  ;;  %v7000_v46 = vld [vmem:[#allocation53_spill] sm:$0xff] }
 0x544   : > { %v974_v37 = vmul.f32 1.442695, %v6975_v41  ;;  %v7001_v41 = vsub.f32 %v6999_v52, %v7000_v46  ;;  %v7015_v46 = vld [vmem:[#allocation46_spill] sm:$0xff] }
 0x546   : > { %3991 = vpow2.f32 %v974_v37  ;;  %v1842_v37 = vmul.f32 1.442695, %v7001_v41 }
 0x547   : > { %3993 = vpow2.f32 %v976_v49  ;;  %v7003_v49 = vld [vmem:[#allocation58_spill] sm:$0xff] }
 0x553   : > { %1234 = vperm.xlu1 %3938, %v3974_v42   ;;  %1229 = vperm.xlu0 %3937, %v6133_v15   ;;  %v6979_v15 = vsub.f32 %v5646_v21, %v5659_v19  ;;  %v6201_v42 = vpop.eup %3985  ;;  %v6982_v19 = vsub.f32 %v5676_v53, %v5692_v32 }
 0x555   : > { %v978_v22 = vmul.f32 1.442695, %v6979_v15  ;;  %v984_v21 = vmul.f32 1.442695, %v6982_v19  ;;  %v7004_v15 = vsub.f32 %v7002_v28, %v7003_v49 }
 0x557   : > { %1239 = vperm.xlu1 %3938, %v3978_v62   ;;  %1244 = vperm.xlu0 %3937, %v3976_v3   ;;  %3995 = vpow2.f32 %v978_v22  ;;  %v6981_v3 = vsub.f32 %v5666_v30, %v5679_v26  ;;  %v6984_v26 = vsub.f32 %v5981_v12, %v5987_v0  ;;  %v1848_v22 = vmul.f32 1.442695, %v7004_v15 }
 0x558   : > { %3997 = vpow2.f32 %v980_v29 }
 0x559   : > { %v982_v62 = vmul.f32 1.442695, %v6981_v3  ;;  %v1822_v30 = vmul.f32 1.442695, %v6984_v26  ;;  %v7008_v26 = vld [vmem:[#allocation84_spill] sm:$0xff] }
 0x55b   : > { %1249 = vperm.xlu1 %3938, %v3980_v60   ;;  %1254 = vperm.xlu0 %3937, %v3982_v33   ;;  %v6210_v60 = vpop.eup %3987  ;;  %3999 = vpow2.f32 %v982_v62  ;;  %v7005_v62 = vld [vmem:[#allocation40_spill] sm:$0xff] }
 0x55c   : > { %v6212_v33 = vpop.eup %3989  ;;  %4001 = vpow2.f32 %v984_v21  ;;  %v7006_v21 = vld [vmem:[#allocation41_spill] sm:$0xff] }
 0x55d   : > { %v6222_v53 = vpop.eup %3991  ;;  %4003 = vpow2.f32 %v1824_v18  ;;  %v7007_v18 = vld [vmem:[#allocation55_spill] sm:$0xff] }
 0x55e   : > { %v6224_v32 = vpop.eup %3993  ;;  %4005 = vpow2.f32 %v1822_v30  ;;  %v7009_v30 = vsub.f32 %v7007_v18, %v7008_v26 }
 0x55f   : > { %1259 = vperm.xlu1 %3938, %v3984_v31   ;;  %1264 = vperm.xlu0 %3937, %v6201_v42   ;;  %4007 = vpow2.f32 %v1828_v59  ;;  %v1832_v31 = vmul.f32 1.442695, %v6987_v20 }
 0x560   : > { %4009 = vpow2.f32 %v1826_v11  ;;  %v1846_v50 = vmul.f32 1.442695, %v7009_v30 }
 0x561   : > { %v6234_v12 = vpop.eup %3995  ;;  %4011 = vpow2.f32 %v1832_v31 }
 0x562   : > { %v6236_v0 = vpop.eup %3997  ;;  %4013 = vpow2.f32 %v1830_v1  ;;  %v7010_v1 = vld [vmem:[#allocation39_spill] sm:$0xff] }
 0x563   : > { %1269 = vperm.xlu1 %3938, %v6210_v60   ;;  %1274 = vperm.xlu0 %3937, %v6212_v33   ;;  %4015 = vpow2.f32 %v1836_v24  ;;  %v7011_v24 = vld [vmem:[#allocation42_spill] sm:$0xff] }
 0x564   : > { %4017 = vpow2.f32 %v1834_v63 }
 0x565   : > { %v6246_v6 = vpop.eup %3999  ;;  %4019 = vpow2.f32 %v1840_v43 }
 0x566   : > { %v6248_v25 = vpop.eup %4001 }
 0x567   : > { %1279 = vperm.xlu1 %3938, %v6222_v53   ;;  %1284 = vperm.xlu0 %3937, %v6224_v32   ;;  %v6258_v61 = vpop.eup %4003 }
 0x568   : > { %v6264_v8 = vpop.eup %4005 }
 0x569   : > { %v6272_v35 = vpop.eup %4007 }
 0x56a   : > { %v6274_v10 = vpop.eup %4009 }
 0x56b   : > { %1289 = vperm.xlu1 %3938, %v6234_v12   ;;  %1294 = vperm.xlu0 %3937, %v6236_v0   ;;  %v6285_v9 = vpop.eup %4011 }
 0x56c   : > { %v6290_v3 = vpop.eup %4013 }
 0x56d   : > { %v6299_v11 = vpop.eup %4015 }
 0x56e   : > { %v6301_v51 = vpop.eup %4017 }
 0x56f   : > { %1299 = vperm.xlu1 %3938, %v6246_v6   ;;  %1304 = vperm.xlu0 %3937, %v6248_v25   ;;  %v6305_v63 = vpop.eup %4019 }
 0x570   : > { %v1862_v48 = vpop.permute.xlu0 %1861 }
 0x571   : > { %v1935_v44 = vsub.f32 %v5879_v54, %v1862_v48  ;;  %v1857_v7 = vpop.permute.xlu1 %1856 }
 0x572   : > { %v1934_v38 = vsub.f32 %v5885_v13, %v1857_v7  ;;  %v6995_v13 = vld [vmem:[#allocation38_spill] sm:$0xff] }
 0x573   : > { %v1952_v55 = vmul.f32 1.442695, %v1935_v44  ;;  %2103 = vperm.xlu1 %3938, %v6258_v61   ;;  %2098 = vperm.xlu0 %3937, %v6264_v8  }
 0x574   : > { %v1950_v39 = vmul.f32 1.442695, %v1934_v38 }
 0x575   : > { %v1867_v54 = vpop.permute.xlu1 %1866 }
 0x576   : > { %4021 = vpow2.f32 %v1950_v39  ;;  %v1936_v5 = vsub.f32 %v6995_v13, %v1867_v54 }
 0x577   : > { %4023 = vpow2.f32 %v1952_v55  ;;  %2108 = vperm.xlu1 %3938, %v6274_v10   ;;  %2113 = vperm.xlu0 %3937, %v6272_v35  }
 0x578   : > { %4025 = vpow2.f32 %v1838_v2  ;;  %v1954_v27 = vmul.f32 1.442695, %v1936_v5 }
 0x579   : > { %v1872_v14 = vpop.permute.xlu1 %1871  ;;  %v1877_v29 = vpop.permute.xlu0 %1876 }
 0x57a   : > { %4027 = vpow2.f32 %v1954_v27  ;;  %v1937_v19 = vsub.f32 %v7005_v62, %v1872_v14  ;;  %v1938_v17 = vsub.f32 %v7006_v21, %v1877_v29  ;;  %v7016_v62 = vld [vmem:[#allocation47_spill] sm:$0xff]  ;;  %v7017_v21 = vld [vmem:[#allocation49_spill] sm:$0xff] }
 0x57b   : > { %4029 = vpow2.f32 %v1844_v34  ;;  %2118 = vperm.xlu1 %3938, %v6290_v3   ;;  %2123 = vperm.xlu0 %3937, %v6285_v9   ;;  %v7014_v34 = vld [vmem:[#allocation45_spill] sm:$0xff] }
 0x57c   : > { %4031 = vpow2.f32 %v1842_v37  ;;  %v1956_v59 = vmul.f32 1.442695, %v1937_v19  ;;  %v1958_v36 = vmul.f32 1.442695, %v1938_v17 }
 0x57d   : > { %4033 = vpow2.f32 %v1848_v22  ;;  %v1882_v20 = vpop.permute.xlu1 %1881  ;;  %v1887_v31 = vpop.permute.xlu0 %1886 }
 0x57e   : > { %4035 = vpow2.f32 %v1956_v59  ;;  %v1939_v23 = vsub.f32 %v7010_v1, %v1882_v20  ;;  %v1940_v47 = vsub.f32 %v7011_v24, %v1887_v31  ;;  %v7018_v20 = vld [vmem:[#allocation48_spill] sm:$0xff]  ;;  %v7019_v1 = vld [vmem:[#allocation82_spill] sm:$0xff] }
 0x57f   : > { %4037 = vpow2.f32 %v1958_v36  ;;  %2128 = vperm.xlu1 %3938, %v6301_v51   ;;  %2133 = vperm.xlu0 %3937, %v6299_v11  }
 0x580   : > { %v6309_v48 = vpop.eup %4021  ;;  %4039 = vpow2.f32 %v1846_v50  ;;  %v1960_v56 = vmul.f32 1.442695, %v1939_v23  ;;  %v1962_v43 = vmul.f32 1.442695, %v1940_v47 }
 0x581   : > { %v6311_v44 = vpop.eup %4023  ;;  %3571 = vmatprep.mubr.f32.mxu0 %v6309_v48  ;;  %v1892_v7 = vpop.permute.xlu1 %1891 }
 0x582   : > { %v1897_v38 = vpop.permute.xlu0 %1896  ;;  %v6314_v55 = vpop.eup %4025  ;;  %4041 = vpow2.f32 %v1960_v56  ;;  %v1941_v57 = vsub.f32 %v7012_v16, %v1892_v7  ;;  %3572 = vmatmul.mubr.f32.vlgmr.msra.gmra.mrb[16].mxu0 %v6311_v44 }
 0x583   : > { %v1942_v2 = vsub.f32 %v7013_v4, %v1897_v38  ;;  %4043 = vpow2.f32 %v1962_v43  ;;  %2138 = vperm.xlu1 %3938, %v6314_v55   ;;  %2143 = vperm.xlu0 %3937, %v6305_v63   ;;  %v7020_v38 = vld [vmem:[#allocation81_spill] sm:$0xff] }
 0x584   : > { %v6321_v39 = vpop.eup %4027  ;;  %v1964_v54 = vmul.f32 1.442695, %v1941_v57 }
 0x585   : > { %v1966_v13 = vmul.f32 1.442695, %v1942_v2  ;;  %v6323_v5 = vpop.eup %4029  ;;  %v1902_v58 = vpop.permute.xlu1 %1901  ;;  %3574 = vmatprep.mubr.f32.mxu0 %v6321_v39 }
 0x586   : > { %v1907_v45 = vpop.permute.xlu0 %1906  ;;  %v6326_v40 = vpop.eup %4031  ;;  %4045 = vpow2.f32 %v1964_v54  ;;  %v1943_v52 = vsub.f32 %v7014_v34, %v1902_v58 }
 0x587   : > { %v1944_v41 = vsub.f32 %v7015_v46, %v1907_v45  ;;  %v6330_v37 = vpop.eup %4033  ;;  %4047 = vpow2.f32 %v1966_v13  ;;  %2148 = vperm.xlu1 %3938, %v6326_v40   ;;  %2153 = vperm.xlu0 %3937, %v6323_v5  }
 0x588   : > { %v4036_v27 = vpop.eup %4035  ;;  %v1968_v28 = vmul.f32 1.442695, %v1943_v52  ;;  %v1121_v52 = vld [vmem:[#allocation3 + $0x38] sm:$0xff] }
 0x589   : > { %v1970_v49 = vmul.f32 1.442695, %v1944_v41  ;;  %v4038_v15 = vpop.eup %4037  ;;  %v1912_v22 = vpop.permute.xlu1 %1911  ;;  %3575 = vmatmul.mubr.f32.gmra.mrb[18].mxu0 %v4036_v27  ;;  %v1137_v46 = vmul.f32 %v6201_v42, %v1121_v52 }
 0x58a   : > { %v1917_v14 = vpop.permute.xlu0 %1916  ;;  %v6334_v29 = vpop.eup %4039  ;;  %4049 = vpow2.f32 %v1968_v28  ;;  %v1945_v19 = vsub.f32 %v7016_v62, %v1912_v22  ;;  %3577 = vmatprep.mubr.f32.mxu0 %v4038_v15  ;;  %v1123_v28 = vld [vmem:[#allocation3 + $0x48] sm:$0xff]  ;;  %v1124_v22 = vld [vmem:[#allocation3 + $0x50] sm:$0xff]  ;;  %v1126_v62 = vld [vmem:[#allocation3 + $0x60] sm:$0xff] }
 0x58b   : > { %v1946_v17 = vsub.f32 %v7017_v21, %v1917_v14  ;;  %4051 = vpow2.f32 %v1970_v49  ;;  %2158 = vperm.xlu1 %3938, %v6334_v29   ;;  %2163 = vperm.xlu0 %3937, %v6330_v37  }
 0x58c   : > { %v4042_v18 = vpop.eup %4041  ;;  %v1972_v26 = vmul.f32 1.442695, %v1945_v19 }
 0x58d   : > { %v1974_v30 = vmul.f32 1.442695, %v1946_v17  ;;  %v4044_v50 = vpop.eup %4043  ;;  %v1922_v59 = vpop.permute.xlu1 %1921  ;;  %3578 = vmatmul.mubr.f32.gmra.mrb[20].mxu0 %v4042_v18  ;;  %v1125_v17 = vld [vmem:[#allocation3 + $0x58] sm:$0xff] }
 0x58e   : > { %v1927_v36 = vpop.permute.xlu0 %1926  ;;  %4053 = vpow2.f32 %v1972_v26  ;;  %v1947_v31 = vsub.f32 %v7018_v20, %v1922_v59  ;;  %3580 = vmatprep.mubr.f32.mxu0 %v4044_v50 }
 0x58f   : > { %v1948_v23 = vsub.f32 %v7019_v1, %v1927_v36  ;;  %4055 = vpow2.f32 %v1974_v30  ;;  %v1128_v30 = vld [vmem:[#allocation3 + $0x70] sm:$0xff] }
 0x590   : > { %v4046_v24 = vpop.eup %4045  ;;  %v1976_v47 = vmul.f32 1.442695, %v1947_v31  ;;  %v1144_v20 = vmul.f32 %v6246_v6, %v1128_v30 }
 0x591   : > { %v1978_v56 = vmul.f32 1.442695, %v1948_v23  ;;  %v4048_v43 = vpop.eup %4047  ;;  %v1932_v7 = vpop.permute.xlu1 %1931  ;;  %3581 = vmatmul.mubr.f32.gmra.mrb[22].mxu0 %v4046_v24 }
 0x592   : > { %4057 = vpow2.f32 %v1976_v47  ;;  %v1949_v16 = vsub.f32 %v7020_v38, %v1932_v7  ;;  %3583 = vmatprep.mubr.f32.mxu0 %v4048_v43  ;;  %v7022_v47 = vld [vmem:[#allocation86_spill] sm:$0xff]  ;;  %v7024_v38 = vld [vmem:[#allocation85_spill] sm:$0xff] }
 0x593   : > { %4059 = vpow2.f32 %v1978_v56 }
 0x594   : > { %v4050_v57 = vpop.eup %4049  ;;  %v1980_v4 = vmul.f32 1.442695, %v1949_v16  ;;  %v7025_v16 = vld [vmem:[#allocation87_spill] sm:$0xff] }
 0x595   : > { %v4052_v2 = vpop.eup %4051  ;;  %3584 = vmatmul.mubr.f32.gmra.mrb[24].mxu0 %v4050_v57 }
 0x596   : > { %4061 = vpow2.f32 %v1980_v4  ;;  %3586 = vmatprep.mubr.f32.mxu0 %v4052_v2 }
 0x598   : > { %v4054_v54 = vpop.eup %4053 }
 0x599   : > { %v4056_v13 = vpop.eup %4055  ;;  %3587 = vmatmul.mubr.f32.gmra.mrb[26].mxu0 %v4054_v54 }
 0x59a   : > { %3589 = vmatprep.mubr.f32.mxu0 %v4056_v13 }
 0x59c   : > { %v4058_v58 = vpop.eup %4057 }
 0x59d   : > { %v4060_v45 = vpop.eup %4059  ;;  %3590 = vmatmul.mubr.f32.gmra.mrb[28].mxu0 %v4058_v58 }
 0x59e   : > { %3592 = vmatprep.mubr.f32.mxu0 %v4060_v45 }
 0x5a0   : > { %v4062_v34 = vpop.eup %4061 }
 0x5a1   : > { %3593 = vmatmul.mubr.f32.gmra.mrb[30].mxu0 %v4062_v34 }
 0x5aa   : > { %2017 = vadd.xlane.f32.xlu0 %v6311_v44  ;;  %v1139_v44 = vmul.f32 %v6212_v33, %v1123_v28 }
 0x5ae   : > { %2019 = vadd.xlane.f32.xlu0 %v6321_v39 }
 0x5af   : > { %2015 = vadd.xlane.f32.xlu1 %v6309_v48 }
 0x5b2   : > { %2023 = vadd.xlane.f32.xlu0 %v4038_v15  ;;  %v1140_v15 = vmul.f32 %v6222_v53, %v1124_v22  ;;  %v1141_v53 = vmul.f32 %v6224_v32, %v1125_v17  ;;  %v7021_v32 = vld [vmem:[#allocation57_spill] sm:$0xff] }
 0x5b3   : > { %2021 = vadd.xlane.f32.xlu1 %v4036_v27  ;;  %v1122_v27 = vld [vmem:[#allocation3 + $0x40] sm:$0xff]  ;;  %v7023_v56 = vsub.f32 %v7021_v32, %v7022_v47  ;;  %v1220_v32 = vld [vmem:[#allocation4 + $0x48] sm:$0xff]  ;;  %v7033_v47 = vld [vmem:[#allocation71_spill] sm:$0xff] }
 0x5b4   : > { %v1138_v14 = vmul.f32 %v6210_v60, %v1122_v27  ;;  %v1127_v60 = vld [vmem:[#allocation3 + $0x68] sm:$0xff] }
 0x5b6   : > { %2027 = vadd.xlane.f32.xlu0 %v4044_v50 }
 0x5b7   : > { %2025 = vadd.xlane.f32.xlu1 %v4042_v18  ;;  %v1142_v18 = vmul.f32 %v6234_v12, %v1126_v62  ;;  %v1143_v12 = vmul.f32 %v6236_v0, %v1127_v60  ;;  %v1215_v62 = vld [vmem:[#allocation4 + $0x20] sm:$0xff] }
 0x5ba   : > { %2031 = vadd.xlane.f32.xlu0 %v4048_v43  ;;  %v1161_v41 = vpop.xlane.xlu0 %1160  ;;  %v1852_v43 = vmul.f32 1.442695, %v7023_v56 }
 0x5bb   : > { %v1185_v49 = vadd.f32 %v1161_v41, %v1137_v46  ;;  %2029 = vadd.xlane.f32.xlu1 %v4046_v24  ;;  %v1129_v24 = vld [vmem:[#allocation3 + $0x78] sm:$0xff]  ;;  %v7027_v41 = vld [vmem:[#allocation66_spill] sm:$0xff] }
 0x5bc   : > { %v1145_v6 = vmul.f32 %v6248_v25, %v1129_v24  ;;  %4063 = vpow2.f32 %v1852_v43  ;;  %v1214_v46 = vld [vmem:[#allocation4 + $0x18] sm:$0xff]  ;;  %v1219_v43 = vld [vmem:[#allocation4 + $0x40] sm:$0xff] }
 0x5bd   : > { %1202 = vst.msk [vmem:[#allocation3 + $0x38] sm:$0xff] %vm1194_vm15, %v1185_v49  ;;  %v1213_v49 = vld [vmem:[#allocation4 + $0x10] sm:$0xff] }
 0x5be   : > { %2035 = vadd.xlane.f32.xlu0 %v4052_v2  ;;  %v1165_v39 = vpop.xlane.xlu0 %1164 }
 0x5bf   : > { %v1187_v48 = vadd.f32 %v1165_v39, %v1139_v44  ;;  %2033 = vadd.xlane.f32.xlu1 %v4050_v57  ;;  %v7026_v57 = vsub.f32 %v7024_v38, %v7025_v16  ;;  %v7028_v44 = vld [vmem:[#allocation37_spill] sm:$0xff] }
 0x5c1   : > { %1204 = vst.msk [vmem:[#allocation3 + $0x48] sm:$0xff] %vm1194_vm15, %v1187_v48  ;;  %v1850_v4 = vmul.f32 1.442695, %v7026_v57 }
 0x5c2   : > { %2039 = vadd.xlane.f32.xlu0 %v4056_v13  ;;  %v1167_v42 = vpop.xlane.xlu0 %1166  ;;  %v1212_v13 = vld [vmem:[#allocation4 + $0x8] sm:$0xff] }
 0x5c3   : > { %v1188_v19 = vadd.f32 %v1167_v42, %v1140_v15  ;;  %v1163_v21 = vpop.xlane.xlu1 %1162  ;;  %2037 = vadd.xlane.f32.xlu1 %v4054_v54  ;;  %v1211_v54 = vld [vmem:[#allocation4] sm:$0xff]  ;;  %4065 = vpow2.f32 %v1850_v4  ;;  %v1216_v15 = vld [vmem:[#allocation4 + $0x28] sm:$0xff]  ;;  %v7029_v42 = vld [vmem:[#allocation67_spill] sm:$0xff] }
 0x5c4   : > { %v1186_v33 = vadd.f32 %v1163_v21, %v1138_v14  ;;  %v7030_v21 = vld [vmem:[#allocation68_spill] sm:$0xff] }
 0x5c5   : > { %1205 = vst.msk [vmem:[#allocation3 + $0x50] sm:$0xff] %vm1194_vm15, %v1188_v19 }
 0x5c6   : > { %1203 = vst.msk [vmem:[#allocation3 + $0x40] sm:$0xff] %vm1194_vm15, %v1186_v33  ;;  %2043 = vadd.xlane.f32.xlu0 %v4060_v45  ;;  %v1171_v26 = vpop.xlane.xlu0 %1170  ;;  %v6375_v19 = vpop.eup %4063 }
 0x5c7   : > { %v1190_v50 = vadd.f32 %v1171_v26, %v1142_v18  ;;  %v1169_v59 = vpop.xlane.xlu1 %1168  ;;  %2041 = vadd.xlane.f32.xlu1 %v4058_v58 }
 0x5c8   : > { %v1189_v36 = vadd.f32 %v1169_v59, %v1141_v53  ;;  %v7031_v59 = vld [vmem:[#allocation69_spill] sm:$0xff] }
 0x5c9   : > { %1207 = vst.msk [vmem:[#allocation3 + $0x60] sm:$0xff] %vm1194_vm15, %v1190_v50  ;;  %v1218_v50 = vld [vmem:[#allocation4 + $0x38] sm:$0xff] }
 0x5ca   : > { %1206 = vst.msk [vmem:[#allocation3 + $0x58] sm:$0xff] %vm1194_vm15, %v1189_v36  ;;  %v1175_v31 = vpop.xlane.xlu0 %1174  ;;  %v1217_v36 = vld [vmem:[#allocation4 + $0x30] sm:$0xff] }
 0x5cb   : > { %v1192_v1 = vadd.f32 %v1175_v31, %v1144_v20  ;;  %v1173_v23 = vpop.xlane.xlu1 %1172  ;;  %2045 = vadd.xlane.f32.xlu1 %v4062_v34  ;;  %v7032_v20 = vld [vmem:[#allocation70_spill] sm:$0xff] }
 0x5cc   : > { %v1191_v7 = vadd.f32 %v1173_v23, %v1143_v12 }
 0x5cd   : > { %1209 = vst.msk [vmem:[#allocation3 + $0x70] sm:$0xff] %vm1194_vm15, %v1192_v1  ;;  %v6378_v18 = vpop.eup %4065 }
 0x5ce   : > { %1208 = vst.msk [vmem:[#allocation3 + $0x68] sm:$0xff] %vm1194_vm15, %v1191_v7  ;;  %v7034_v7 = vld [vmem:[#allocation72_spill] sm:$0xff] }
 0x5cf   : > { %v1177_v0 = vpop.xlane.xlu1 %1176 }
 0x5d0   : > { %v1193_v2 = vadd.f32 %v1177_v0, %v1145_v6  ;;  %v1222_v0 = vld [vmem:[#allocation4 + $0x58] sm:$0xff] }
 0x5d2   : > { %1210 = vst.msk [vmem:[#allocation3 + $0x78] sm:$0xff] %vm1194_vm15, %v1193_v2  ;;  %v1230_v58 = vpop.permute.xlu0 %1229  ;;  %v7035_v2 = vld [vmem:[#allocation73_spill] sm:$0xff] }
 0x5d3   : > { %v1307_v45 = vmul.f32 %v1230_v58, %v1211_v54  ;;  %v1235_v34 = vpop.permute.xlu1 %1234  ;;  %v7036_v58 = vld [vmem:[#allocation74_spill] sm:$0xff] }
 0x5d4   : > { %v1308_v52 = vmul.f32 %v1235_v34, %v1212_v13  ;;  %v1221_v13 = vld [vmem:[#allocation4 + $0x50] sm:$0xff] }
 0x5d5   : > { %v1468_v28 = vadd.f32 %v7027_v41, %v1307_v45 }
 0x5d6   : > { %v1469_v39 = vadd.f32 %v7028_v44, %v1308_v52  ;;  %v1245_v22 = vpop.permute.xlu0 %1244 }
 0x5d7   : > { %1484 = vst.msk [vmem:[#allocation4] sm:$0xff] %vm616_vm3, %v1468_v28  ;;  %v1310_v25 = vmul.f32 %v1245_v22, %v1214_v46  ;;  %v1240_v48 = vpop.permute.xlu1 %1239  ;;  %v1224_v28 = vld [vmem:[#allocation4 + $0x68] sm:$0xff]  ;;  %v7038_v22 = vld [vmem:[#allocation76_spill] sm:$0xff] }
 0x5d8   : > { %1485 = vst.msk [vmem:[#allocation4 + $0x8] sm:$0xff] %vm616_vm3, %v1469_v39  ;;  %v1309_v27 = vmul.f32 %v1240_v48, %v1213_v49  ;;  %v7037_v49 = vld [vmem:[#allocation75_spill] sm:$0xff]  ;;  %v1223_v39 = vld [vmem:[#allocation4 + $0x60] sm:$0xff] }
 0x5d9   : > { %v1471_v14 = vadd.f32 %v7029_v42, %v1310_v25 }
 0x5da   : > { %v1470_v17 = vadd.f32 %v7030_v21, %v1309_v27  ;;  %v1255_v33 = vpop.permute.xlu0 %1254 }
 0x5db   : > { %1487 = vst.msk [vmem:[#allocation4 + $0x18] sm:$0xff] %vm616_vm3, %v1471_v14  ;;  %v1312_v26 = vmul.f32 %v1255_v33, %v1216_v15  ;;  %v1250_v53 = vpop.permute.xlu1 %1249  ;;  %v1226_v14 = vld [vmem:[#allocation4 + $0x78] sm:$0xff]  ;;  %v7040_v33 = vld [vmem:[#allocation78_spill] sm:$0xff] }
 0x5dc   : > { %1486 = vst.msk [vmem:[#allocation4 + $0x10] sm:$0xff] %vm616_vm3, %v1470_v17  ;;  %v1311_v30 = vmul.f32 %v1250_v53, %v1215_v62  ;;  %2168 = vperm.xlu1 %3938, %v6378_v18   ;;  %2173 = vperm.xlu0 %3937, %v6375_v19   ;;  %v7039_v62 = vld [vmem:[#allocation77_spill] sm:$0xff]  ;;  %v1225_v17 = vld [vmem:[#allocation4 + $0x70] sm:$0xff] }
 0x5dd   : > { %v1473_v60 = vadd.f32 %v7031_v59, %v1312_v26 }
 0x5de   : > { %v1472_v31 = vadd.f32 %v7032_v20, %v1311_v30  ;;  %v1265_v12 = vpop.permute.xlu0 %1264  ;;  %v7042_v20 = vld [vmem:[#allocation80_spill] sm:$0xff] }
 0x5df   : > { %1489 = vst.msk [vmem:[#allocation4 + $0x28] sm:$0xff] %vm616_vm3, %v1473_v60  ;;  %v1314_v1 = vmul.f32 %v1265_v12, %v1218_v50  ;;  %v1260_v23 = vpop.permute.xlu1 %1259  ;;  %v7041_v60 = vld [vmem:[#allocation79_spill] sm:$0xff] }
 0x5e0   : > { %1488 = vst.msk [vmem:[#allocation4 + $0x20] sm:$0xff] %vm616_vm3, %v1472_v31  ;;  %v1313_v24 = vmul.f32 %v1260_v23, %v1217_v36 }
 0x5e1   : > { %v1475_v56 = vadd.f32 %v7033_v47, %v1314_v1 }
 0x5e2   : > { %v1474_v38 = vadd.f32 %v7034_v7, %v1313_v24  ;;  %v1275_v16 = vpop.permute.xlu0 %1274 }
 0x5e3   : > { %1491 = vst.msk [vmem:[#allocation4 + $0x38] sm:$0xff] %vm616_vm3, %v1475_v56  ;;  %v1316_v57 = vmul.f32 %v1275_v16, %v1220_v32  ;;  %v1270_v4 = vpop.permute.xlu1 %1269 }
 0x5e4   : > { %1490 = vst.msk [vmem:[#allocation4 + $0x30] sm:$0xff] %vm616_vm3, %v1474_v38  ;;  %v1315_v6 = vmul.f32 %v1270_v4, %v1219_v43 }
 0x5e5   : > { %v1477_v54 = vadd.f32 %v7035_v2, %v1316_v57 }
 0x5e6   : > { %v1476_v45 = vadd.f32 %v7036_v58, %v1315_v6  ;;  %v1285_v34 = vpop.permute.xlu0 %1284  ;;  %v1984_v6 = vld [vmem:[#allocation3 + $0x88] sm:$0xff] }
 0x5e7   : > { %1493 = vst.msk [vmem:[#allocation4 + $0x48] sm:$0xff] %vm616_vm3, %v1477_v54  ;;  %v1318_v52 = vmul.f32 %v1285_v34, %v1222_v0  ;;  %v1280_v46 = vpop.permute.xlu1 %1279  ;;  %v2000_v0 = vmul.f32 %v6258_v61, %v1984_v6  ;;  %v1985_v54 = vld [vmem:[#allocation3 + $0x90] sm:$0xff] }
 0x5e8   : > { %1492 = vst.msk [vmem:[#allocation4 + $0x40] sm:$0xff] %vm616_vm3, %v1476_v45  ;;  %v1317_v41 = vmul.f32 %v1280_v46, %v1221_v13  ;;  %v1983_v45 = vld [vmem:[#allocation3 + $0x80] sm:$0xff]  ;;  %v2001_v34 = vmul.f32 %v6274_v10, %v1985_v54 }
 0x5e9   : > { %v1479_v44 = vadd.f32 %v7037_v49, %v1318_v52  ;;  %v1999_v46 = vmul.f32 %v6264_v8, %v1983_v45 }
 0x5ea   : > { %v1478_v25 = vadd.f32 %v7038_v22, %v1317_v41  ;;  %v1295_v48 = vpop.permute.xlu0 %1294  ;;  %v1987_v41 = vld [vmem:[#allocation3 + $0xa0] sm:$0xff] }
 0x5eb   : > { %1495 = vst.msk [vmem:[#allocation4 + $0x58] sm:$0xff] %vm616_vm3, %v1479_v44  ;;  %v1320_v27 = vmul.f32 %v1295_v48, %v1224_v28  ;;  %v1290_v15 = vpop.permute.xlu1 %1289  ;;  %v1986_v44 = vld [vmem:[#allocation3 + $0x98] sm:$0xff]  ;;  %v2003_v61 = vmul.f32 %v6290_v3, %v1987_v41  ;;  %v1989_v48 = vld [vmem:[#allocation3 + $0xb0] sm:$0xff]  ;;  %v1991_v3 = vld [vmem:[#allocation3 + $0xc0] sm:$0xff] }
 0x5ec   : > { %1494 = vst.msk [vmem:[#allocation4 + $0x50] sm:$0xff] %vm616_vm3, %v1478_v25  ;;  %v1319_v42 = vmul.f32 %v1290_v15, %v1223_v39  ;;  %v2002_v25 = vmul.f32 %v6272_v35, %v1986_v44  ;;  %v1988_v15 = vld [vmem:[#allocation3 + $0xa8] sm:$0xff]  ;;  %v2005_v8 = vmul.f32 %v6301_v51, %v1989_v48  ;;  %v2007_v35 = vmul.f32 %v6314_v55, %v1991_v3  ;;  %v1993_v51 = vld [vmem:[#allocation3 + $0xd0] sm:$0xff]  ;;  %v1995_v55 = vld [vmem:[#allocation3 + $0xe0] sm:$0xff] }
 0x5ed   : > { %v1481_v21 = vadd.f32 %v7039_v62, %v1320_v27  ;;  %v2004_v62 = vmul.f32 %v6285_v9, %v1988_v15  ;;  %v2009_v9 = vmul.f32 %v6326_v40, %v1993_v51  ;;  %v1997_v40 = vld [vmem:[#allocation3 + $0xf0] sm:$0xff]  ;;  %v2081_v41 = vld [vmem:[#allocation4 + $0x88] sm:$0xff] }
 0x5ee   : > { %v1480_v26 = vadd.f32 %v7040_v33, %v1319_v42  ;;  %v1305_v53 = vpop.permute.xlu0 %1304  ;;  %v1990_v33 = vld [vmem:[#allocation3 + $0xb8] sm:$0xff]  ;;  %v2085_v3 = vld [vmem:[#allocation4 + $0xa8] sm:$0xff]  ;;  %v2086_v51 = vld [vmem:[#allocation4 + $0xb0] sm:$0xff] }
 0x5ef   : > { %1497 = vst.msk [vmem:[#allocation4 + $0x68] sm:$0xff] %vm616_vm3, %v1481_v21  ;;  %v1322_v30 = vmul.f32 %v1305_v53, %v1226_v14  ;;  %v1300_v50 = vpop.permute.xlu1 %1299 }
 0x5f0   : > { %1496 = vst.msk [vmem:[#allocation4 + $0x60] sm:$0xff] %vm616_vm3, %v1480_v26  ;;  %v1321_v59 = vmul.f32 %v1300_v50, %v1225_v17 }
 0x5f1   : > { %v1483_v36 = vadd.f32 %v7041_v60, %v1322_v30  ;;  %v2006_v30 = vmul.f32 %v6299_v11, %v1990_v33  ;;  %v1992_v60 = vld [vmem:[#allocation3 + $0xc8] sm:$0xff]  ;;  %v2011_v11 = vmul.f32 %v6334_v29, %v1995_v55 }
 0x5f2   : > { %v1482_v31 = vadd.f32 %v7042_v20, %v1321_v59  ;;  %v6408_v12 = vpop.permute.xlu0 %2098 }
 0x5f3   : > { %1499 = vst.msk [vmem:[#allocation4 + $0x78] sm:$0xff] %vm616_vm3, %v1483_v36  ;;  %v6410_v1 = vpop.permute.xlu1 %2103 }
 0x5f4   : > { %1498 = vst.msk [vmem:[#allocation4 + $0x70] sm:$0xff] %vm616_vm3, %v1482_v31  ;;  %v2008_v31 = vmul.f32 %v6305_v63, %v1992_v60 }
 0x5f6   : > { %v6412_v23 = vpop.permute.xlu0 %2113 }
 0x5f7   : > { %v6414_v24 = vpop.permute.xlu1 %2108 }
 0x5fa   : > { %v6416_v32 = vpop.permute.xlu0 %2123 }
 0x5fb   : > { %v6418_v47 = vpop.permute.xlu1 %2118 }
 0x5fe   : > { %v6420_v56 = vpop.permute.xlu0 %2133 }
 0x5ff   : > { %v6422_v43 = vpop.permute.xlu1 %2128 }
 0x602   : > { %v6424_v7 = vpop.permute.xlu0 %2143 }
 0x603   : > { %v6426_v38 = vpop.permute.xlu1 %2138 }
 0x606   : > { %v6428_v16 = vpop.permute.xlu0 %2153 }
 0x607   : > { %v6430_v57 = vpop.permute.xlu1 %2148 }
 0x60a   : > { %v6432_v4 = vpop.permute.xlu0 %2163 }
 0x60b   : > { %v6435_v13 = vpop.permute.xlu1 %2158 }
 0x637   : > { %v2018_v2 = vpop.xlane.xlu0 %2017 }
 0x638   : > { %v2048_v58 = vadd.f32 %v2018_v2, %v2000_v0  ;;  %v1994_v2 = vld [vmem:[#allocation3 + $0xd8] sm:$0xff] }
 0x639   : > { %v2010_v45 = vmul.f32 %v6323_v5, %v1994_v2  ;;  %v2091_v2 = vld [vmem:[#allocation4 + $0xd8] sm:$0xff] }
 0x63a   : > { %2064 = vst.msk [vmem:[#allocation3 + $0x88] sm:$0xff] %vm1194_vm15, %v2048_v58 }
 0x63b   : > { %v2020_v52 = vpop.xlane.xlu0 %2019 }
 0x63c   : > { %v2049_v28 = vadd.f32 %v2020_v52, %v2001_v34  ;;  %v2016_v49 = vpop.xlane.xlu1 %2015 }
 0x63d   : > { %v2047_v39 = vadd.f32 %v2016_v49, %v1999_v46  ;;  %v1996_v46 = vld [vmem:[#allocation3 + $0xe8] sm:$0xff]  ;;  %v2013_v49 = vmul.f32 %v6378_v18, %v1997_v40 }
 0x63e   : > { %2065 = vst.msk [vmem:[#allocation3 + $0x90] sm:$0xff] %vm1194_vm15, %v2049_v28  ;;  %v2080_v28 = vld [vmem:[#allocation4 + $0x80] sm:$0xff]  ;;  %v2012_v29 = vmul.f32 %v6330_v37, %v1996_v46 }
 0x63f   : > { %2063 = vst.msk [vmem:[#allocation3 + $0x80] sm:$0xff] %vm1194_vm15, %v2047_v39  ;;  %v2024_v22 = vpop.xlane.xlu0 %2023  ;;  %v2177_v39 = vmul.f32 %v6410_v1, %v2081_v41  ;;  %v2082_v1 = vld [vmem:[#allocation4 + $0x90] sm:$0xff] }
 0x640   : > { %v2051_v27 = vadd.f32 %v2024_v22, %v2003_v61  ;;  %v2022_v10 = vpop.xlane.xlu1 %2021  ;;  %v1998_v22 = vld [vmem:[#allocation3 + $0xf8] sm:$0xff] }
 0x641   : > { %v2050_v42 = vadd.f32 %v2022_v10, %v2002_v25  ;;  %v2176_v25 = vmul.f32 %v6408_v12, %v2080_v28 }
 0x642   : > { %2067 = vst.msk [vmem:[#allocation3 + $0xa0] sm:$0xff] %vm1194_vm15, %v2051_v27 }
 0x643   : > { %2066 = vst.msk [vmem:[#allocation3 + $0x98] sm:$0xff] %vm1194_vm15, %v2050_v42  ;;  %v2028_v14 = vpop.xlane.xlu0 %2027  ;;  %v2014_v42 = vmul.f32 %v6375_v19, %v1998_v22 }
 0x644   : > { %v2053_v21 = vadd.f32 %v2028_v14, %v2005_v8  ;;  %v2026_v17 = vpop.xlane.xlu1 %2025  ;;  %v2083_v8 = vld [vmem:[#allocation4 + $0x98] sm:$0xff] }
 0x645   : > { %v2052_v26 = vadd.f32 %v2026_v17, %v2004_v62  ;;  %v2179_v12 = vmul.f32 %v6412_v23, %v2083_v8  ;;  %v2178_v62 = vmul.f32 %v6414_v24, %v2082_v1  ;;  %v2084_v17 = vld [vmem:[#allocation4 + $0xa0] sm:$0xff] }
 0x646   : > { %2069 = vst.msk [vmem:[#allocation3 + $0xb0] sm:$0xff] %vm1194_vm15, %v2053_v21 }
 0x647   : > { %2068 = vst.msk [vmem:[#allocation3 + $0xa8] sm:$0xff] %vm1194_vm15, %v2052_v26  ;;  %v2032_v53 = vpop.xlane.xlu0 %2031 }
 0x648   : > { %v2055_v50 = vadd.f32 %v2032_v53, %v2007_v35  ;;  %v2030_v59 = vpop.xlane.xlu1 %2029  ;;  %v2181_v35 = vmul.f32 %v6416_v32, %v2085_v3  ;;  %v2180_v53 = vmul.f32 %v6418_v47, %v2084_v17 }
 0x649   : > { %v2054_v36 = vadd.f32 %v2030_v59, %v2006_v30  ;;  %v2087_v30 = vld [vmem:[#allocation4 + $0xb8] sm:$0xff] }
 0x64a   : > { %2071 = vst.msk [vmem:[#allocation3 + $0xc0] sm:$0xff] %vm1194_vm15, %v2055_v50  ;;  %v2183_v60 = vmul.f32 %v6420_v56, %v2087_v30 }
 0x64b   : > { %2070 = vst.msk [vmem:[#allocation3 + $0xb8] sm:$0xff] %vm1194_vm15, %v2054_v36  ;;  %v2036_v20 = vpop.xlane.xlu0 %2035  ;;  %v2182_v36 = vmul.f32 %v6422_v43, %v2086_v51 }
 0x64c   : > { %v2057_v6 = vadd.f32 %v2036_v20, %v2009_v9  ;;  %v2034_v0 = vpop.xlane.xlu1 %2033  ;;  %v2089_v9 = vld [vmem:[#allocation4 + $0xc8] sm:$0xff]  ;;  %v2088_v20 = vld [vmem:[#allocation4 + $0xc0] sm:$0xff] }
 0x64d   : > { %v2056_v54 = vadd.f32 %v2034_v0, %v2008_v31  ;;  %v2184_v0 = vmul.f32 %v6426_v38, %v2088_v20 }
 0x64e   : > { %2073 = vst.msk [vmem:[#allocation3 + $0xd0] sm:$0xff] %vm1194_vm15, %v2057_v6  ;;  %v2185_v6 = vmul.f32 %v6424_v7, %v2089_v9 }
 0x64f   : > { %2072 = vst.msk [vmem:[#allocation3 + $0xc8] sm:$0xff] %vm1194_vm15, %v2056_v54  ;;  %v2040_v58 = vpop.xlane.xlu0 %2039  ;;  %v2090_v54 = vld [vmem:[#allocation4 + $0xd0] sm:$0xff] }
 0x650   : > { %v2059_v34 = vadd.f32 %v2040_v58, %v2011_v11  ;;  %v2038_v52 = vpop.xlane.xlu1 %2037  ;;  %v2186_v40 = vmul.f32 %v6430_v57, %v2090_v54  ;;  %v2094_v57 = vld [vmem:[#allocation4 + $0xf0] sm:$0xff] }
 0x651   : > { %v2058_v63 = vadd.f32 %v2038_v52, %v2010_v45  ;;  %v2187_v45 = vmul.f32 %v6428_v16, %v2091_v2  ;;  %v2092_v52 = vld [vmem:[#allocation4 + $0xe0] sm:$0xff] }
 0x652   : > { %2075 = vst.msk [vmem:[#allocation3 + $0xe0] sm:$0xff] %vm1194_vm15, %v2059_v34  ;;  %v2093_v34 = vld [vmem:[#allocation4 + $0xe8] sm:$0xff]  ;;  %v2188_v28 = vmul.f32 %v6435_v13, %v2092_v52 }
 0x653   : > { %2074 = vst.msk [vmem:[#allocation3 + $0xd8] sm:$0xff] %vm1194_vm15, %v2058_v63  ;;  %v2044_v44 = vpop.xlane.xlu0 %2043  ;;  %v2189_v63 = vmul.f32 %v6432_v4, %v2093_v34 }
 0x654   : > { %v2061_v61 = vadd.f32 %v2044_v44, %v2013_v49  ;;  %v2042_v5 = vpop.xlane.xlu1 %2041  ;;  %v2095_v49 = vld [vmem:[#allocation4 + $0xf8] sm:$0xff] }
 0x655   : > { %v2060_v48 = vadd.f32 %v2042_v5, %v2012_v29  ;;  %v3573_v27 = vpop.f32.mrb[16].mxu0 }
 0x656   : > { %2077 = vst.msk [vmem:[#allocation3 + $0xf0] sm:$0xff] %vm1194_vm15, %v2061_v61  ;;  %v2338_v10 = vadd.f32 %v3573_v27, %v2177_v39  ;;  %v2258_v15 = vpop.f32.mrb[17].mxu0 }
 0x657   : > { %2076 = vst.msk [vmem:[#allocation3 + $0xe8] sm:$0xff] %vm1194_vm15, %v2060_v48  ;;  %v2337_v18 = vadd.f32 %v2258_v15, %v2176_v25 }
 0x658   : > { %2354 = vst.msk [vmem:[#allocation4 + $0x88] sm:$0xff] %vm616_vm3, %v2338_v10  ;;  %v2046_v37 = vpop.xlane.xlu1 %2045 }
 0x659   : > { %2353 = vst.msk [vmem:[#allocation4 + $0x80] sm:$0xff] %vm616_vm3, %v2337_v18  ;;  %v2062_v14 = vadd.f32 %v2046_v37, %v2014_v42 }
 0x65b   : > { %2078 = vst.msk [vmem:[#allocation3 + $0xf8] sm:$0xff] %vm1194_vm15, %v2062_v14  ;;  %v2174_v16 = vpop.permute.xlu0 %2173 }
 0x65c   : > { %v3576_v21 = vpop.f32.mrb[18].mxu0  ;;  %v2169_v29 = vpop.permute.xlu1 %2168  ;;  %v2191_v22 = vmul.f32 %v2174_v16, %v2095_v49 }
 0x65d   : > { %v2340_v33 = vadd.f32 %v3576_v21, %v2179_v12  ;;  %v2268_v26 = vpop.f32.mrb[19].mxu0  ;;  %v2190_v25 = vmul.f32 %v2169_v29, %v2094_v57 }
 0x65e   : > { %v2339_v19 = vadd.f32 %v2268_v26, %v2178_v62 }
 0x65f   : > { %2356 = vst.msk [vmem:[#allocation4 + $0x98] sm:$0xff] %vm616_vm3, %v2340_v33 }
 0x660   : > { %2355 = vst.msk [vmem:[#allocation4 + $0x90] sm:$0xff] %vm616_vm3, %v2339_v19  ;;  %v3579_v23 = vpop.f32.mrb[20].mxu0 }
 0x661   : > { %v2342_v50 = vadd.f32 %v3579_v23, %v2181_v35  ;;  %v2278_v59 = vpop.f32.mrb[21].mxu0 }
 0x662   : > { %v2341_v24 = vadd.f32 %v2278_v59, %v2180_v53 }
 0x663   : > { %2358 = vst.msk [vmem:[#allocation4 + $0xa8] sm:$0xff] %vm616_vm3, %v2342_v50 }
 0x664   : > { %2357 = vst.msk [vmem:[#allocation4 + $0xa0] sm:$0xff] %vm616_vm3, %v2341_v24  ;;  %v3582_v32 = vpop.f32.mrb[22].mxu0 }
 0x665   : > { %v2344_v47 = vadd.f32 %v3582_v32, %v2183_v60  ;;  %v2288_v31 = vpop.f32.mrb[23].mxu0 }
 0x666   : > { %v2343_v55 = vadd.f32 %v2288_v31, %v2182_v36 }
 0x667   : > { %2360 = vst.msk [vmem:[#allocation4 + $0xb8] sm:$0xff] %vm616_vm3, %v2344_v47 }
 0x668   : > { %2359 = vst.msk [vmem:[#allocation4 + $0xb0] sm:$0xff] %vm616_vm3, %v2343_v55  ;;  %v3585_v56 = vpop.f32.mrb[24].mxu0 }
 0x669   : > { %v2346_v43 = vadd.f32 %v3585_v56, %v2185_v6  ;;  %v2298_v11 = vpop.f32.mrb[25].mxu0 }
 0x66a   : > { %v2345_v58 = vadd.f32 %v2298_v11, %v2184_v0 }
 0x66b   : > { %2362 = vst.msk [vmem:[#allocation4 + $0xc8] sm:$0xff] %vm616_vm3, %v2346_v43 }
 0x66c   : > { %2361 = vst.msk [vmem:[#allocation4 + $0xc0] sm:$0xff] %vm616_vm3, %v2345_v58  ;;  %v3588_v7 = vpop.f32.mrb[26].mxu0 }
 0x66d   : > { %v2348_v38 = vadd.f32 %v3588_v7, %v2187_v45  ;;  %v2308_v46 = vpop.f32.mrb[27].mxu0 }
 0x66e   : > { %v2347_v41 = vadd.f32 %v2308_v46, %v2186_v40 }
 0x66f   : > { %2364 = vst.msk [vmem:[#allocation4 + $0xd8] sm:$0xff] %vm616_vm3, %v2348_v38 }
 0x670   : > { %2363 = vst.msk [vmem:[#allocation4 + $0xd0] sm:$0xff] %vm616_vm3, %v2347_v41  ;;  %v3591_v44 = vpop.f32.mrb[28].mxu0 }
 0x671   : > { %v2350_v39 = vadd.f32 %v3591_v44, %v2189_v63  ;;  %v2318_v61 = vpop.f32.mrb[29].mxu0 }
 0x672   : > { %v2349_v5 = vadd.f32 %v2318_v61, %v2188_v28 }
 0x673   : > { %2366 = vst.msk [vmem:[#allocation4 + $0xe8] sm:$0xff] %vm616_vm3, %v2350_v39 }
 0x674   : > { %2365 = vst.msk [vmem:[#allocation4 + $0xe0] sm:$0xff] %vm616_vm3, %v2349_v5  ;;  %v3594_v4 = vpop.f32.mrb[30].mxu0 }
 0x675   : > { %v2352_v48 = vadd.f32 %v3594_v4, %v2191_v22  ;;  %v2328_v27 = vpop.f32.mrb[31].mxu0 }
 0x676   : > { %v2351_v13 = vadd.f32 %v2328_v27, %v2190_v25 }
 0x677   : > { %2368 = vst.msk [vmem:[#allocation4 + $0xf8] sm:$0xff] %vm616_vm3, %v2352_v48 }
 0x678   : > { %2367 = vst.msk [vmem:[#allocation4 + $0xf0] sm:$0xff] %vm616_vm3, %v2351_v13 }
 0x679 PF: > { %s7043_s24 = sld [smem:[#allocation24_spill]] }
 0x67f   : > { %p3228_p9 = scmp.ne.s32.totalorder %s7043_s24, 1 }
 0x680   : > { %v2391_v10 = vld [vmem:[#allocation3 + $0x10] sm:$0xff] (!%p3228_p9)  ;;  %v2389_v15 = vld [vmem:[#allocation3] sm:$0xff] (!%p3228_p9)  ;;  %v2392_v18 = vld [vmem:[#allocation3 + $0x18] sm:$0xff] (!%p3228_p9)  ;;  %v4405_v42 = vmov (!%p3228_p9), 0   ;;  %vm2661_vm3 = vcmask (!%p3228_p9), 523264   ;;  %s4406_s19 = smov (!%p3228_p9), 64  }
 0x681   : > { %2388 = sbr.rel (%p3228_p9) target bundleno = 1977 (0x7b9), region = 60  ;;  %4068 = vset.pattern.permute.xlu1 (!%p3228_p9), %v4405_v42  ;;  %4067 = vset.pattern.permute.xlu0 (!%p3228_p9), %v4405_v42  ;;  %4069 = vrcp.f32 (!%p3228_p9), %v2391_v10  ;;  %v2390_v8 = vld [vmem:[#allocation3 + $0x8] sm:$0xff] (!%p3228_p9)  ;;  %v2393_v1 = vld [vmem:[#allocation3 + $0x20] sm:$0xff] (!%p3228_p9)  ;;  %v2396_v14 = vld [vmem:[#allocation3 + $0x38] sm:$0xff] (!%p3228_p9)  ;;  %vm2855_vm7 = vcmask (!%p3228_p9), 1048064  }
 0x682   : > { %4071 = vrcp.f32 (!%p3228_p9), %v2389_v15  ;;  %v2394_v37 = vld [vmem:[#allocation3 + $0x28] sm:$0xff] (!%p3228_p9)  ;;  %v2395_v12 = vld [vmem:[#allocation3 + $0x30] sm:$0xff] (!%p3228_p9)  ;;  %v2405_v62 = vld [vmem:[#allocation3 + $0x80] sm:$0xff] (!%p3228_p9) }
 0x683   : > { %4073 = vrcp.f32 (!%p3228_p9), %v2392_v18  ;;  %v2397_v3 = vld [vmem:[#allocation3 + $0x40] sm:$0xff] (!%p3228_p9)  ;;  %v2407_v21 = vld [vmem:[#allocation3 + $0x90] sm:$0xff] (!%p3228_p9)  ;;  %v6499_v33 = vld [vmem:[#allocation3 + $0x88] sm:$0xff] (!%p3228_p9) }
 0x684   : > { %4075 = vrcp.f32 (!%p3228_p9), %v2390_v8  ;;  %v2409_v50 = vld [vmem:[#allocation3 + $0xa0] sm:$0xff] (!%p3228_p9)  ;;  %v6502_v36 = vld [vmem:[#allocation3 + $0x98] sm:$0xff] (!%p3228_p9)  ;;  %v2411_v11 = vld [vmem:[#allocation3 + $0xb0] sm:$0xff] (!%p3228_p9) }
 0x685   : > { %4077 = vrcp.f32 (!%p3228_p9), %v2394_v37  ;;  %v2410_v7 = vld [vmem:[#allocation3 + $0xa8] sm:$0xff] (!%p3228_p9)  ;;  %v2413_v63 = vld [vmem:[#allocation3 + $0xc0] sm:$0xff] (!%p3228_p9)  ;;  %v2412_v57 = vld [vmem:[#allocation3 + $0xb8] sm:$0xff] (!%p3228_p9) }
 0x686   : > { %4079 = vrcp.f32 (!%p3228_p9), %v2393_v1  ;;  %v2415_v22 = vld [vmem:[#allocation3 + $0xd0] sm:$0xff] (!%p3228_p9)  ;;  %v2414_v13 = vld [vmem:[#allocation3 + $0xc8] sm:$0xff] (!%p3228_p9) }
 0x687   : > { %4081 = vrcp.f32 (!%p3228_p9), %v2396_v14 }
 0x688   : > { %4083 = vrcp.f32 %v2395_v12 }
 0x689   : > { %4085 = vrcp.f32 %v2405_v62 }
 0x68a   : > { %4087 = vrcp.f32 %v2397_v3 }
 0x68b   : > { %v4070_v17 = vpop.eup %4069  ;;  %4089 = vrcp.f32 %v2407_v21 }
 0x68c   : > { %v4072_v26 = vpop.eup %4071  ;;  %v2455_v19 = vmul.f32 %v4070_v17, %v2391_v10  ;;  %4091 = vrcp.f32 %v6499_v33 }
 0x68d   : > { %v4074_v35 = vpop.eup %4073  ;;  %v2453_v53 = vmul.f32 %v4072_v26, %v2389_v15  ;;  %4093 = vrcp.f32 %v2409_v50 }
 0x68e   : > { %v4076_v30 = vpop.eup %4075  ;;  %v2487_v23 = vsub.f32 2.0, %v2455_v19  ;;  %v2456_v51 = vmul.f32 %v4074_v35, %v2392_v18  ;;  %4095 = vrcp.f32 %v6502_v36 }
 0x68f   : > { %v4078_v59 = vpop.eup %4077  ;;  %v2485_v24 = vsub.f32 2.0, %v2453_v53  ;;  %v2454_v60 = vmul.f32 %v4076_v30, %v2390_v8  ;;  %4097 = vrcp.f32 %v2411_v11  ;;  %v2417_v8 = vld [vmem:[#allocation3 + $0xe0] sm:$0xff] }
 0x690   : > { %v4080_v9 = vpop.eup %4079  ;;  %v2519_v32 = vmul.f32 %v4070_v17, %v2487_v23  ;;  %v2488_v20 = vsub.f32 2.0, %v2456_v51  ;;  %v2458_v47 = vmul.f32 %v4078_v59, %v2394_v37  ;;  %4099 = vrcp.f32 %v2410_v7  ;;  %v2418_v23 = vld [vmem:[#allocation3 + $0xe8] sm:$0xff] }
 0x691   : > { %v4082_v31 = vpop.eup %4081  ;;  %v2517_v55 = vmul.f32 %v4072_v26, %v2485_v24  ;;  %v2486_v6 = vsub.f32 2.0, %v2454_v60  ;;  %v2457_v0 = vmul.f32 %v4080_v9, %v2393_v1  ;;  %4101 = vrcp.f32 %v2413_v63  ;;  %v2419_v26 = vld [vmem:[#allocation3 + $0xf0] sm:$0xff]  ;;  %v2398_v60 = vld [vmem:[#allocation3 + $0x48] sm:$0xff] }
 0x692   : > { %v4084_v2 = vpop.eup %4083  ;;  %2577 = vperm.xlu1 %4068, %v2519_v32   ;;  %v2520_v56 = vmul.f32 %v4074_v35, %v2488_v20  ;;  %v2490_v54 = vsub.f32 2.0, %v2458_v47  ;;  %v2460_v43 = vmul.f32 %v4082_v31, %v2396_v14  ;;  %4103 = vrcp.f32 %v2412_v57  ;;  %v2420_v47 = vld [vmem:[#allocation3 + $0xf8] sm:$0xff] }
 0x693   : > { %v4086_v58 = vpop.eup %4085  ;;  %2567 = vperm.xlu0 %4067, %v2517_v55   ;;  %v2518_v45 = vmul.f32 %v4076_v30, %v2486_v6  ;;  %v2489_v40 = vsub.f32 2.0, %v2457_v0  ;;  %v2459_v34 = vmul.f32 %v4084_v2, %v2395_v12  ;;  %4105 = vrcp.f32 %v2415_v22 }
 0x694   : > { %v4088_v52 = vpop.eup %4087  ;;  %v2522_v38 = vmul.f32 %v4078_v59, %v2490_v54  ;;  %v2492_v46 = vsub.f32 2.0, %v2460_v43  ;;  %v2469_v41 = vmul.f32 %v4086_v58, %v2405_v62  ;;  %4107 = vrcp.f32 %v2414_v13  ;;  %v2416_v62 = vld [vmem:[#allocation3 + $0xd8] sm:$0xff] }
 0x695   : > { %v4090_v28 = vpop.eup %4089  ;;  %v2521_v49 = vmul.f32 %v4080_v9, %v2489_v40  ;;  %v2491_v16 = vsub.f32 2.0, %v2459_v34  ;;  %v2461_v44 = vmul.f32 %v4088_v52, %v2397_v3  ;;  %4109 = vrcp.f32 %v2417_v8 }
 0x696   : > { %2582 = vperm.xlu1 %4068, %v2520_v56   ;;  %v4092_v29 = vpop.eup %4091  ;;  %v2524_v39 = vmul.f32 %v4082_v31, %v2492_v46  ;;  %v2501_v61 = vsub.f32 2.0, %v2469_v41  ;;  %v2471_v5 = vmul.f32 %v4090_v28, %v2407_v21  ;;  %4111 = vrcp.f32 %v2416_v62 }
 0x697   : > { %2572 = vperm.xlu0 %4067, %v2518_v45   ;;  %v4094_v25 = vpop.eup %4093  ;;  %v2523_v4 = vmul.f32 %v4084_v2, %v2491_v16  ;;  %v2493_v48 = vsub.f32 2.0, %v2461_v44  ;;  %v2470_v27 = vmul.f32 %v4092_v29, %v6499_v33  ;;  %4113 = vrcp.f32 %v2419_v26  ;;  %v2400_v2 = vld [vmem:[#allocation3 + $0x58] sm:$0xff] }
 0x698   : > { %v4096_v10 = vpop.eup %4095  ;;  %v2533_v15 = vmul.f32 %v4086_v58, %v2501_v61  ;;  %v2503_v18 = vsub.f32 2.0, %v2471_v5  ;;  %v2473_v42 = vmul.f32 %v4094_v25, %v2409_v50  ;;  %4115 = vrcp.f32 %v2418_v23  ;;  %v2399_v58 = vld [vmem:[#allocation3 + $0x50] sm:$0xff] }
 0x699   : > { %v4098_v37 = vpop.eup %4097  ;;  %v2525_v1 = vmul.f32 %v4088_v52, %v2493_v48  ;;  %v2502_v14 = vsub.f32 2.0, %v2470_v27  ;;  %v2472_v12 = vmul.f32 %v4096_v10, %v6502_v36  ;;  %4117 = vrcp.f32 %v2398_v60  ;;  %v2402_v52 = vld [vmem:[#allocation3 + $0x68] sm:$0xff] }
 0x69a   : > { %2592 = vperm.xlu1 %4068, %v2522_v38   ;;  %v4100_v3 = vpop.eup %4099  ;;  %v2535_v21 = vmul.f32 %v4090_v28, %v2503_v18  ;;  %v2505_v17 = vsub.f32 2.0, %v2473_v42  ;;  %v2475_v33 = vmul.f32 %v4098_v37, %v2411_v11  ;;  %4119 = vrcp.f32 %v2420_v47  ;;  %v2401_v28 = vld [vmem:[#allocation3 + $0x60] sm:$0xff] }
 0x69b   : > { %2587 = vperm.xlu0 %4067, %v2521_v49   ;;  %v4102_v19 = vpop.eup %4101  ;;  %v2534_v35 = vmul.f32 %v4092_v29, %v2502_v14  ;;  %v2504_v53 = vsub.f32 2.0, %v2472_v12  ;;  %v2474_v30 = vmul.f32 %v4100_v3, %v2410_v7  ;;  %4121 = vrcp.f32 %v2400_v2  ;;  %v2404_v29 = vld [vmem:[#allocation3 + $0x78] sm:$0xff] }
 0x69c   : > { %v4104_v51 = vpop.eup %4103  ;;  %v2537_v50 = vmul.f32 %v4094_v25, %v2505_v17  ;;  %v2507_v59 = vsub.f32 2.0, %v2475_v33  ;;  %v2477_v24 = vmul.f32 %v4102_v19, %v2413_v63  ;;  %4123 = vrcp.f32 %v2399_v58  ;;  %v2403_v25 = vld [vmem:[#allocation3 + $0x70] sm:$0xff] }
 0x69d   : > { %v4106_v36 = vpop.eup %4105  ;;  %v2536_v9 = vmul.f32 %v4096_v10, %v2504_v53  ;;  %v2506_v32 = vsub.f32 2.0, %v2474_v30  ;;  %v2476_v20 = vmul.f32 %v4104_v51, %v2412_v57  ;;  %4125 = vrcp.f32 %v2402_v52 }
 0x69e   : > { %2602 = vperm.xlu1 %4068, %v2524_v39   ;;  %v4108_v31 = vpop.eup %4107  ;;  %v2539_v55 = vmul.f32 %v4098_v37, %v2507_v59  ;;  %v2509_v6 = vsub.f32 2.0, %v2477_v24  ;;  %v2479_v0 = vmul.f32 %v4106_v36, %v2415_v22  ;;  %4127 = vrcp.f32 %v2401_v28 }
 0x69f   : > { %2597 = vperm.xlu0 %4067, %v2523_v4   ;;  %v4110_v56 = vpop.eup %4109  ;;  %v2538_v54 = vmul.f32 %v4100_v3, %v2506_v32  ;;  %v2508_v43 = vsub.f32 2.0, %v2476_v20  ;;  %v2478_v11 = vmul.f32 %v4108_v31, %v2414_v13  ;;  %4129 = vrcp.f32 %v2404_v29 }
 0x6a0   : > { %v4112_v45 = vpop.eup %4111  ;;  %v2541_v40 = vmul.f32 %v4102_v19, %v2509_v6  ;;  %v2511_v34 = vsub.f32 2.0, %v2479_v0  ;;  %v2481_v7 = vmul.f32 %v4110_v56, %v2417_v8  ;;  %4131 = vrcp.f32 %v2403_v25  ;;  %v2551_v0 = vld [vmem:[#allocation4 + $0x10] sm:$0xff] }
 0x6a1   : > { %v4114_v38 = vpop.eup %4113  ;;  %v2540_v46 = vmul.f32 %v4104_v51, %v2508_v43  ;;  %v2510_v41 = vsub.f32 2.0, %v2478_v11  ;;  %v2480_v63 = vmul.f32 %v4112_v45, %v2416_v62 }
 0x6a2   : > { %2697 = vperm.xlu1 %4068, %v2533_v15   ;;  %v4116_v49 = vpop.eup %4115  ;;  %v2543_v16 = vmul.f32 %v4106_v36, %v2511_v34  ;;  %v2513_v44 = vsub.f32 2.0, %v2481_v7  ;;  %v2483_v57 = vmul.f32 %v4114_v38, %v2419_v26 }
 0x6a3   : > { %2607 = vperm.xlu0 %4067, %v2525_v1   ;;  %v4118_v39 = vpop.eup %4117  ;;  %v2542_v61 = vmul.f32 %v4108_v31, %v2510_v41  ;;  %v2512_v5 = vsub.f32 2.0, %v2480_v63  ;;  %v2482_v22 = vmul.f32 %v4116_v49, %v2418_v23 }
 0x6a4   : > { %v4120_v4 = vpop.eup %4119  ;;  %v2545_v48 = vmul.f32 %v4110_v56, %v2513_v44  ;;  %v2515_v27 = vsub.f32 2.0, %v2483_v57  ;;  %v2462_v13 = vmul.f32 %v4118_v39, %v2398_v60  ;;  %v2555_v44 = vld [vmem:[#allocation4 + $0x30] sm:$0xff] }
 0x6a5   : > { %v4122_v10 = vpop.eup %4121  ;;  %v2544_v15 = vmul.f32 %v4112_v45, %v2512_v5  ;;  %v2514_v18 = vsub.f32 2.0, %v2482_v22  ;;  %v2484_v42 = vmul.f32 %v4120_v4, %v2420_v47  ;;  %v2550_v45 = vld [vmem:[#allocation4 + $0x8] sm:$0xff]  ;;  %v2679_v5 = vld [vmem:[#allocation4 + $0x80] sm:$0xff] }
 0x6a6   : > { %2707 = vperm.xlu1 %4068, %v2535_v21   ;;  %v4124_v8 = vpop.eup %4123  ;;  %v2547_v37 = vmul.f32 %v4114_v38, %v2515_v27  ;;  %v2494_v1 = vsub.f32 2.0, %v2462_v13  ;;  %v2464_v14 = vmul.f32 %v4122_v10, %v2400_v2  ;;  %v2549_v2 = vld [vmem:[#allocation4] sm:$0xff]  ;;  %v2554_v38 = vld [vmem:[#allocation4 + $0x28] sm:$0xff]  ;;  %v2681_v13 = vld [vmem:[#allocation4 + $0x90] sm:$0xff] }
 0x6a7   : > { %2702 = vperm.xlu0 %4067, %v2534_v35   ;;  %v4126_v12 = vpop.eup %4125  ;;  %v2546_v62 = vmul.f32 %v4116_v49, %v2514_v18  ;;  %v2516_v3 = vsub.f32 2.0, %v2484_v42  ;;  %v2463_v21 = vmul.f32 %v4124_v8, %v2399_v58  ;;  %v2552_v58 = vld [vmem:[#allocation4 + $0x18] sm:$0xff]  ;;  %v2557_v22 = vld [vmem:[#allocation4 + $0x40] sm:$0xff] }
 0x6a8   : > { %v4128_v17 = vpop.eup %4127  ;;  %v2526_v33 = vmul.f32 %v4118_v39, %v2494_v1  ;;  %v2496_v26 = vsub.f32 2.0, %v2464_v14  ;;  %v2466_v19 = vmul.f32 %v4126_v12, %v2402_v52  ;;  %v2682_v1 = vld [vmem:[#allocation4 + $0x98] sm:$0xff] }
 0x6a9   : > { %v4130_v35 = vpop.eup %4129  ;;  %v2548_v53 = vmul.f32 %v4120_v4, %v2516_v3  ;;  %v2495_v30 = vsub.f32 2.0, %v2463_v21  ;;  %v2465_v23 = vmul.f32 %v4128_v17, %v2401_v28  ;;  %v2685_v21 = vld [vmem:[#allocation4 + $0xb0] sm:$0xff] }
 0x6aa   : > { %2717 = vperm.xlu1 %4068, %v2537_v50   ;;  %v4132_v51 = vpop.eup %4131  ;;  %v2528_v50 = vmul.f32 %v4122_v10, %v2496_v26  ;;  %v2498_v59 = vsub.f32 2.0, %v2466_v19  ;;  %v2468_v24 = vmul.f32 %v4130_v35, %v2404_v29  ;;  %v2680_v10 = vld [vmem:[#allocation4 + $0x88] sm:$0xff] }
 0x6ab   : > { %2712 = vperm.xlu0 %4067, %v2536_v9   ;;  %v2527_v60 = vmul.f32 %v4124_v8, %v2495_v30  ;;  %v2497_v36 = vsub.f32 2.0, %v2465_v23  ;;  %v2467_v9 = vmul.f32 %v4132_v51, %v2403_v25  ;;  %v2686_v30 = vld [vmem:[#allocation4 + $0xb8] sm:$0xff] }
 0x6ac   : > { %v2530_v32 = vmul.f32 %v4126_v12, %v2498_v59  ;;  %v2500_v20 = vsub.f32 2.0, %v2468_v24  ;;  %v2689_v24 = vld [vmem:[#allocation4 + $0xd0] sm:$0xff] }
 0x6ad   : > { %v2529_v47 = vmul.f32 %v4128_v17, %v2497_v36  ;;  %v2499_v31 = vsub.f32 2.0, %v2467_v9  ;;  %v2684_v17 = vld [vmem:[#allocation4 + $0xa8] sm:$0xff] }
 0x6ae   : > { %2727 = vperm.xlu1 %4068, %v2539_v55   ;;  %v2532_v55 = vmul.f32 %v4130_v35, %v2500_v20 }
 0x6af   : > { %2722 = vperm.xlu0 %4067, %v2538_v54   ;;  %v2531_v6 = vmul.f32 %v4132_v51, %v2499_v31  ;;  %v2690_v31 = vld [vmem:[#allocation4 + $0xd8] sm:$0xff] }
 0x6b2   : > { %2737 = vperm.xlu1 %4068, %v2541_v40  }
 0x6b3   : > { %2732 = vperm.xlu0 %4067, %v2540_v46   ;;  %v2553_v46 = vld [vmem:[#allocation4 + $0x20] sm:$0xff] }
 0x6b6   : > { %2747 = vperm.xlu1 %4068, %v2543_v16   ;;  %v2556_v16 = vld [vmem:[#allocation4 + $0x38] sm:$0xff] }
 0x6b7   : > { %2742 = vperm.xlu0 %4067, %v2542_v61  }
 0x6ba   : > { %2757 = vperm.xlu1 %4068, %v2545_v48  }
 0x6bb   : > { %2752 = vperm.xlu0 %4067, %v2544_v15  }
 0x6be   : > { %2767 = vperm.xlu1 %4068, %v2547_v37   ;;  %v2683_v37 = vld [vmem:[#allocation4 + $0xa0] sm:$0xff] }
 0x6bf   : > { %2762 = vperm.xlu0 %4067, %v2546_v62  }
 0x6c2   : > { %2612 = vperm.xlu1 %4068, %v2526_v33  }
 0x6c3   : > { %2772 = vperm.xlu0 %4067, %v2548_v53   ;;  %v2687_v53 = vld [vmem:[#allocation4 + $0xc0] sm:$0xff] }
 0x6c6   : > { %2622 = vperm.xlu1 %4068, %v2528_v50  }
 0x6c7   : > { %2617 = vperm.xlu0 %4067, %v2527_v60   ;;  %v2688_v60 = vld [vmem:[#allocation4 + $0xc8] sm:$0xff] }
 0x6ca   : > { %2632 = vperm.xlu1 %4068, %v2530_v32  }
 0x6cb   : > { %2627 = vperm.xlu0 %4067, %v2529_v47   ;;  %v2691_v47 = vld [vmem:[#allocation4 + $0xe0] sm:$0xff] }
 0x6ce   : > { %2642 = vperm.xlu1 %4068, %v2532_v55  }
 0x6cf   : > { %2637 = vperm.xlu0 %4067, %v2531_v6  }
 0x711   : > { %v2578_v56 = vpop.permute.xlu1 %2577 }
 0x712   : > { %v2647_v54 = vmul.f32 %v2578_v56, %v2551_v0  ;;  %v2568_v43 = vpop.permute.xlu0 %2567  ;;  %v2693_v56 = vld [vmem:[#allocation4 + $0xf0] sm:$0xff] }
 0x713   : > { %v2645_v11 = vmul.f32 %v2568_v43, %v2549_v2 }
 0x714   : > { %2664 = vst.msk [vmem:[%s4792_s12 + $0x10] sm:$0xff] %vm2661_vm3, %v2647_v54  ;;  %v2692_v54 = vld [vmem:[#allocation4 + $0xe8] sm:$0xff] }
 0x715   : > { %2662 = vst.msk [vmem:[%s4792_s12] sm:$0xff] %vm2661_vm3, %v2645_v11  ;;  %v2583_v40 = vpop.permute.xlu1 %2582 }
 0x716   : > { %v2648_v34 = vmul.f32 %v2583_v40, %v2552_v58  ;;  %v2573_v7 = vpop.permute.xlu0 %2572  ;;  %v2558_v40 = vld [vmem:[#allocation4 + $0x48] sm:$0xff] }
 0x717   : > { %v2646_v52 = vmul.f32 %v2573_v7, %v2550_v45 }
 0x718   : > { %2665 = vst.msk [vmem:[%s4792_s12 + $0x18] sm:$0xff] %vm2661_vm3, %v2648_v34  ;;  %v2694_v34 = vld [vmem:[#allocation4 + $0xf8] sm:$0xff] }
 0x719   : > { %2663 = vst.msk [vmem:[%s4792_s12 + $0x8] sm:$0xff] %vm2661_vm3, %v2646_v52  ;;  %v2593_v41 = vpop.permute.xlu1 %2592 }
 0x71a   : > { %v2650_v63 = vmul.f32 %v2593_v41, %v2554_v38  ;;  %v2588_v28 = vpop.permute.xlu0 %2587  ;;  %v2560_v41 = vld [vmem:[#allocation4 + $0x58] sm:$0xff] }
 0x71b   : > { %v2649_v49 = vmul.f32 %v2588_v28, %v2553_v46 }
 0x71c   : > { %2667 = vst.msk [vmem:[%s4792_s12 + $0x28] sm:$0xff] %vm2661_vm3, %v2650_v63  ;;  %v2559_v63 = vld [vmem:[#allocation4 + $0x50] sm:$0xff] }
 0x71d   : > { %2666 = vst.msk [vmem:[%s4792_s12 + $0x20] sm:$0xff] %vm2661_vm3, %v2649_v49  ;;  %v2603_v57 = vpop.permute.xlu1 %2602 }
 0x71e   : > { %v2652_v29 = vmul.f32 %v2603_v57, %v2556_v16  ;;  %v2598_v39 = vpop.permute.xlu0 %2597  ;;  %v2562_v57 = vld [vmem:[#allocation4 + $0x68] sm:$0xff] }
 0x71f   : > { %v2651_v61 = vmul.f32 %v2598_v39, %v2555_v44 }
 0x720   : > { %2669 = vst.msk [vmem:[%s4792_s12 + $0x38] sm:$0xff] %vm2661_vm3, %v2652_v29  ;;  %v2561_v29 = vld [vmem:[#allocation4 + $0x60] sm:$0xff] }
 0x721   : > { %2668 = vst.msk [vmem:[%s4792_s12 + $0x30] sm:$0xff] %vm2661_vm3, %v2651_v61  ;;  %v2698_v25 = vpop.permute.xlu1 %2697 }
 0x722   : > { %v2775_v4 = vmul.f32 %v2698_v25, %v2679_v5  ;;  %v2608_v48 = vpop.permute.xlu0 %2607  ;;  %v2564_v25 = vld [vmem:[#allocation4 + $0x78] sm:$0xff] }
 0x723   : > { %v2653_v27 = vmul.f32 %v2608_v48, %v2557_v22 }
 0x724   : > { %2807 = vrot.lane.b32.xlu0 %v2775_v4, %s4406_s19  ;;  %v2563_v4 = vld [vmem:[#allocation4 + $0x70] sm:$0xff] }
 0x725   : > { %2670 = vst.msk [vmem:[%s4792_s12 + $0x40] sm:$0xff] %vm2661_vm3, %v2653_v27  ;;  %v2708_v15 = vpop.permute.xlu1 %2707 }
 0x726   : > { %v2777_v18 = vmul.f32 %v2708_v15, %v2681_v13  ;;  %v2703_v42 = vpop.permute.xlu0 %2702 }
 0x727   : > { %v2776_v8 = vmul.f32 %v2703_v42, %v2680_v10 }
 0x728   : > { %2811 = vrot.lane.b32.xlu0 %v2777_v18, %s4406_s19 }
 0x729   : > { %2809 = vrot.lane.b32.xlu1 %v2776_v8, %s4406_s19  ;;  %v2718_v14 = vpop.permute.xlu1 %2717 }
 0x72a   : > { %v2779_v12 = vmul.f32 %v2718_v14, %v2683_v37  ;;  %v2713_v62 = vpop.permute.xlu0 %2712 }
 0x72b   : > { %v2778_v3 = vmul.f32 %v2713_v62, %v2682_v1 }
 0x72c   : > { %2815 = vrot.lane.b32.xlu0 %v2779_v12, %s4406_s19 }
 0x72d   : > { %2813 = vrot.lane.b32.xlu1 %v2778_v3, %s4406_s19  ;;  %v2728_v33 = vpop.permute.xlu1 %2727 }
 0x72e   : > { %v2781_v26 = vmul.f32 %v2728_v33, %v2685_v21  ;;  %v2723_v19 = vpop.permute.xlu0 %2722 }
 0x72f   : > { %v2780_v35 = vmul.f32 %v2723_v19, %v2684_v17 }
 0x730   : > { %2819 = vrot.lane.b32.xlu0 %v2781_v26, %s4406_s19 }
 0x731   : > { %2817 = vrot.lane.b32.xlu1 %v2780_v35, %s4406_s19  ;;  %v2738_v23 = vpop.permute.xlu1 %2737 }
 0x732   : > { %v2783_v51 = vmul.f32 %v2738_v23, %v2687_v53  ;;  %v2733_v50 = vpop.permute.xlu0 %2732 }
 0x733   : > { %v2782_v59 = vmul.f32 %v2733_v50, %v2686_v30 }
 0x734   : > { %2823 = vrot.lane.b32.xlu0 %v2783_v51, %s4406_s19 }
 0x735   : > { %2821 = vrot.lane.b32.xlu1 %v2782_v59, %s4406_s19  ;;  %v2748_v36 = vpop.permute.xlu1 %2747 }
 0x736   : > { %v2785_v9 = vmul.f32 %v2748_v36, %v2689_v24  ;;  %v2743_v32 = vpop.permute.xlu0 %2742 }
 0x737   : > { %v2784_v20 = vmul.f32 %v2743_v32, %v2688_v60 }
 0x738   : > { %2827 = vrot.lane.b32.xlu0 %v2785_v9, %s4406_s19 }
 0x739   : > { %2825 = vrot.lane.b32.xlu1 %v2784_v20, %s4406_s19  ;;  %v2758_v55 = vpop.permute.xlu1 %2757 }
 0x73a   : > { %v2787_v6 = vmul.f32 %v2758_v55, %v2691_v47  ;;  %v2753_v0 = vpop.permute.xlu0 %2752 }
 0x73b   : > { %v2786_v2 = vmul.f32 %v2753_v0, %v2690_v31 }
 0x73c   : > { %2831 = vrot.lane.b32.xlu0 %v2787_v6, %s4406_s19 }
 0x73d   : > { %2829 = vrot.lane.b32.xlu1 %v2786_v2, %s4406_s19  ;;  %v2768_v43 = vpop.permute.xlu1 %2767 }
 0x73e   : > { %v2789_v11 = vmul.f32 %v2768_v43, %v2693_v56  ;;  %v2763_v58 = vpop.permute.xlu0 %2762 }
 0x73f   : > { %v2788_v45 = vmul.f32 %v2763_v58, %v2692_v54 }
 0x740   : > { %2835 = vrot.lane.b32.xlu0 %v2789_v11, %s4406_s19 }
 0x741   : > { %2833 = vrot.lane.b32.xlu1 %v2788_v45, %s4406_s19  ;;  %v2613_v7 = vpop.permute.xlu1 %2612 }
 0x742   : > { %v2654_v52 = vmul.f32 %v2613_v7, %v2558_v40  ;;  %v2773_v38 = vpop.permute.xlu0 %2772 }
 0x743   : > { %v2790_v46 = vmul.f32 %v2773_v38, %v2694_v34 }
 0x744   : > { %2671 = vst.msk [vmem:[%s4792_s12 + $0x48] sm:$0xff] %vm2661_vm3, %v2654_v52 }
 0x745   : > { %2837 = vrot.lane.b32.xlu1 %v2790_v46, %s4406_s19  ;;  %v2623_v28 = vpop.permute.xlu1 %2622 }
 0x746   : > { %v2656_v49 = vmul.f32 %v2623_v28, %v2560_v41  ;;  %v2618_v16 = vpop.permute.xlu0 %2617 }
 0x747   : > { %v2655_v44 = vmul.f32 %v2618_v16, %v2559_v63 }
 0x748   : > { %2673 = vst.msk [vmem:[%s4792_s12 + $0x58] sm:$0xff] %vm2661_vm3, %v2656_v49 }
 0x749   : > { %2672 = vst.msk [vmem:[%s4792_s12 + $0x50] sm:$0xff] %vm2661_vm3, %v2655_v44  ;;  %v2633_v39 = vpop.permute.xlu1 %2632 }
 0x74a   : > { %v2658_v61 = vmul.f32 %v2633_v39, %v2562_v57  ;;  %v2628_v5 = vpop.permute.xlu0 %2627 }
 0x74b   : > { %v2657_v22 = vmul.f32 %v2628_v5, %v2561_v29 }
 0x74c   : > { %2675 = vst.msk [vmem:[%s4792_s12 + $0x68] sm:$0xff] %vm2661_vm3, %v2658_v61 }
 0x74d   : > { %2674 = vst.msk [vmem:[%s4792_s12 + $0x60] sm:$0xff] %vm2661_vm3, %v2657_v22  ;;  %v2643_v48 = vpop.permute.xlu1 %2642 }
 0x74e   : > { %v2660_v27 = vmul.f32 %v2643_v48, %v2564_v25  ;;  %v2638_v13 = vpop.permute.xlu0 %2637 }
 0x74f   : > { %v2659_v10 = vmul.f32 %v2638_v13, %v2563_v4 }
 0x750   : > { %2677 = vst.msk [vmem:[%s4792_s12 + $0x78] sm:$0xff] %vm2661_vm3, %v2660_v27 }
 0x751   : > { %2676 = vst.msk [vmem:[%s4792_s12 + $0x70] sm:$0xff] %vm2661_vm3, %v2659_v10 }
 0x796   : > { %v2808_v15 = vpop.permute.xlu0 %2807 }
 0x797   : > { %2856 = vst.msk [vmem:[%s4792_s12] sm:$0xff] %vm2855_vm7, %v2808_v15 }
 0x79a   : > { %v2812_v18 = vpop.permute.xlu0 %2811 }
 0x79b   : > { %v2810_v42 = vpop.permute.xlu1 %2809  ;;  %2858 = vst.msk [vmem:[%s4792_s12 + $0x10] sm:$0xff] %vm2855_vm7, %v2812_v18 }
 0x79c   : > { %2857 = vst.msk [vmem:[%s4792_s12 + $0x8] sm:$0xff] %vm2855_vm7, %v2810_v42 }
 0x79e   : > { %v2816_v8 = vpop.permute.xlu0 %2815 }
 0x79f   : > { %v2814_v37 = vpop.permute.xlu1 %2813  ;;  %2860 = vst.msk [vmem:[%s4792_s12 + $0x20] sm:$0xff] %vm2855_vm7, %v2816_v8 }
 0x7a0   : > { %2859 = vst.msk [vmem:[%s4792_s12 + $0x18] sm:$0xff] %vm2855_vm7, %v2814_v37 }
 0x7a2   : > { %v2820_v1 = vpop.permute.xlu0 %2819 }
 0x7a3   : > { %v2818_v14 = vpop.permute.xlu1 %2817  ;;  %2862 = vst.msk [vmem:[%s4792_s12 + $0x30] sm:$0xff] %vm2855_vm7, %v2820_v1 }
 0x7a4   : > { %2861 = vst.msk [vmem:[%s4792_s12 + $0x28] sm:$0xff] %vm2855_vm7, %v2818_v14 }
 0x7a6   : > { %v2824_v12 = vpop.permute.xlu0 %2823 }
 0x7a7   : > { %v2822_v62 = vpop.permute.xlu1 %2821  ;;  %2864 = vst.msk [vmem:[%s4792_s12 + $0x40] sm:$0xff] %vm2855_vm7, %v2824_v12 }
 0x7a8   : > { %2863 = vst.msk [vmem:[%s4792_s12 + $0x38] sm:$0xff] %vm2855_vm7, %v2822_v62 }
 0x7aa   : > { %v2828_v3 = vpop.permute.xlu0 %2827 }
 0x7ab   : > { %v2826_v21 = vpop.permute.xlu1 %2825  ;;  %2866 = vst.msk [vmem:[%s4792_s12 + $0x50] sm:$0xff] %vm2855_vm7, %v2828_v3 }
 0x7ac   : > { %2865 = vst.msk [vmem:[%s4792_s12 + $0x48] sm:$0xff] %vm2855_vm7, %v2826_v21 }
 0x7ae   : > { %v2832_v17 = vpop.permute.xlu0 %2831 }
 0x7af   : > { %v2830_v33 = vpop.permute.xlu1 %2829  ;;  %2868 = vst.msk [vmem:[%s4792_s12 + $0x60] sm:$0xff] %vm2855_vm7, %v2832_v17 }
 0x7b0   : > { %2867 = vst.msk [vmem:[%s4792_s12 + $0x58] sm:$0xff] %vm2855_vm7, %v2830_v33 }
 0x7b2   : > { %v2836_v26 = vpop.permute.xlu0 %2835 }
 0x7b3   : > { %v2834_v19 = vpop.permute.xlu1 %2833  ;;  %2870 = vst.msk [vmem:[%s4792_s12 + $0x70] sm:$0xff] %vm2855_vm7, %v2836_v26 }
 0x7b4   : > { %2869 = vst.msk [vmem:[%s4792_s12 + $0x68] sm:$0xff] %vm2855_vm7, %v2834_v19 }
 0x7b7   : > { %v2838_v35 = vpop.permute.xlu1 %2837 }
 0x7b8   : > { %2871 = vst.msk [vmem:[%s4792_s12 + $0x78] sm:$0xff] %vm2855_vm7, %v2838_v35 }
 0x7b9 PF: > { %s7044_s9 = sld [smem:[#allocation25_spill]]  ;;  %s7045_s14 = sld [smem:[#allocation26_spill]] }
 0x7ba   : > { %s2893_s1 = sshll.u32 %s4792_s12, 4  ;;  %s7046_s25 = sld [smem:[#allocation90_spill]]  ;;  %s6590_s1 = int_to_ptr.vmem [resolvable:$true] %s2893_s1 }
 0x7bb   : > { %s2873_s27 = scalar_lea.sflag [#allocation7], %s4769_s6  ;;  %s4223_s5 = scalar_lea.vmem %s6590_s1, 2048 }
 0x7bc   : > { %p4224_p13 = scmp.ne.s32.totalorder %s6590_s1, %s4223_s5  ;;  %p7048_p12 = scmp.ne.s32.totalorder %s6837_s3, 0 }
 0x7bd   : > { %s4407_s24 = smov [#allocation11]  }
 0x7be   : > { %p4225_p2 = pnand %p4224_p13, %p7048_p12  ;;  %s4227_s12 = sshll.u32 %s4407_s24, 4  ;;  %s4228_s12 = int_to_ptr.vmem [resolvable:$false] %s4227_s12 }
 0x7bf   : > { %s3242_s13 = sshll.u32 %s7044_s9, 5  ;;  %s4229_s19 = scalar_lea.vmem %s4228_s12, 4096 }
 0x7c0   : > { %s2890_s0 = sadd.s32 %s7045_s14, %s3242_s13  ;;  %s7047_s8 = smov %s7046_s25 }
 0x7c1   : > { %s3233_s11 = sshll.u32 %s2890_s0, 7  ;;  %p4226_p8 = pneg %p4225_p2 }
 0x7c2   : > { %s6595_s26 = scalar_lea.hbm %s7046_s25, %s3233_s11  ;;  %p4230_p1 = scmp.lt.s32.totalorder %s6590_s1, %s4228_s12 }
 0x7c3   : > { %p4231_p10 = scmp.lt.s32.totalorder %s4229_s19, %s4223_s5 }
 0x7c5   : > { %p4232_p3 = por %p4231_p10, %p4230_p1 }
 0x7c7   : > { %p4233_p11 = pnand %p4232_p3, %p4226_p8 }
 0x7c9   : > { %4236 = shalt.err (!%p4233_p11)
}
 0x7ca   : > { %s4237_s13 = scalar_lea.hbm %s6595_s26, 2048  ;;  %s4241_s20 = scalar_lea.hbm %s7047_s8, 8192 }
 0x7cb   : > { %p4238_p7 = scmp.ne.s32.totalorder %s6595_s26, %s4237_s13  ;;  %p4242_p4 = scmp.lt.u32.totalorder %s6595_s26, %s7047_s8 }
 0x7cc   : > { %p4243_p6 = scmp.lt.u32.totalorder %s4241_s20, %s4237_s13  ;;  %p4245_p13 = scmp.lt.u32.totalorder %s4237_s13, %s6595_s26 }
 0x7cd   : > { %p4239_p5 = pnand %p4238_p7, %p7048_p12 }
 0x7ce   : > { %p4244_p9 = por %p4243_p6, %p4242_p4 }
 0x7cf   : > { %p4240_p0 = pneg %p4239_p5 }
 0x7d0   : > { %p4246_p2 = por %p4245_p13, %p4244_p9 }
 0x7d2   : > { %p4247_p8 = pnand %p4246_p2, %p4240_p0 }
 0x7d4   : > { %4250 = shalt.err (!%p4247_p8)
}
 0x7d5   : > { %s4408_s5 = smov 128   ;;  %s4409_s12 = smov 256  }
 0x7d6   : > { %s4410_s19 = smov 8   ;;  %s2878_s0 = scalar_lea.sflag [#allocation13], %s340_s16 }
 0x7d7   : > { %3761 = dma.vmem_to_hbm [thread:$0]  (%p7048_p12), %s6590_s1, 2048, %s6595_s26, %s2873_s27, %s4408_s5, %s4409_s12, %s4410_s19  }
 0x7d8   : > { %s7050_s13 = sld [smem:[#allocation24_spill]]  ;;  %p2903_p1 = scmp.eq.s32.totalorder %s7044_s9, 0 }
 0x7d9   : > { %s3235_s11 = sshll.u32 %s7045_s14, 5  ;;  %s2929_s20 = sshll.u32 %s4794_s18, 4  ;;  %s2930_s20 = int_to_ptr.vmem [resolvable:$true] %s2929_s20 }
 0x7da   : > { %s4411_s3 = smov 2048   ;;  %p7051_p10 = scmp.ne.s32.totalorder %s6839_s28, 0 }
 0x7db   : > { %s4412_s1 = smov 8192   ;;  %s7052_s9 = sld [smem:[#allocation91_spill]] }
 0x7dc   : > { %3762 = sst [smem:[#allocation15]] (%p7051_p10), %s4411_s3  ;;  %s4413_s14 = smov 16  }
 0x7dd   : > { %3763 = sst [smem:[#allocation15 + $0x1]] (%p7051_p10), %s4412_s1  ;;  %s4414_s18 = smov 128  }
 0x7de   : > { %s7088_s13 = smov (!%p2903_p1, %s7050_s13), 1  ;;  %3764 = sst [smem:[#allocation15 + $0x2]] (%p7051_p10), %s4413_s14 }
 0x7df   : > { %s3234_s6 = sshll.u32 %s7088_s13, 4  ;;  %3765 = sst [smem:[#allocation15 + $0x3]] (%p7051_p10), %s4414_s18 }
 0x7e0   : > { %s2910_s16 = sadd.s32 %s3235_s11, %s3234_s6  ;;  %3766 = sst [smem:[#allocation15 + $0x4]] (%p7051_p10), %s4414_s18 }
 0x7e1   : > { %s3236_s26 = sshll.u32 %s2910_s16, 7  ;;  %s4415_s5 = smov 8  }
 0x7e2   : > { %s2912_s25 = scalar_lea.hbm %s7052_s9, %s3236_s26  ;;  %3767 = sst [smem:[#allocation15 + $0x5]] (%p7051_p10), %s4415_s5 }
 0x7e3   : > { %s4416_s24 = smov [#allocation14]   ;;  %s4417_s12 = smov 0  }
 0x7e4   : > { %3768 = dma.general (%p7051_p10), %s2930_s20, 4096, %s2912_s25, %s2878_s0, %s4416_s24, [#allocation15], %s4417_s12, 0  }
 0x7e5 PF: > { %p3789_p12 = scmp.ge.s32.totalorder %s4393_s30, 2  ;;  %s2957_s19 = sand.u32 1, %s4357_s21  }
 0x7e6   : > { %p7053_p3 = scmp.ne.s32.totalorder %s6838_s15, 0  ;;  %s2958_s13 = scalar_lea.sflag [#allocation7], %s2957_s19 }
 0x7e8   : > { %p3782_p11 = pnand %p3789_p12, %p7053_p3 }
 0x7ea   : > { %4324 = dma.done.wait (!%p3782_p11), %s2958_s13, 2048  }
 0x7eb   : > { %4326 = vsyncadd (!%p3782_p11), %s2958_s13, 4294965248  ;;  %s7054_s11 = sld [smem:[#allocation20_spill]]  ;;  %p7055_p7 = scmp.ne.s32.totalorder %s6840_s7, 0 }
 0x7ed   : > { %p3785_p5 = pnand %p3789_p12, %p7055_p7 }
 0x7f1   : > { %s2966_s3 = sand.u32 1, %s7054_s11  }
 0x7f2   : > { %s2967_s6 = scalar_lea.sflag [#allocation13], %s2966_s3 }
 0x7f3   : > { %4328 = dma.done.wait (!%p3785_p5), %s2967_s6, 4096  }
 0x7f4   : > { %4330 = vsyncadd (!%p3785_p5), %s2967_s6, 4294963200  ;;  %s27_s30 = sadd.s32 1, %s4393_s30   ;;  %s7057_s15 = sld [smem:[#allocation21_spill]] }
 0x7f5   : > { %p6652_p0 = scmp.ge.s32.totalorder %s27_s30, 10   ;;  %s7058_s21 = sld [smem:[#allocation35_spill]] }
 0x7f6   : > { %s7059_s18 = sld [smem:[#allocation22_spill]]  ;;  %s7060_s19 = sld [smem:[#allocation23_spill]] }
 0x7f7   : > { %s7061_s20 = sld [smem:[#allocation34_spill]]  ;;  %s7062_s0 = sld [smem:[#allocation36_spill]] }
 0x7f8   : > { %s7063_s24 = sld [smem:[#allocation27_spill]]  ;;  %s7064_s25 = sld [smem:[#allocation28_spill]] }
 0x7f9   : > { %s7065_s27 = sld [smem:[#allocation30_spill]]  ;;  %s7066_s7 = sld [smem:[#allocation31_spill]] }
 0x7fa   : > { %s7067_s1 = sld [smem:[#allocation33_spill]]  ;;  %s7069_s16 = smov %s4341_s17 }
 0x7fb   : > { %s7070_s17 = smov %s7058_s21  ;;  %s7071_s21 = smov %s4361_s22 }
 0x7fc   : > { %s7072_s22 = smov %s4365_s23  ;;  %s7074_s26 = smov %s4389_s29 }
 0x7fd   : > { %s7073_s23 = smov %s7062_s0  ;;  %26 = sbr.rel (!%p6652_p0) target bundleno = 20 (0x14), region = 144 }
 0x7ff   : > { %s7075_s28 = smov %s7066_s7 }
 0x800   : > { %s7076_s29 = smov %s7067_s1 }
 0x804   :  { %2972 = vsyncpa [#allocation6], 1 }
 0x805   :  { %2974 = vsyncpa [#allocation6 + $0x1], 1 }
 0x806   :  { %2975 = vsyncpa [#allocation9], 1 }
 0x807   :  { %2977 = vsyncpa [#allocation9 + $0x1], 1 }
 0x808   :  { %2978 = vsyncpa [#allocation7], 1 }
 0x809   :  { %2980 = vsyncpa [#allocation7 + $0x1], 1 }
 0x80a   :  { %2981 = vsyncpa [#allocation13], 1 }
 0x80b   :  { %2983 = vsyncpa [#allocation13 + $0x1], 1 }

</bundles_post_ra>
